<compile_context>
chip_gen: v5e
topology: v5e:2x2
jax: 0.10.0
libtpu: 0.0.40
codegen_flags: <defaults>
</compile_context>

<pallas_src>
import jax
import jax.numpy as jnp
from jax import lax
from jax.experimental import pallas as pl
from jax.experimental.pallas import tpu as pltpu

COMPUTE_DTYPE = jnp.bfloat16   # MXU operand / activation dtype (f32 accumulate)


def _round_up(x, m):
    return ((x + m - 1) // m) * m


# ----------------------------- Pallas kernel -----------------------------

def _make_fused_mm_kernel(n_parts, slope):
    """y = sum_t A_t @ W_t ;  y = y*scale + shift ;  optional LeakyReLU(slope)."""

    def kernel(*refs):
        a_refs = refs[:n_parts]
        w_refs = refs[n_parts:2 * n_parts]
        s_ref, b_ref, o_ref = refs[2 * n_parts:]
        y = jnp.dot(a_refs[0][...], w_refs[0][...],
                    preferred_element_type=jnp.float32)
        for t in range(1, n_parts):
            y = y + jnp.dot(a_refs[t][...], w_refs[t][...],
                            preferred_element_type=jnp.float32)
        y = y * s_ref[...] + b_ref[...]
        if slope is not None:
            y = jnp.where(y >= 0.0, y, jnp.float32(slope) * y)
        o_ref[...] = y.astype(o_ref.dtype)

    return kernel


def fused_matmul(parts, scale, shift, *, slope=None,
                 out_dtype=jnp.float32, tm=512):
    """parts: list of (A:(M,Kt), W:(Kt,N)) pairs. Returns (M, N) in out_dtype."""
    M = parts[0][0].shape[0]
    N = parts[0][1].shape[1]

    Mp8 = _round_up(M, 8)
    tm_eff = min(tm, Mp8)
    if tm_eff >= Mp8 and Mp8 >= 16:
        # always expose >=2 grid steps so both v7x TensorCores get work
        tm_eff = _round_up(Mp8 // 2, 8)
    Mp = _round_up(Mp8, tm_eff)

    a_args, in_specs = [], []
    for a, _ in parts:
        if Mp != M:
            a = jnp.pad(a, ((0, Mp - M), (0, 0)))
        a_args.append(a.astype(COMPUTE_DTYPE))
        in_specs.append(pl.BlockSpec((tm_eff, a.shape[1]), lambda i: (i, 0)))
    w_args = [w.astype(COMPUTE_DTYPE) for _, w in parts]
    w_specs = [pl.BlockSpec(w.shape, lambda i: (0, 0)) for w in w_args]
    sb_args = [scale.reshape(1, N).astype(jnp.float32),
               shift.reshape(1, N).astype(jnp.float32)]
    sb_specs = [pl.BlockSpec((1, N), lambda i: (0, 0))] * 2

    out = pl.pallas_call(
        _make_fused_mm_kernel(len(parts), slope),
        out_shape=jax.ShapeDtypeStruct((Mp, N), out_dtype),
        grid=(Mp // tm_eff,),
        in_specs=in_specs + w_specs + sb_specs,
        out_specs=pl.BlockSpec((tm_eff, N), lambda i: (i, 0)),
        compiler_params=pltpu.CompilerParams(
            dimension_semantics=("parallel",)),
    )(*a_args, *w_args, *sb_args)
    return out[:M] if Mp != M else out


# ----------------------------- layout glue -----------------------------

def _im2col_3x3(x, stride):
    """x: (B, H, W, C) NHWC -> patches (B*Ho*Wo, 9*C), row order (ky, kx, c)."""
    B, H, W, C = x.shape
    Ho = (H - 1) // stride + 1
    Wo = (W - 1) // stride + 1
    xp = jnp.pad(x, ((0, 0), (1, 1), (1, 1), (0, 0)))
    cols = []
    for ky in range(3):
        for kx in range(3):
            cols.append(lax.slice(
                xp,
                (0, ky, kx, 0),
                (B, ky + (Ho - 1) * stride + 1, kx + (Wo - 1) * stride + 1, C),
                (1, stride, stride, 1)))
    patches = jnp.concatenate(cols, axis=-1)
    return patches.reshape(B * Ho * Wo, 9 * C), Ho, Wo


def _run_block(xs, p, *, stride=1, slope=0.1, out_dtype=COMPUTE_DTYPE,
               upsample=False):
    """One U_net layer = im2col + one fused Pallas matmul (+ depth-to-space)."""
    B = xs[0].shape[0]
    parts, Ho, Wo = [], None, None
    for x, w in zip(xs, p["ws"]):
        patches, Ho, Wo = _im2col_3x3(x, stride)
        parts.append((patches, w))
    y = fused_matmul(parts, p["scale"], p["shift"],
                     slope=slope, out_dtype=out_dtype)
    if upsample:
        cout = y.shape[-1] // 4
        y = y.reshape(B, Ho, Wo, 2, 2, cout)                 # (.., py, px, c)
        y = jnp.transpose(y, (0, 1, 3, 2, 4, 5)).reshape(B, 2 * Ho, 2 * Wo, cout)
        return y
    return y.reshape(B, Ho, Wo, -1)


# -------------------- ConvTranspose2d(k=4,s=2,p=1) as 3x3 conv --------------------

# phase (oy%2) -> tuple of (dy, ky): output[2y+py] += x[y+dy] * Wt[..., ky, ...]
_PHASE_TAPS = {0: ((0, 1), (-1, 3)), 1: ((1, 0), (0, 2))}


def _deconv_to_conv_weight(wt, bias):
    """(Cin, Cout, 4, 4) ConvTranspose weight -> (3,3,Cin,4*Cout) conv weight
    (one Cout block per output phase py*2+px) and the replicated bias."""
    cin, cout = wt.shape[0], wt.shape[1]
    wc = jnp.zeros((3, 3, cin, 4, cout), jnp.float32)
    for py in (0, 1):
        for px in (0, 1):
            phase = py * 2 + px
            for dy, ky in _PHASE_TAPS[py]:
                for dx, kx in _PHASE_TAPS[px]:
                    wc = wc.at[dy + 1, dx + 1, :, phase, :].set(wt[:, :, ky, kx])
    return wc.reshape(3, 3, cin, 4 * cout), jnp.tile(bias, 4)


# ----------------------------- parameters -----------------------------

def init_unet_params(key, input_channels, output_channels, kernel_size=3):
    assert kernel_size == 3
    assert input_channels == output_channels, (
        "output_layer expects 2*output_channels input channels")
    C = output_channels
    keys = iter(jax.random.split(key, 64))

    def nrm(shape, scale):
        return scale * jax.random.normal(next(keys), shape, dtype=jnp.float32)

    def conv_block(cin, cout):
        # Conv2d(bias=False) + eval-mode BatchNorm2d folded into scale/shift.
        w = nrm((3, 3, cin, cout), (2.0 / (9 * cin)) ** 0.5)
        gamma = 1.0 + 0.1 * nrm((cout,), 1.0)
        beta = 0.1 * nrm((cout,), 1.0)
        mean = 0.1 * nrm((cout,), 1.0)
        var = 0.5 + jax.random.uniform(next(keys), (cout,), dtype=jnp.float32)
        scale = gamma / jnp.sqrt(var + 1e-5)
        shift = beta - mean * scale
        return {"ws": [w.reshape(9 * cin, cout).astype(COMPUTE_DTYPE)],
                "scale": scale, "shift": shift}

    def deconv_block(cins, cout):
        cin = sum(cins)
        wt = nrm((cin, cout, 4, 4), (1.0 / (16.0 * cin)) ** 0.5)
        bias = 0.1 * nrm((cout,), 1.0)
        wc, shift = _deconv_to_conv_weight(wt, bias)
        ws, off = [], 0
        for c in cins:        # split along Cin: fuses the torch.cat skip concat
            ws.append(wc[:, :, off:off + c, :]
                      .reshape(9 * c, 4 * cout).astype(COMPUTE_DTYPE))
            off += c
        return {"ws": ws, "scale": jnp.ones((4 * cout,), jnp.float32),
                "shift": shift}

    def output_block(cins, cout):
        cin = sum(cins)
        w = nrm((3, 3, cin, cout), (2.0 / (9 * cin)) ** 0.5)
        bias = 0.1 * nrm((cout,), 1.0)
        ws, off = [], 0
        for c in cins:
            ws.append(w[:, :, off:off + c, :]
                      .reshape(9 * c, cout).astype(COMPUTE_DTYPE))
            off += c
        return {"ws": ws, "scale": jnp.ones((cout,), jnp.float32),
                "shift": bias}

    return {
        "conv1": conv_block(input_channels, C),
        "conv2": conv_block(C, C),
        "conv2_1": conv_block(C, C),
        "conv3": conv_block(C, C),
        "conv3_1": conv_block(C, C),
        "deconv2": deconv_block([C], C),
        "deconv1": deconv_block([C, C], C),
        "deconv0": deconv_block([C, C], C),
        "output": output_block([input_channels, C], C),
    }


# ----------------------------- model forward -----------------------------

def unet_forward(params, x_nchw):
    # NCHW (PyTorch layout) -> NHWC (channels on lanes), bf16 activations.
    x = jnp.transpose(x_nchw, (0, 2, 3, 1)).astype(COMPUTE_DTYPE)

    out_conv1 = _run_block([x], params["conv1"], stride=2)
    out_conv2 = _run_block([_run_block([out_conv1], params["conv2"], stride=2)],
                           params["conv2_1"], stride=1)
    out_conv3 = _run_block([_run_block([out_conv2], params["conv3"], stride=2)],
                           params["conv3_1"], stride=1)

    out_deconv2 = _run_block([out_conv3], params["deconv2"],
                             upsample=True)[:, :, :71, :]
    # concat2 = cat(out_conv2, out_deconv2) -> fused into deconv1 (split weights)
    out_deconv1 = _run_block([out_conv2, out_deconv2], params["deconv1"],
                             upsample=True)[:, :, :141, :]
    # concat1 = cat(out_conv1, out_deconv1) -> fused into deconv0
    out_deconv0 = _run_block([out_conv1, out_deconv1], params["deconv0"],
                             upsample=True)
    # concat0 = cat(x, out_deconv0) -> fused into the output conv (f32, no act)
    out = _run_block([x, out_deconv0], params["output"],
                     slope=None, out_dtype=jnp.float32)
    return jnp.transpose(out, (0, 3, 1, 2))   # back to NCHW


# ----------------------------- main -----------------------------

if __name__ == "__main__":
    # U_net(input_channels=32, output_channels=32, kernel_size=3, dropout_rate=0)
    B, C, H, W = 2, 32, 16, 16
    key = jax.random.PRNGKey(0)
    kx, kp = jax.random.split(key)

    x = jax.random.normal(kx, (B, C, H, W), dtype=jnp.float32)
    params = init_unet_params(kp, input_channels=C, output_channels=C,
                              kernel_size=3)

    fwd = jax.jit(unet_forward)
    out = jax.block_until_ready(fwd(params, x))

    assert out.shape == (B, C, H, W), out.shape
    assert out.dtype == jnp.float32, out.dtype
    assert bool(jnp.all(jnp.isfinite(out)))
    print("KERNEL_OK")
</pallas_src>

<mosaic_0001>
module attributes {stable_mosaic.version = 11 : i64} {
  func.func @kernel(%arg0: i32, %arg1: memref<64x288xbf16, #tpu.memory_space<vmem>>, %arg2: memref<288x32xbf16, #tpu.memory_space<vmem>>, %arg3: memref<1x32xf32, #tpu.memory_space<vmem>>, %arg4: memref<1x32xf32, #tpu.memory_space<vmem>>, %arg5: memref<64x32xbf16, #tpu.memory_space<vmem>>) attributes {dimension_semantics = [#tpu.dimension_semantics<parallel>], iteration_bounds = array<i64: 2>, scalar_prefetch = 0 : i64, scratch_operands = 0 : i64, tpu.core_type = #tpu.core_type<tc>, window_params = [{transform_indices = @transform_0, window_bounds = array<i64: 64, 288>}, {pipeline_mode = #tpu.pipeline_mode<synchronous>, transform_indices = @transform_1, window_bounds = array<i64: 288, 32>}, {pipeline_mode = #tpu.pipeline_mode<synchronous>, transform_indices = @transform_2, window_bounds = array<i64: 1, 32>}, {pipeline_mode = #tpu.pipeline_mode<synchronous>, transform_indices = @transform_3, window_bounds = array<i64: 1, 32>}, {transform_indices = @transform_4, window_bounds = array<i64: 64, 32>}]} {
    %c0 = arith.constant 0 : index
    %c0_0 = arith.constant 0 : index
    %0 = vector.load %arg1[%c0, %c0_0] : memref<64x288xbf16, #tpu.memory_space<vmem>>, vector<64x288xbf16>
    %c0_1 = arith.constant 0 : index
    %c0_2 = arith.constant 0 : index
    %1 = vector.load %arg2[%c0_1, %c0_2] : memref<288x32xbf16, #tpu.memory_space<vmem>>, vector<288x32xbf16>
    %cst = arith.constant dense<0.000000e+00> : vector<64x32xf32>
    %2 = tpu.matmul %0, %1, %cst {dimension_numbers = #tpu.dot_dimension_numbers<[1], [0], [0], [1], [0, 0, 1, 1], [], []>} : vector<64x288xbf16>, vector<288x32xbf16>, vector<64x32xf32> -> vector<64x32xf32>
    %c0_3 = arith.constant 0 : index
    %c0_4 = arith.constant 0 : index
    %3 = vector.load %arg3[%c0_3, %c0_4] : memref<1x32xf32, #tpu.memory_space<vmem>>, vector<1x32xf32>
    %4 = vector.broadcast %3 : vector<1x32xf32> to vector<64x32xf32>
    %5 = arith.mulf %2, %4 : vector<64x32xf32>
    %c0_5 = arith.constant 0 : index
    %c0_6 = arith.constant 0 : index
    %6 = vector.load %arg4[%c0_5, %c0_6] : memref<1x32xf32, #tpu.memory_space<vmem>>, vector<1x32xf32>
    %7 = vector.broadcast %6 : vector<1x32xf32> to vector<64x32xf32>
    %8 = arith.addf %5, %7 : vector<64x32xf32>
    %cst_7 = arith.constant 0.000000e+00 : f32
    %9 = vector.broadcast %cst_7 : f32 to vector<64x32xf32>
    %10 = arith.cmpf oge, %8, %9 : vector<64x32xf32>
    %cst_8 = arith.constant 1.000000e-01 : f32
    %11 = vector.broadcast %cst_8 : f32 to vector<64x32xf32>
    %12 = arith.mulf %11, %8 : vector<64x32xf32>
    %13 = arith.select %10, %8, %12 : vector<64x32xi1>, vector<64x32xf32>
    %14 = arith.truncf %13 : vector<64x32xf32> to vector<64x32xbf16>
    %c0_9 = arith.constant 0 : index
    %c0_10 = arith.constant 0 : index
    %15 = vector.load %arg5[%c0_9, %c0_10] : memref<64x32xbf16, #tpu.memory_space<vmem>>, vector<64x32xbf16>
    tpu.vector_store %arg5[%c0_9, %c0_10], %14 {strides = array<i32>} : memref<64x32xbf16, #tpu.memory_space<vmem>>, vector<64x32xbf16>,
    return
  }
  func.func @transform_0(%arg0: i32) -> (i32, i32) {
    %c0_i32 = arith.constant 0 : i32
    %c0_i32_0 = arith.constant 0 : i32
    return %arg0, %c0_i32 : i32, i32
  }
  func.func @transform_1(%arg0: i32) -> (i32, i32) {
    %c0_i32 = arith.constant 0 : i32
    %c0_i32_0 = arith.constant 0 : i32
    %c0_i32_1 = arith.constant 0 : i32
    return %c0_i32, %c0_i32_0 : i32, i32
  }
  func.func @transform_2(%arg0: i32) -> (i32, i32) {
    %c0_i32 = arith.constant 0 : i32
    %c0_i32_0 = arith.constant 0 : i32
    %c0_i32_1 = arith.constant 0 : i32
    return %c0_i32, %c0_i32_0 : i32, i32
  }
  func.func @transform_3(%arg0: i32) -> (i32, i32) {
    %c0_i32 = arith.constant 0 : i32
    %c0_i32_0 = arith.constant 0 : i32
    %c0_i32_1 = arith.constant 0 : i32
    return %c0_i32, %c0_i32_0 : i32, i32
  }
  func.func @transform_4(%arg0: i32) -> (i32, i32) {
    %c0_i32 = arith.constant 0 : i32
    %c0_i32_0 = arith.constant 0 : i32
    return %arg0, %c0_i32 : i32, i32
  }
}

module attributes {stable_mosaic.version = 11 : i64} {
  func.func @kernel(%arg0: i32, %arg1: memref<16x288xbf16, #tpu.memory_space<vmem>>, %arg2: memref<288x32xbf16, #tpu.memory_space<vmem>>, %arg3: memref<1x32xf32, #tpu.memory_space<vmem>>, %arg4: memref<1x32xf32, #tpu.memory_space<vmem>>, %arg5: memref<16x32xbf16, #tpu.memory_space<vmem>>) attributes {dimension_semantics = [#tpu.dimension_semantics<parallel>], iteration_bounds = array<i64: 2>, scalar_prefetch = 0 : i64, scratch_operands = 0 : i64, tpu.core_type = #tpu.core_type<tc>, window_params = [{transform_indices = @transform_0, window_bounds = array<i64: 16, 288>}, {pipeline_mode = #tpu.pipeline_mode<synchronous>, transform_indices = @transform_1, window_bounds = array<i64: 288, 32>}, {pipeline_mode = #tpu.pipeline_mode<synchronous>, transform_indices = @transform_2, window_bounds = array<i64: 1, 32>}, {pipeline_mode = #tpu.pipeline_mode<synchronous>, transform_indices = @transform_3, window_bounds = array<i64: 1, 32>}, {transform_indices = @transform_4, window_bounds = array<i64: 16, 32>}]} {
    %c0 = arith.constant 0 : index
    %c0_0 = arith.constant 0 : index
    %0 = vector.load %arg1[%c0, %c0_0] : memref<16x288xbf16, #tpu.memory_space<vmem>>, vector<16x288xbf16>
    %c0_1 = arith.constant 0 : index
    %c0_2 = arith.constant 0 : index
    %1 = vector.load %arg2[%c0_1, %c0_2] : memref<288x32xbf16, #tpu.memory_space<vmem>>, vector<288x32xbf16>
    %cst = arith.constant dense<0.000000e+00> : vector<16x32xf32>
    %2 = tpu.matmul %0, %1, %cst {dimension_numbers = #tpu.dot_dimension_numbers<[1], [0], [0], [1], [0, 0, 1, 1], [], []>} : vector<16x288xbf16>, vector<288x32xbf16>, vector<16x32xf32> -> vector<16x32xf32>
    %c0_3 = arith.constant 0 : index
    %c0_4 = arith.constant 0 : index
    %3 = vector.load %arg3[%c0_3, %c0_4] : memref<1x32xf32, #tpu.memory_space<vmem>>, vector<1x32xf32>
    %4 = vector.broadcast %3 : vector<1x32xf32> to vector<16x32xf32>
    %5 = arith.mulf %2, %4 : vector<16x32xf32>
    %c0_5 = arith.constant 0 : index
    %c0_6 = arith.constant 0 : index
    %6 = vector.load %arg4[%c0_5, %c0_6] : memref<1x32xf32, #tpu.memory_space<vmem>>, vector<1x32xf32>
    %7 = vector.broadcast %6 : vector<1x32xf32> to vector<16x32xf32>
    %8 = arith.addf %5, %7 : vector<16x32xf32>
    %cst_7 = arith.constant 0.000000e+00 : f32
    %9 = vector.broadcast %cst_7 : f32 to vector<16x32xf32>
    %10 = arith.cmpf oge, %8, %9 : vector<16x32xf32>
    %cst_8 = arith.constant 1.000000e-01 : f32
    %11 = vector.broadcast %cst_8 : f32 to vector<16x32xf32>
    %12 = arith.mulf %11, %8 : vector<16x32xf32>
    %13 = arith.select %10, %8, %12 : vector<16x32xi1>, vector<16x32xf32>
    %14 = arith.truncf %13 : vector<16x32xf32> to vector<16x32xbf16>
    %c0_9 = arith.constant 0 : index
    %c0_10 = arith.constant 0 : index
    %15 = vector.load %arg5[%c0_9, %c0_10] : memref<16x32xbf16, #tpu.memory_space<vmem>>, vector<16x32xbf16>
    tpu.vector_store %arg5[%c0_9, %c0_10], %14 {strides = array<i32>} : memref<16x32xbf16, #tpu.memory_space<vmem>>, vector<16x32xbf16>,
    return
  }
  func.func @transform_0(%arg0: i32) -> (i32, i32) {
    %c0_i32 = arith.constant 0 : i32
    %c0_i32_0 = arith.constant 0 : i32
    return %arg0, %c0_i32 : i32, i32
  }
  func.func @transform_1(%arg0: i32) -> (i32, i32) {
    %c0_i32 = arith.constant 0 : i32
    %c0_i32_0 = arith.constant 0 : i32
    %c0_i32_1 = arith.constant 0 : i32
    return %c0_i32, %c0_i32_0 : i32, i32
  }
  func.func @transform_2(%arg0: i32) -> (i32, i32) {
    %c0_i32 = arith.constant 0 : i32
    %c0_i32_0 = arith.constant 0 : i32
    %c0_i32_1 = arith.constant 0 : i32
    return %c0_i32, %c0_i32_0 : i32, i32
  }
  func.func @transform_3(%arg0: i32) -> (i32, i32) {
    %c0_i32 = arith.constant 0 : i32
    %c0_i32_0 = arith.constant 0 : i32
    %c0_i32_1 = arith.constant 0 : i32
    return %c0_i32, %c0_i32_0 : i32, i32
  }
  func.func @transform_4(%arg0: i32) -> (i32, i32) {
    %c0_i32 = arith.constant 0 : i32
    %c0_i32_0 = arith.constant 0 : i32
    return %arg0, %c0_i32 : i32, i32
  }
}

module attributes {stable_mosaic.version = 11 : i64} {
  func.func @kernel(%arg0: i32, %arg1: memref<8x288xbf16, #tpu.memory_space<vmem>>, %arg2: memref<288x32xbf16, #tpu.memory_space<vmem>>, %arg3: memref<1x32xf32, #tpu.memory_space<vmem>>, %arg4: memref<1x32xf32, #tpu.memory_space<vmem>>, %arg5: memref<8x32xbf16, #tpu.memory_space<vmem>>) attributes {dimension_semantics = [#tpu.dimension_semantics<parallel>], iteration_bounds = array<i64: 1>, scalar_prefetch = 0 : i64, scratch_operands = 0 : i64, tpu.core_type = #tpu.core_type<tc>, window_params = [{transform_indices = @transform_0, window_bounds = array<i64: 8, 288>}, {pipeline_mode = #tpu.pipeline_mode<synchronous>, transform_indices = @transform_1, window_bounds = array<i64: 288, 32>}, {pipeline_mode = #tpu.pipeline_mode<synchronous>, transform_indices = @transform_2, window_bounds = array<i64: 1, 32>}, {pipeline_mode = #tpu.pipeline_mode<synchronous>, transform_indices = @transform_3, window_bounds = array<i64: 1, 32>}, {transform_indices = @transform_4, window_bounds = array<i64: 8, 32>}]} {
    %c0 = arith.constant 0 : index
    %c0_0 = arith.constant 0 : index
    %0 = vector.load %arg1[%c0, %c0_0] : memref<8x288xbf16, #tpu.memory_space<vmem>>, vector<8x288xbf16>
    %c0_1 = arith.constant 0 : index
    %c0_2 = arith.constant 0 : index
    %1 = vector.load %arg2[%c0_1, %c0_2] : memref<288x32xbf16, #tpu.memory_space<vmem>>, vector<288x32xbf16>
    %cst = arith.constant dense<0.000000e+00> : vector<8x32xf32>
    %2 = tpu.matmul %0, %1, %cst {dimension_numbers = #tpu.dot_dimension_numbers<[1], [0], [0], [1], [0, 0, 1, 1], [], []>} : vector<8x288xbf16>, vector<288x32xbf16>, vector<8x32xf32> -> vector<8x32xf32>
    %c0_3 = arith.constant 0 : index
    %c0_4 = arith.constant 0 : index
    %3 = vector.load %arg3[%c0_3, %c0_4] : memref<1x32xf32, #tpu.memory_space<vmem>>, vector<1x32xf32>
    %4 = vector.broadcast %3 : vector<1x32xf32> to vector<8x32xf32>
    %5 = arith.mulf %2, %4 : vector<8x32xf32>
    %c0_5 = arith.constant 0 : index
    %c0_6 = arith.constant 0 : index
    %6 = vector.load %arg4[%c0_5, %c0_6] : memref<1x32xf32, #tpu.memory_space<vmem>>, vector<1x32xf32>
    %7 = vector.broadcast %6 : vector<1x32xf32> to vector<8x32xf32>
    %8 = arith.addf %5, %7 : vector<8x32xf32>
    %cst_7 = arith.constant 0.000000e+00 : f32
    %9 = vector.broadcast %cst_7 : f32 to vector<8x32xf32>
    %10 = arith.cmpf oge, %8, %9 : vector<8x32xf32>
    %cst_8 = arith.constant 1.000000e-01 : f32
    %11 = vector.broadcast %cst_8 : f32 to vector<8x32xf32>
    %12 = arith.mulf %11, %8 : vector<8x32xf32>
    %13 = arith.select %10, %8, %12 : vector<8x32xi1>, vector<8x32xf32>
    %14 = arith.truncf %13 : vector<8x32xf32> to vector<8x32xbf16>
    %c0_9 = arith.constant 0 : index
    %c0_10 = arith.constant 0 : index
    %15 = vector.load %arg5[%c0_9, %c0_10] : memref<8x32xbf16, #tpu.memory_space<vmem>>, vector<8x32xbf16>
    tpu.vector_store %arg5[%c0_9, %c0_10], %14 {strides = array<i32>} : memref<8x32xbf16, #tpu.memory_space<vmem>>, vector<8x32xbf16>,
    return
  }
  func.func @transform_0(%arg0: i32) -> (i32, i32) {
    %c0_i32 = arith.constant 0 : i32
    %c0_i32_0 = arith.constant 0 : i32
    return %arg0, %c0_i32 : i32, i32
  }
  func.func @transform_1(%arg0: i32) -> (i32, i32) {
    %c0_i32 = arith.constant 0 : i32
    %c0_i32_0 = arith.constant 0 : i32
    %c0_i32_1 = arith.constant 0 : i32
    return %c0_i32, %c0_i32_0 : i32, i32
  }
  func.func @transform_2(%arg0: i32) -> (i32, i32) {
    %c0_i32 = arith.constant 0 : i32
    %c0_i32_0 = arith.constant 0 : i32
    %c0_i32_1 = arith.constant 0 : i32
    return %c0_i32, %c0_i32_0 : i32, i32
  }
  func.func @transform_3(%arg0: i32) -> (i32, i32) {
    %c0_i32 = arith.constant 0 : i32
    %c0_i32_0 = arith.constant 0 : i32
    %c0_i32_1 = arith.constant 0 : i32
    return %c0_i32, %c0_i32_0 : i32, i32
  }
  func.func @transform_4(%arg0: i32) -> (i32, i32) {
    %c0_i32 = arith.constant 0 : i32
    %c0_i32_0 = arith.constant 0 : i32
    return %arg0, %c0_i32 : i32, i32
  }
}

module attributes {stable_mosaic.version = 11 : i64} {
  func.func @kernel(%arg0: i32, %arg1: memref<8x288xbf16, #tpu.memory_space<vmem>>, %arg2: memref<288x128xbf16, #tpu.memory_space<vmem>>, %arg3: memref<1x128xf32, #tpu.memory_space<vmem>>, %arg4: memref<1x128xf32, #tpu.memory_space<vmem>>, %arg5: memref<8x128xbf16, #tpu.memory_space<vmem>>) attributes {dimension_semantics = [#tpu.dimension_semantics<parallel>], iteration_bounds = array<i64: 1>, scalar_prefetch = 0 : i64, scratch_operands = 0 : i64, tpu.core_type = #tpu.core_type<tc>, window_params = [{transform_indices = @transform_0, window_bounds = array<i64: 8, 288>}, {pipeline_mode = #tpu.pipeline_mode<synchronous>, transform_indices = @transform_1, window_bounds = array<i64: 288, 128>}, {pipeline_mode = #tpu.pipeline_mode<synchronous>, transform_indices = @transform_2, window_bounds = array<i64: 1, 128>}, {pipeline_mode = #tpu.pipeline_mode<synchronous>, transform_indices = @transform_3, window_bounds = array<i64: 1, 128>}, {transform_indices = @transform_4, window_bounds = array<i64: 8, 128>}]} {
    %c0 = arith.constant 0 : index
    %c0_0 = arith.constant 0 : index
    %0 = vector.load %arg1[%c0, %c0_0] : memref<8x288xbf16, #tpu.memory_space<vmem>>, vector<8x288xbf16>
    %c0_1 = arith.constant 0 : index
    %c0_2 = arith.constant 0 : index
    %1 = vector.load %arg2[%c0_1, %c0_2] : memref<288x128xbf16, #tpu.memory_space<vmem>>, vector<288x128xbf16>
    %cst = arith.constant dense<0.000000e+00> : vector<8x128xf32>
    %2 = tpu.matmul %0, %1, %cst {dimension_numbers = #tpu.dot_dimension_numbers<[1], [0], [0], [1], [0, 0, 1, 1], [], []>} : vector<8x288xbf16>, vector<288x128xbf16>, vector<8x128xf32> -> vector<8x128xf32>
    %c0_3 = arith.constant 0 : index
    %c0_4 = arith.constant 0 : index
    %3 = vector.load %arg3[%c0_3, %c0_4] : memref<1x128xf32, #tpu.memory_space<vmem>>, vector<1x128xf32>
    %4 = vector.broadcast %3 : vector<1x128xf32> to vector<8x128xf32>
    %5 = arith.mulf %2, %4 : vector<8x128xf32>
    %c0_5 = arith.constant 0 : index
    %c0_6 = arith.constant 0 : index
    %6 = vector.load %arg4[%c0_5, %c0_6] : memref<1x128xf32, #tpu.memory_space<vmem>>, vector<1x128xf32>
    %7 = vector.broadcast %6 : vector<1x128xf32> to vector<8x128xf32>
    %8 = arith.addf %5, %7 : vector<8x128xf32>
    %cst_7 = arith.constant 0.000000e+00 : f32
    %9 = vector.broadcast %cst_7 : f32 to vector<8x128xf32>
    %10 = arith.cmpf oge, %8, %9 : vector<8x128xf32>
    %cst_8 = arith.constant 1.000000e-01 : f32
    %11 = vector.broadcast %cst_8 : f32 to vector<8x128xf32>
    %12 = arith.mulf %11, %8 : vector<8x128xf32>
    %13 = arith.select %10, %8, %12 : vector<8x128xi1>, vector<8x128xf32>
    %14 = arith.truncf %13 : vector<8x128xf32> to vector<8x128xbf16>
    %c0_9 = arith.constant 0 : index
    %c0_10 = arith.constant 0 : index
    %15 = vector.load %arg5[%c0_9, %c0_10] : memref<8x128xbf16, #tpu.memory_space<vmem>>, vector<8x128xbf16>
    tpu.vector_store %arg5[%c0_9, %c0_10], %14 {strides = array<i32>} : memref<8x128xbf16, #tpu.memory_space<vmem>>, vector<8x128xbf16>,
    return
  }
  func.func @transform_0(%arg0: i32) -> (i32, i32) {
    %c0_i32 = arith.constant 0 : i32
    %c0_i32_0 = arith.constant 0 : i32
    return %arg0, %c0_i32 : i32, i32
  }
  func.func @transform_1(%arg0: i32) -> (i32, i32) {
    %c0_i32 = arith.constant 0 : i32
    %c0_i32_0 = arith.constant 0 : i32
    %c0_i32_1 = arith.constant 0 : i32
    return %c0_i32, %c0_i32_0 : i32, i32
  }
  func.func @transform_2(%arg0: i32) -> (i32, i32) {
    %c0_i32 = arith.constant 0 : i32
    %c0_i32_0 = arith.constant 0 : i32
    %c0_i32_1 = arith.constant 0 : i32
    return %c0_i32, %c0_i32_0 : i32, i32
  }
  func.func @transform_3(%arg0: i32) -> (i32, i32) {
    %c0_i32 = arith.constant 0 : i32
    %c0_i32_0 = arith.constant 0 : i32
    %c0_i32_1 = arith.constant 0 : i32
    return %c0_i32, %c0_i32_0 : i32, i32
  }
  func.func @transform_4(%arg0: i32) -> (i32, i32) {
    %c0_i32 = arith.constant 0 : i32
    %c0_i32_0 = arith.constant 0 : i32
    return %arg0, %c0_i32 : i32, i32
  }
}

module attributes {stable_mosaic.version = 11 : i64} {
  func.func @kernel(%arg0: i32, %arg1: memref<16x288xbf16, #tpu.memory_space<vmem>>, %arg2: memref<16x288xbf16, #tpu.memory_space<vmem>>, %arg3: memref<288x128xbf16, #tpu.memory_space<vmem>>, %arg4: memref<288x128xbf16, #tpu.memory_space<vmem>>, %arg5: memref<1x128xf32, #tpu.memory_space<vmem>>, %arg6: memref<1x128xf32, #tpu.memory_space<vmem>>, %arg7: memref<16x128xbf16, #tpu.memory_space<vmem>>) attributes {dimension_semantics = [#tpu.dimension_semantics<parallel>], iteration_bounds = array<i64: 2>, scalar_prefetch = 0 : i64, scratch_operands = 0 : i64, tpu.core_type = #tpu.core_type<tc>, window_params = [{transform_indices = @transform_0, window_bounds = array<i64: 16, 288>}, {transform_indices = @transform_1, window_bounds = array<i64: 16, 288>}, {pipeline_mode = #tpu.pipeline_mode<synchronous>, transform_indices = @transform_2, window_bounds = array<i64: 288, 128>}, {pipeline_mode = #tpu.pipeline_mode<synchronous>, transform_indices = @transform_3, window_bounds = array<i64: 288, 128>}, {pipeline_mode = #tpu.pipeline_mode<synchronous>, transform_indices = @transform_4, window_bounds = array<i64: 1, 128>}, {pipeline_mode = #tpu.pipeline_mode<synchronous>, transform_indices = @transform_5, window_bounds = array<i64: 1, 128>}, {transform_indices = @transform_6, window_bounds = array<i64: 16, 128>}]} {
    %c0 = arith.constant 0 : index
    %c0_0 = arith.constant 0 : index
    %0 = vector.load %arg1[%c0, %c0_0] : memref<16x288xbf16, #tpu.memory_space<vmem>>, vector<16x288xbf16>
    %c0_1 = arith.constant 0 : index
    %c0_2 = arith.constant 0 : index
    %1 = vector.load %arg3[%c0_1, %c0_2] : memref<288x128xbf16, #tpu.memory_space<vmem>>, vector<288x128xbf16>
    %cst = arith.constant dense<0.000000e+00> : vector<16x128xf32>
    %2 = tpu.matmul %0, %1, %cst {dimension_numbers = #tpu.dot_dimension_numbers<[1], [0], [0], [1], [0, 0, 1, 1], [], []>} : vector<16x288xbf16>, vector<288x128xbf16>, vector<16x128xf32> -> vector<16x128xf32>
    %c0_3 = arith.constant 0 : index
    %c0_4 = arith.constant 0 : index
    %3 = vector.load %arg2[%c0_3, %c0_4] : memref<16x288xbf16, #tpu.memory_space<vmem>>, vector<16x288xbf16>
    %c0_5 = arith.constant 0 : index
    %c0_6 = arith.constant 0 : index
    %4 = vector.load %arg4[%c0_5, %c0_6] : memref<288x128xbf16, #tpu.memory_space<vmem>>, vector<288x128xbf16>
    %cst_7 = arith.constant dense<0.000000e+00> : vector<16x128xf32>
    %5 = tpu.matmul %3, %4, %cst_7 {dimension_numbers = #tpu.dot_dimension_numbers<[1], [0], [0], [1], [0, 0, 1, 1], [], []>} : vector<16x288xbf16>, vector<288x128xbf16>, vector<16x128xf32> -> vector<16x128xf32>
    %6 = arith.addf %2, %5 : vector<16x128xf32>
    %c0_8 = arith.constant 0 : index
    %c0_9 = arith.constant 0 : index
    %7 = vector.load %arg5[%c0_8, %c0_9] : memref<1x128xf32, #tpu.memory_space<vmem>>, vector<1x128xf32>
    %8 = vector.broadcast %7 : vector<1x128xf32> to vector<16x128xf32>
    %9 = arith.mulf %6, %8 : vector<16x128xf32>
    %c0_10 = arith.constant 0 : index
    %c0_11 = arith.constant 0 : index
    %10 = vector.load %arg6[%c0_10, %c0_11] : memref<1x128xf32, #tpu.memory_space<vmem>>, vector<1x128xf32>
    %11 = vector.broadcast %10 : vector<1x128xf32> to vector<16x128xf32>
    %12 = arith.addf %9, %11 : vector<16x128xf32>
    %cst_12 = arith.constant 0.000000e+00 : f32
    %13 = vector.broadcast %cst_12 : f32 to vector<16x128xf32>
    %14 = arith.cmpf oge, %12, %13 : vector<16x128xf32>
    %cst_13 = arith.constant 1.000000e-01 : f32
    %15 = vector.broadcast %cst_13 : f32 to vector<16x128xf32>
    %16 = arith.mulf %15, %12 : vector<16x128xf32>
    %17 = arith.select %14, %12, %16 : vector<16x128xi1>, vector<16x128xf32>
    %18 = arith.truncf %17 : vector<16x128xf32> to vector<16x128xbf16>
    %c0_14 = arith.constant 0 : index
    %c0_15 = arith.constant 0 : index
    %19 = vector.load %arg7[%c0_14, %c0_15] : memref<16x128xbf16, #tpu.memory_space<vmem>>, vector<16x128xbf16>
    tpu.vector_store %arg7[%c0_14, %c0_15], %18 {strides = array<i32>} : memref<16x128xbf16, #tpu.memory_space<vmem>>, vector<16x128xbf16>,
    return
  }
  func.func @transform_0(%arg0: i32) -> (i32, i32) {
    %c0_i32 = arith.constant 0 : i32
    %c0_i32_0 = arith.constant 0 : i32
    return %arg0, %c0_i32 : i32, i32
  }
  func.func @transform_1(%arg0: i32) -> (i32, i32) {
    %c0_i32 = arith.constant 0 : i32
    %c0_i32_0 = arith.constant 0 : i32
    return %arg0, %c0_i32 : i32, i32
  }
  func.func @transform_2(%arg0: i32) -> (i32, i32) {
    %c0_i32 = arith.constant 0 : i32
    %c0_i32_0 = arith.constant 0 : i32
    %c0_i32_1 = arith.constant 0 : i32
    return %c0_i32, %c0_i32_0 : i32, i32
  }
  func.func @transform_3(%arg0: i32) -> (i32, i32) {
    %c0_i32 = arith.constant 0 : i32
    %c0_i32_0 = arith.constant 0 : i32
    %c0_i32_1 = arith.constant 0 : i32
    return %c0_i32, %c0_i32_0 : i32, i32
  }
  func.func @transform_4(%arg0: i32) -> (i32, i32) {
    %c0_i32 = arith.constant 0 : i32
    %c0_i32_0 = arith.constant 0 : i32
    %c0_i32_1 = arith.constant 0 : i32
    return %c0_i32, %c0_i32_0 : i32, i32
  }
  func.func @transform_5(%arg0: i32) -> (i32, i32) {
    %c0_i32 = arith.constant 0 : i32
    %c0_i32_0 = arith.constant 0 : i32
    %c0_i32_1 = arith.constant 0 : i32
    return %c0_i32, %c0_i32_0 : i32, i32
  }
  func.func @transform_6(%arg0: i32) -> (i32, i32) {
    %c0_i32 = arith.constant 0 : i32
    %c0_i32_0 = arith.constant 0 : i32
    return %arg0, %c0_i32 : i32, i32
  }
}

module attributes {stable_mosaic.version = 11 : i64} {
  func.func @kernel(%arg0: i32, %arg1: memref<64x288xbf16, #tpu.memory_space<vmem>>, %arg2: memref<64x288xbf16, #tpu.memory_space<vmem>>, %arg3: memref<288x128xbf16, #tpu.memory_space<vmem>>, %arg4: memref<288x128xbf16, #tpu.memory_space<vmem>>, %arg5: memref<1x128xf32, #tpu.memory_space<vmem>>, %arg6: memref<1x128xf32, #tpu.memory_space<vmem>>, %arg7: memref<64x128xbf16, #tpu.memory_space<vmem>>) attributes {dimension_semantics = [#tpu.dimension_semantics<parallel>], iteration_bounds = array<i64: 2>, scalar_prefetch = 0 : i64, scratch_operands = 0 : i64, tpu.core_type = #tpu.core_type<tc>, window_params = [{transform_indices = @transform_0, window_bounds = array<i64: 64, 288>}, {transform_indices = @transform_1, window_bounds = array<i64: 64, 288>}, {pipeline_mode = #tpu.pipeline_mode<synchronous>, transform_indices = @transform_2, window_bounds = array<i64: 288, 128>}, {pipeline_mode = #tpu.pipeline_mode<synchronous>, transform_indices = @transform_3, window_bounds = array<i64: 288, 128>}, {pipeline_mode = #tpu.pipeline_mode<synchronous>, transform_indices = @transform_4, window_bounds = array<i64: 1, 128>}, {pipeline_mode = #tpu.pipeline_mode<synchronous>, transform_indices = @transform_5, window_bounds = array<i64: 1, 128>}, {transform_indices = @transform_6, window_bounds = array<i64: 64, 128>}]} {
    %c0 = arith.constant 0 : index
    %c0_0 = arith.constant 0 : index
    %0 = vector.load %arg1[%c0, %c0_0] : memref<64x288xbf16, #tpu.memory_space<vmem>>, vector<64x288xbf16>
    %c0_1 = arith.constant 0 : index
    %c0_2 = arith.constant 0 : index
    %1 = vector.load %arg3[%c0_1, %c0_2] : memref<288x128xbf16, #tpu.memory_space<vmem>>, vector<288x128xbf16>
    %cst = arith.constant dense<0.000000e+00> : vector<64x128xf32>
    %2 = tpu.matmul %0, %1, %cst {dimension_numbers = #tpu.dot_dimension_numbers<[1], [0], [0], [1], [0, 0, 1, 1], [], []>} : vector<64x288xbf16>, vector<288x128xbf16>, vector<64x128xf32> -> vector<64x128xf32>
    %c0_3 = arith.constant 0 : index
    %c0_4 = arith.constant 0 : index
    %3 = vector.load %arg2[%c0_3, %c0_4] : memref<64x288xbf16, #tpu.memory_space<vmem>>, vector<64x288xbf16>
    %c0_5 = arith.constant 0 : index
    %c0_6 = arith.constant 0 : index
    %4 = vector.load %arg4[%c0_5, %c0_6] : memref<288x128xbf16, #tpu.memory_space<vmem>>, vector<288x128xbf16>
    %cst_7 = arith.constant dense<0.000000e+00> : vector<64x128xf32>
    %5 = tpu.matmul %3, %4, %cst_7 {dimension_numbers = #tpu.dot_dimension_numbers<[1], [0], [0], [1], [0, 0, 1, 1], [], []>} : vector<64x288xbf16>, vector<288x128xbf16>, vector<64x128xf32> -> vector<64x128xf32>
    %6 = arith.addf %2, %5 : vector<64x128xf32>
    %c0_8 = arith.constant 0 : index
    %c0_9 = arith.constant 0 : index
    %7 = vector.load %arg5[%c0_8, %c0_9] : memref<1x128xf32, #tpu.memory_space<vmem>>, vector<1x128xf32>
    %8 = vector.broadcast %7 : vector<1x128xf32> to vector<64x128xf32>
    %9 = arith.mulf %6, %8 : vector<64x128xf32>
    %c0_10 = arith.constant 0 : index
    %c0_11 = arith.constant 0 : index
    %10 = vector.load %arg6[%c0_10, %c0_11] : memref<1x128xf32, #tpu.memory_space<vmem>>, vector<1x128xf32>
    %11 = vector.broadcast %10 : vector<1x128xf32> to vector<64x128xf32>
    %12 = arith.addf %9, %11 : vector<64x128xf32>
    %cst_12 = arith.constant 0.000000e+00 : f32
    %13 = vector.broadcast %cst_12 : f32 to vector<64x128xf32>
    %14 = arith.cmpf oge, %12, %13 : vector<64x128xf32>
    %cst_13 = arith.constant 1.000000e-01 : f32
    %15 = vector.broadcast %cst_13 : f32 to vector<64x128xf32>
    %16 = arith.mulf %15, %12 : vector<64x128xf32>
    %17 = arith.select %14, %12, %16 : vector<64x128xi1>, vector<64x128xf32>
    %18 = arith.truncf %17 : vector<64x128xf32> to vector<64x128xbf16>
    %c0_14 = arith.constant 0 : index
    %c0_15 = arith.constant 0 : index
    %19 = vector.load %arg7[%c0_14, %c0_15] : memref<64x128xbf16, #tpu.memory_space<vmem>>, vector<64x128xbf16>
    tpu.vector_store %arg7[%c0_14, %c0_15], %18 {strides = array<i32>} : memref<64x128xbf16, #tpu.memory_space<vmem>>, vector<64x128xbf16>,
    return
  }
  func.func @transform_0(%arg0: i32) -> (i32, i32) {
    %c0_i32 = arith.constant 0 : i32
    %c0_i32_0 = arith.constant 0 : i32
    return %arg0, %c0_i32 : i32, i32
  }
  func.func @transform_1(%arg0: i32) -> (i32, i32) {
    %c0_i32 = arith.constant 0 : i32
    %c0_i32_0 = arith.constant 0 : i32
    return %arg0, %c0_i32 : i32, i32
  }
  func.func @transform_2(%arg0: i32) -> (i32, i32) {
    %c0_i32 = arith.constant 0 : i32
    %c0_i32_0 = arith.constant 0 : i32
    %c0_i32_1 = arith.constant 0 : i32
    return %c0_i32, %c0_i32_0 : i32, i32
  }
  func.func @transform_3(%arg0: i32) -> (i32, i32) {
    %c0_i32 = arith.constant 0 : i32
    %c0_i32_0 = arith.constant 0 : i32
    %c0_i32_1 = arith.constant 0 : i32
    return %c0_i32, %c0_i32_0 : i32, i32
  }
  func.func @transform_4(%arg0: i32) -> (i32, i32) {
    %c0_i32 = arith.constant 0 : i32
    %c0_i32_0 = arith.constant 0 : i32
    %c0_i32_1 = arith.constant 0 : i32
    return %c0_i32, %c0_i32_0 : i32, i32
  }
  func.func @transform_5(%arg0: i32) -> (i32, i32) {
    %c0_i32 = arith.constant 0 : i32
    %c0_i32_0 = arith.constant 0 : i32
    %c0_i32_1 = arith.constant 0 : i32
    return %c0_i32, %c0_i32_0 : i32, i32
  }
  func.func @transform_6(%arg0: i32) -> (i32, i32) {
    %c0_i32 = arith.constant 0 : i32
    %c0_i32_0 = arith.constant 0 : i32
    return %arg0, %c0_i32 : i32, i32
  }
}

module attributes {stable_mosaic.version = 11 : i64} {
  func.func @kernel(%arg0: i32, %arg1: memref<256x288xbf16, #tpu.memory_space<vmem>>, %arg2: memref<256x288xbf16, #tpu.memory_space<vmem>>, %arg3: memref<288x32xbf16, #tpu.memory_space<vmem>>, %arg4: memref<288x32xbf16, #tpu.memory_space<vmem>>, %arg5: memref<1x32xf32, #tpu.memory_space<vmem>>, %arg6: memref<1x32xf32, #tpu.memory_space<vmem>>, %arg7: memref<256x32xf32, #tpu.memory_space<vmem>>) attributes {dimension_semantics = [#tpu.dimension_semantics<parallel>], iteration_bounds = array<i64: 2>, scalar_prefetch = 0 : i64, scratch_operands = 0 : i64, tpu.core_type = #tpu.core_type<tc>, window_params = [{transform_indices = @transform_0, window_bounds = array<i64: 256, 288>}, {transform_indices = @transform_1, window_bounds = array<i64: 256, 288>}, {pipeline_mode = #tpu.pipeline_mode<synchronous>, transform_indices = @transform_2, window_bounds = array<i64: 288, 32>}, {pipeline_mode = #tpu.pipeline_mode<synchronous>, transform_indices = @transform_3, window_bounds = array<i64: 288, 32>}, {pipeline_mode = #tpu.pipeline_mode<synchronous>, transform_indices = @transform_4, window_bounds = array<i64: 1, 32>}, {pipeline_mode = #tpu.pipeline_mode<synchronous>, transform_indices = @transform_5, window_bounds = array<i64: 1, 32>}, {transform_indices = @transform_6, window_bounds = array<i64: 256, 32>}]} {
    %c0 = arith.constant 0 : index
    %c0_0 = arith.constant 0 : index
    %0 = vector.load %arg1[%c0, %c0_0] : memref<256x288xbf16, #tpu.memory_space<vmem>>, vector<256x288xbf16>
    %c0_1 = arith.constant 0 : index
    %c0_2 = arith.constant 0 : index
    %1 = vector.load %arg3[%c0_1, %c0_2] : memref<288x32xbf16, #tpu.memory_space<vmem>>, vector<288x32xbf16>
    %cst = arith.constant dense<0.000000e+00> : vector<256x32xf32>
    %2 = tpu.matmul %0, %1, %cst {dimension_numbers = #tpu.dot_dimension_numbers<[1], [0], [0], [1], [0, 0, 1, 1], [], []>} : vector<256x288xbf16>, vector<288x32xbf16>, vector<256x32xf32> -> vector<256x32xf32>
    %c0_3 = arith.constant 0 : index
    %c0_4 = arith.constant 0 : index
    %3 = vector.load %arg2[%c0_3, %c0_4] : memref<256x288xbf16, #tpu.memory_space<vmem>>, vector<256x288xbf16>
    %c0_5 = arith.constant 0 : index
    %c0_6 = arith.constant 0 : index
    %4 = vector.load %arg4[%c0_5, %c0_6] : memref<288x32xbf16, #tpu.memory_space<vmem>>, vector<288x32xbf16>
    %cst_7 = arith.constant dense<0.000000e+00> : vector<256x32xf32>
    %5 = tpu.matmul %3, %4, %cst_7 {dimension_numbers = #tpu.dot_dimension_numbers<[1], [0], [0], [1], [0, 0, 1, 1], [], []>} : vector<256x288xbf16>, vector<288x32xbf16>, vector<256x32xf32> -> vector<256x32xf32>
    %6 = arith.addf %2, %5 : vector<256x32xf32>
    %c0_8 = arith.constant 0 : index
    %c0_9 = arith.constant 0 : index
    %7 = vector.load %arg5[%c0_8, %c0_9] : memref<1x32xf32, #tpu.memory_space<vmem>>, vector<1x32xf32>
    %8 = vector.broadcast %7 : vector<1x32xf32> to vector<256x32xf32>
    %9 = arith.mulf %6, %8 : vector<256x32xf32>
    %c0_10 = arith.constant 0 : index
    %c0_11 = arith.constant 0 : index
    %10 = vector.load %arg6[%c0_10, %c0_11] : memref<1x32xf32, #tpu.memory_space<vmem>>, vector<1x32xf32>
    %11 = vector.broadcast %10 : vector<1x32xf32> to vector<256x32xf32>
    %12 = arith.addf %9, %11 : vector<256x32xf32>
    %c0_12 = arith.constant 0 : index
    %c0_13 = arith.constant 0 : index
    %13 = vector.load %arg7[%c0_12, %c0_13] : memref<256x32xf32, #tpu.memory_space<vmem>>, vector<256x32xf32>
    tpu.vector_store %arg7[%c0_12, %c0_13], %12 {strides = array<i32>} : memref<256x32xf32, #tpu.memory_space<vmem>>, vector<256x32xf32>,
    return
  }
  func.func @transform_0(%arg0: i32) -> (i32, i32) {
    %c0_i32 = arith.constant 0 : i32
    %c0_i32_0 = arith.constant 0 : i32
    return %arg0, %c0_i32 : i32, i32
  }
  func.func @transform_1(%arg0: i32) -> (i32, i32) {
    %c0_i32 = arith.constant 0 : i32
    %c0_i32_0 = arith.constant 0 : i32
    return %arg0, %c0_i32 : i32, i32
  }
  func.func @transform_2(%arg0: i32) -> (i32, i32) {
    %c0_i32 = arith.constant 0 : i32
    %c0_i32_0 = arith.constant 0 : i32
    %c0_i32_1 = arith.constant 0 : i32
    return %c0_i32, %c0_i32_0 : i32, i32
  }
  func.func @transform_3(%arg0: i32) -> (i32, i32) {
    %c0_i32 = arith.constant 0 : i32
    %c0_i32_0 = arith.constant 0 : i32
    %c0_i32_1 = arith.constant 0 : i32
    return %c0_i32, %c0_i32_0 : i32, i32
  }
  func.func @transform_4(%arg0: i32) -> (i32, i32) {
    %c0_i32 = arith.constant 0 : i32
    %c0_i32_0 = arith.constant 0 : i32
    %c0_i32_1 = arith.constant 0 : i32
    return %c0_i32, %c0_i32_0 : i32, i32
  }
  func.func @transform_5(%arg0: i32) -> (i32, i32) {
    %c0_i32 = arith.constant 0 : i32
    %c0_i32_0 = arith.constant 0 : i32
    %c0_i32_1 = arith.constant 0 : i32
    return %c0_i32, %c0_i32_0 : i32, i32
  }
  func.func @transform_6(%arg0: i32) -> (i32, i32) {
    %c0_i32 = arith.constant 0 : i32
    %c0_i32_0 = arith.constant 0 : i32
    return %arg0, %c0_i32 : i32, i32
  }
}

</mosaic_0001>

<bundles_post_ra>
// kernel: unet_forward.9
= control target key start
LH: loop header
LB: loop body
LE: loop exit
PB: predicated region body
PF: predicated region fallthrough
CT: control target
= control target key end

     0   :  { %s871_s15 = smov 0   ;;  %s1027_s0 = inlined_call_operand.vmem [shape: bf16[128,288], index: 0, kind: input, shape index: {}]   ;;  %s1028_s1 = inlined_call_operand.vmem [shape: bf16[288,32], index: 1, kind: input, shape index: {}]   ;;  %s1029_s2 = inlined_call_operand.vmem [shape: f32[1,32], index: 2, kind: input, shape index: {}]   ;;  %s1030_s3 = inlined_call_operand.vmem [shape: f32[1,32], index: 3, kind: input, shape index: {}]   ;;  %s1031_s4 = inlined_call_operand.vmem [shape: bf16[128,32], index: 4, kind: output, shape index: {}]  }
   0x1 LB: > { %s646_s16 = sadd.s32 4294967295, %s844_s15   ;;  %p650_p0 = scmp.ge.s32.totalorder %s844_s15, 1  ;;  %s844_s15 = sphi %s871_s15, %s14_s15  }
   0x2   : > { %p164_p1 = scmp.lt.s32.totalorder %s844_s15, 3 }
   0x4   : > { %p165_p2 = pnand %p650_p0, %p164_p1 }
   0x5   : > { %s651_s23 = sshll.u32 (!%p165_p2), %s646_s16, 3 }
   0x6   : > { %168 = sbr.rel (%p165_p2) target bundleno = 229 (0xe5), region = 36  ;;  %p192_p3 = scmp.lt.s32.totalorder (!%p165_p2), %s651_s23, 15 }
   0xb   : > { %v800_v0 = vld [vmem:[%s1028_s1 + $0x38] sm:$0xff]  ;;  %v810_v2 = vld [vmem:[%s1028_s1 + $0x88] sm:$0xff]  ;;  %v799_v3 = vld [vmem:[%s1028_s1 + $0x30] sm:$0xff]  ;;  %s1033_s23 = smov (!%p192_p3, %s651_s23), 15  ;;  %vm425_vm0 = vcmask 261120   ;;  %vm581_vm2 = vcmask 257024  }
   0xc   : > { %v885_v1 = vld [vmem:[%s1028_s1 + $0x78] sm:$0xff]  ;;  %438 = vmatpush.bf16.msra.mxu0 %v800_v0  ;;  %811 = vmatpush.bf16.msra.mxu3 %v800_v0  ;;  %v807_v4 = vld [vmem:[%s1028_s1 + $0x70] sm:$0xff]  ;;  %v809_v5 = vld [vmem:[%s1028_s1 + $0x80] sm:$0xff]  ;;  %s827_s30 = smul.u32 12, %s1033_s23  ;;  %s654_s12 = sshll.u32 %s1033_s23, 2 }
   0xd   : > { %819 = vmatpush.bf16.msra.mxu1 %v885_v1  ;;  %502 = vmatpush.bf16.msra.mxu2 %v810_v2  ;;  %v798_v6 = vld [vmem:[%s1028_s1 + $0x28] sm:$0xff]  ;;  %v797_v11 = vld [vmem:[%s1028_s1 + $0x20] sm:$0xff]  ;;  %v796_v13 = vld [vmem:[%s1028_s1 + $0x18] sm:$0xff]  ;;  %s991_s16 = scalar_lea.vmem %s1031_s4, %s654_s12 }
   0xe   : > { %v806_v7 = vld [vmem:[%s1028_s1 + $0x68] sm:$0xff]  ;;  %s912_s11 = scalar_lea.vmem %s1027_s0, %s827_s30  ;;  %v805_v12 = vld [vmem:[%s1028_s1 + $0x60] sm:$0xff]  ;;  %v804_v14 = vld [vmem:[%s1028_s1 + $0x58] sm:$0xff] }
   0xf   : > { %v665_v8 = vld [vmem:[%s912_s11 + $0x8] sm:$0xf]  ;;  %v783_v9 = vld [vmem:[%s912_s11 + $0x10] sm:$0xf0]  ;;  %v677_v17 = vld [vmem:[%s912_s11 + $0x20] sm:$0xf] }
  0x10   : > { %439 = vmatpush.bf16.msra.mxu0 %v799_v3  ;;  %812 = vmatpush.bf16.msra.mxu3 %v799_v3  ;;  %v666_v10 = vor.u32 %v783_v9, %v665_v8  ;;  %v795_v15 = vld [vmem:[%s1028_s1 + $0x10] sm:$0xff]  ;;  %v786_v18 = vld [vmem:[%s912_s11 + $0x28] sm:$0xf0]  ;;  %v793_v22 = vld [vmem:[%s1028_s1] sm:$0xff] }
  0x11   : > { %820 = vmatpush.bf16.msra.mxu1 %v807_v4  ;;  %503 = vmatpush.bf16.msra.mxu2 %v809_v5  ;;  %v803_v16 = vld [vmem:[%s1028_s1 + $0x50] sm:$0xff]  ;;  %v794_v19 = vld [vmem:[%s1028_s1 + $0x8] sm:$0xff]  ;;  %v678_v21 = vor.u32 %v786_v18, %v677_v17  ;;  %v669_v23 = vld [vmem:[%s912_s11 + $0x18] sm:$0xf] }
  0x12   : > { %v802_v20 = vld [vmem:[%s1028_s1 + $0x48] sm:$0xff]  ;;  %v785_v24 = vld [vmem:[%s912_s11 + $0x20] sm:$0xf0]  ;;  %v657_v25 = vld [vmem:[%s912_s11] sm:$0xf] }
  0x13   : > { %v782_v26 = vld [vmem:[%s912_s11 + $0x8] sm:$0xf0]  ;;  %v801_v27 = vld [vmem:[%s1028_s1 + $0x40] sm:$0xff]  ;;  %v784_v28 = vld [vmem:[%s912_s11 + $0x1c] sm:$0xf]  ;;  %v670_v30 = vor.u32 %v785_v24, %v669_v23 }
  0x14   : > { %440 = vmatpush.bf16.msra.mxu0 %v798_v6  ;;  %813 = vmatpush.bf16.msra.mxu3 %v798_v6  ;;  %v671_v29 = vld [vmem:[%s912_s11 + $0x24] sm:$0xf0]  ;;  %v658_v31 = vor.u32 %v782_v26, %v657_v25  ;;  %v689_v33 = vld [vmem:[%s912_s11 + $0x38] sm:$0xf]  ;;  %v789_v34 = vld [vmem:[%s912_s11 + $0x40] sm:$0xf0] }
  0x15   : > { %821 = vmatpush.bf16.msra.mxu1 %v806_v7  ;;  %775 = vmatmul.msk.bf16.vlgmr.msra.gmra.mxu2 %vm425_vm0, %v666_v10  ;;  %v674_v32 = vor.u32 %v784_v28, %v671_v29  ;;  %v690_v35 = vor.u32 %v789_v34, %v689_v33  ;;  %v681_v36 = vld [vmem:[%s912_s11 + $0x30] sm:$0xf]  ;;  %v788_v37 = vld [vmem:[%s912_s11 + $0x38] sm:$0xf0]  ;;  %v787_v38 = vld [vmem:[%s912_s11 + $0x34] sm:$0xf] }
  0x16   : > { %v683_v39 = vld [vmem:[%s912_s11 + $0x3c] sm:$0xf0]  ;;  %v682_v40 = vor.u32 %v788_v37, %v681_v36  ;;  %v701_v42 = vld [vmem:[%s912_s11 + $0x50] sm:$0xf]  ;;  %v792_v43 = vld [vmem:[%s912_s11 + $0x58] sm:$0xf0] }
  0x17   : > { %v686_v41 = vor.u32 %v787_v38, %v683_v39  ;;  %v702_v44 = vor.u32 %v792_v43, %v701_v42  ;;  %v781_v45 = vld [vmem:[%s912_s11 + $0x4] sm:$0xf]  ;;  %v659_v46 = vld [vmem:[%s912_s11 + $0xc] sm:$0xf0]  ;;  %v693_v48 = vld [vmem:[%s912_s11 + $0x48] sm:$0xf] }
  0x18   : > { %441 = vmatpush.bf16.msra.mxu0 %v797_v11  ;;  %814 = vmatpush.bf16.msra.mxu3 %v797_v11  ;;  %v662_v47 = vor.u32 %v781_v45, %v659_v46  ;;  %v791_v49 = vld [vmem:[%s912_s11 + $0x50] sm:$0xf0]  ;;  %v790_v50 = vld [vmem:[%s912_s11 + $0x4c] sm:$0xf]  ;;  %v695_v51 = vld [vmem:[%s912_s11 + $0x54] sm:$0xf0] }
  0x19   : > { %822 = vmatpush.bf16.msra.mxu1 %v805_v12  ;;  %v694_v52 = vor.u32 %v791_v49, %v693_v48  ;;  %v698_v53 = vor.u32 %v790_v50, %v695_v51  ;;  %v978_v60 = vld [vmem:[%s1029_s2] ss:$0 sm:$0xff] }
  0x1a   : > { %v983_v63 = vld [vmem:[%s1030_s3] ss:$0 sm:$0xff] }
  0x1c   : > { %442 = vmatpush.bf16.msra.mxu0 %v796_v13  ;;  %815 = vmatpush.bf16.msra.mxu3 %v796_v13 }
  0x1d   : > { %823 = vmatpush.bf16.msra.mxu1 %v804_v14 }
  0x20   : > { %443 = vmatpush.bf16.msra.mxu0 %v795_v15  ;;  %816 = vmatpush.bf16.msra.mxu3 %v795_v15 }
  0x21   : > { %824 = vmatpush.bf16.msra.mxu1 %v803_v16 }
  0x24   : > { %444 = vmatpush.bf16.msra.mxu0 %v794_v19  ;;  %817 = vmatpush.bf16.msra.mxu3 %v794_v19 }
  0x25   : > { %825 = vmatpush.bf16.msra.mxu1 %v802_v20  ;;  %776 = vmatmul.msk.bf16.gmra.mxu2 %vm425_vm0, %v678_v21 }
  0x28   : > { %445 = vmatpush.bf16.msra.mxu0 %v793_v22  ;;  %818 = vmatpush.bf16.msra.mxu3 %v793_v22 }
  0x29   : > { %826 = vmatpush.bf16.msra.mxu1 %v801_v27 }
  0x2b   : > { %451 = vmatmul.bf16.vlgmr.msra.gmra.mxu3 %v670_v30  ;;  %446 = vmatmul.bf16.vlgmr.msra.gmra.mxu0 %v658_v31 }
  0x2c   : > { %467 = vmatpush.bf16.msrb.mxu0 %v885_v1  ;;  %480 = vmatmul.bf16.vlgmr.msra.gmra.mxu1 %v674_v32 }
  0x30   : > { %468 = vmatpush.bf16.msrb.mxu0 %v807_v4 }
  0x34   : > { %469 = vmatpush.bf16.msrb.mxu0 %v806_v7 }
  0x35   : > { %777 = vmatmul.msk.bf16.gmra.mxu2 %vm425_vm0, %v690_v35 }
  0x38   : > { %470 = vmatpush.bf16.msrb.mxu0 %v805_v12 }
  0x3b   : > { %456 = vmatmul.bf16.gmra.mxu3 %v682_v40 }
  0x3c   : > { %471 = vmatpush.bf16.msrb.mxu0 %v804_v14  ;;  %485 = vmatmul.bf16.gmra.mxu1 %v686_v41 }
  0x40   : > { %472 = vmatpush.bf16.msrb.mxu0 %v803_v16 }
  0x44   : > { %473 = vmatpush.bf16.msrb.mxu0 %v802_v20 }
  0x45   : > { %778 = vmatmul.msk.bf16.gmra.mxu2 %vm425_vm0, %v702_v44 }
  0x48   : > { %474 = vmatpush.bf16.msrb.mxu0 %v801_v27 }
  0x4b   : > { %475 = vmatmul.bf16.vlgmr.msrb.gmra.mxu0 %v662_v47  ;;  %461 = vmatmul.bf16.gmra.mxu3 %v694_v52 }
  0x4c   : > { %490 = vmatmul.bf16.gmra.mxu1 %v698_v53 }
  0x98   : > { %v505_v54 = vpop.f32.mrf.mxu2 }
  0xa0   : > { %v973_v55 = vpop.f32.mrf.mxu2 }
  0xa8   : > { %v510_v56 = vpop.f32.mrf.mxu2  ;;  %v447_v1 = vpop.f32.mrf.mxu0 }
  0xa9   : > { %v481_v57 = vpop.f32.mrf.mxu1 }
  0xae   : > { %v452_v58 = vpop.f32.mrf.mxu3 }
  0xaf   : > { %v482_v59 = vadd.f32 %v481_v57, %v452_v58 }
  0xb0   : > { %v512_v61 = vpop.f32.mrf.mxu2  ;;  %v449_v13 = vpop.f32.mrf.mxu0 }
  0xb1   : > { %v511_v62 = vadd.f32 %v510_v56, %v482_v59  ;;  %v483_v0 = vpop.f32.mrf.mxu1 }
  0xb3   : > { %v531_v2 = vmul.f32 %v978_v60, %v511_v62 }
  0xb5   : > { %v543_v3 = vadd.f32 %v983_v63, %v531_v2 }
  0xb6   : > { %v454_v4 = vpop.f32.mrf.mxu3 }
  0xb7   : > { %vm551_vm1 = vcmp.ge.f32.partialorder %v543_v3, 0.0  ;;  %v559_v5 = vmul.f32 0.1, %v543_v3  ;;  %v484_v6 = vadd.f32 %v483_v0, %v454_v4 }
  0xb8   : > { %v515_v11 = vpop.f32.mrf.mxu2 }
  0xb9   : > { %v567_v7 = vsel %vm551_vm1, %v543_v3, %v559_v5  ;;  %v513_v8 = vadd.f32 %v512_v61, %v484_v6  ;;  %v486_v9 = vpop.f32.mrf.mxu1 }
  0xba   : > { %v575_v10 = vpack.c.bf16 %v567_v7, %v567_v7 }
  0xbb   : > { %v532_v12 = vmul.f32 %v978_v60, %v513_v8 }
  0xbc   : > { %584 = vst.msk [vmem:[%s991_s16 + $0x8] sm:$0xf] %vm581_vm2, %v575_v10 }
  0xbd   : > { %v544_v14 = vadd.f32 %v983_v63, %v532_v12 }
  0xbe   : > { %v457_v15 = vpop.f32.mrf.mxu3 }
  0xbf   : > { %vm552_vm3 = vcmp.ge.f32.partialorder %v544_v14, 0.0  ;;  %v560_v16 = vmul.f32 0.1, %v544_v14  ;;  %v487_v17 = vadd.f32 %v486_v9, %v457_v15 }
  0xc0   : > { %v517_v23 = vpop.f32.mrf.mxu2 }
  0xc1   : > { %v568_v18 = vsel %vm552_vm3, %v544_v14, %v560_v16  ;;  %v516_v19 = vadd.f32 %v515_v11, %v487_v17  ;;  %v488_v21 = vpop.f32.mrf.mxu1 }
  0xc2   : > { %v576_v20 = vpack.c.bf16 %v568_v18, %v568_v18 }
  0xc3   : > { %v533_v22 = vmul.f32 %v978_v60, %v516_v19 }
  0xc4   : > { %585 = vst.msk [vmem:[%s991_s16 + $0xc] sm:$0xf] %vm581_vm2, %v576_v20 }
  0xc5   : > { %v545_v24 = vadd.f32 %v983_v63, %v533_v22 }
  0xc6   : > { %v459_v27 = vpop.f32.mrf.mxu3 }
  0xc7   : > { %vm553_vm4 = vcmp.ge.f32.partialorder %v545_v24, 0.0  ;;  %v561_v28 = vmul.f32 0.1, %v545_v24  ;;  %v489_v29 = vadd.f32 %v488_v21, %v459_v27 }
  0xc8   : > { %v476_v25 = vpop.f32.mrf.mxu0  ;;  %v520_v41 = vpop.f32.mrf.mxu2 }
  0xc9   : > { %v477_v26 = vadd.f32 %v476_v25, %v447_v1  ;;  %v569_v31 = vsel %vm553_vm4, %v545_v24, %v561_v28  ;;  %v518_v32 = vadd.f32 %v517_v23, %v489_v29  ;;  %v491_v37 = vpop.f32.mrf.mxu1 }
  0xca   : > { %v577_v33 = vpack.c.bf16 %v569_v31, %v569_v31 }
  0xcb   : > { %v506_v30 = vadd.f32 %v505_v54, %v477_v26  ;;  %v534_v35 = vmul.f32 %v978_v60, %v518_v32 }
  0xcc   : > { %586 = vst.msk [vmem:[%s991_s16 + $0x10] sm:$0xf] %vm581_vm2, %v577_v33 }
  0xcd   : > { %v529_v34 = vmul.f32 %v978_v60, %v506_v30  ;;  %v546_v38 = vadd.f32 %v983_v63, %v534_v35 }
  0xce   : > { %v462_v43 = vpop.f32.mrf.mxu3 }
  0xcf   : > { %v541_v36 = vadd.f32 %v983_v63, %v529_v34  ;;  %vm554_vm6 = vcmp.ge.f32.partialorder %v546_v38, 0.0  ;;  %v562_v44 = vmul.f32 0.1, %v546_v38  ;;  %v492_v45 = vadd.f32 %v491_v37, %v462_v43 }
  0xd0   : > { %v478_v39 = vpop.f32.mrf.mxu0  ;;  %v522_v0 = vpop.f32.mrf.mxu2 }
  0xd1   : > { %vm549_vm5 = vcmp.ge.f32.partialorder %v541_v36, 0.0  ;;  %v557_v40 = vmul.f32 0.1, %v541_v36  ;;  %v479_v42 = vadd.f32 %v478_v39, %v449_v13  ;;  %v570_v49 = vsel %vm554_vm6, %v546_v38, %v562_v44  ;;  %v493_v57 = vpop.f32.mrf.mxu1 }
  0xd2   : > { %v521_v50 = vadd.f32 %v520_v41, %v492_v45  ;;  %v578_v51 = vpack.c.bf16 %v570_v49, %v570_v49 }
  0xd3   : > { %v565_v46 = vsel %vm549_vm5, %v541_v36, %v557_v40  ;;  %v508_v47 = vadd.f32 %v973_v55, %v479_v42 }
  0xd4   : > { %v573_v48 = vpack.c.bf16 %v565_v46, %v565_v46  ;;  %v535_v53 = vmul.f32 %v978_v60, %v521_v50  ;;  %587 = vst.msk [vmem:[%s991_s16 + $0x14] sm:$0xf] %vm581_vm2, %v578_v51 }
  0xd5   : > { %v530_v52 = vmul.f32 %v978_v60, %v508_v47 }
  0xd6   : > { %582 = vst.msk [vmem:[%s991_s16] sm:$0xf] %vm581_vm2, %v573_v48  ;;  %v547_v56 = vadd.f32 %v983_v63, %v535_v53  ;;  %v464_v58 = vpop.f32.mrf.mxu3 }
  0xd7   : > { %v542_v54 = vadd.f32 %v983_v63, %v530_v52  ;;  %v494_v61 = vadd.f32 %v493_v57, %v464_v58 }
  0xd8   : > { %vm555_vm8 = vcmp.ge.f32.partialorder %v547_v56, 0.0  ;;  %v563_v59 = vmul.f32 0.1, %v547_v56 }
  0xd9   : > { %vm550_vm7 = vcmp.ge.f32.partialorder %v542_v54, 0.0  ;;  %v558_v55 = vmul.f32 0.1, %v542_v54  ;;  %v523_v3 = vadd.f32 %v522_v0, %v494_v61 }
  0xda   : > { %v571_v2 = vsel %vm555_vm8, %v547_v56, %v563_v59 }
  0xdb   : > { %v566_v62 = vsel %vm550_vm7, %v542_v54, %v558_v55  ;;  %v579_v4 = vpack.c.bf16 %v571_v2, %v571_v2  ;;  %v536_v5 = vmul.f32 %v978_v60, %v523_v3 }
  0xdc   : > { %v574_v1 = vpack.c.bf16 %v566_v62, %v566_v62 }
  0xdd   : > { %588 = vst.msk [vmem:[%s991_s16 + $0x18] sm:$0xf] %vm581_vm2, %v579_v4  ;;  %v548_v6 = vadd.f32 %v983_v63, %v536_v5 }
  0xde   : > { %583 = vst.msk [vmem:[%s991_s16 + $0x4] sm:$0xf] %vm581_vm2, %v574_v1 }
  0xdf   : > { %vm556_vm9 = vcmp.ge.f32.partialorder %v548_v6, 0.0  ;;  %v564_v7 = vmul.f32 0.1, %v548_v6 }
  0xe1   : > { %v572_v8 = vsel %vm556_vm9, %v548_v6, %v564_v7 }
  0xe2   : > { %v580_v9 = vpack.c.bf16 %v572_v8, %v572_v8 }
  0xe4   : > { %589 = vst.msk [vmem:[%s991_s16 + $0x1c] sm:$0xf] %vm581_vm2, %v580_v9 }
  0xe5 PF: > { %s14_s15 = sadd.s32 1, %s844_s15  }
  0xe6   : > { %p11_p4 = scmp.ge.s32.totalorder %s14_s15, 4  }
  0xe8   :  { %13 = sbr.rel (!%p11_p4) target bundleno = 1 (0x1), region = 66 }

// kernel: unet_forward.10
= control target key start
LH: loop header
LB: loop body
LE: loop exit
PB: predicated region body
PF: predicated region fallthrough
CT: control target
= control target key end

     0   :  { %s654_s15 = smov 0   ;;  %s735_s0 = inlined_call_operand.vmem [shape: bf16[32,288], index: 0, kind: input, shape index: {}]   ;;  %s736_s1 = inlined_call_operand.vmem [shape: bf16[288,32], index: 1, kind: input, shape index: {}]   ;;  %s737_s2 = inlined_call_operand.vmem [shape: f32[1,32], index: 2, kind: input, shape index: {}]   ;;  %s738_s3 = inlined_call_operand.vmem [shape: f32[1,32], index: 3, kind: input, shape index: {}]   ;;  %s739_s4 = inlined_call_operand.vmem [shape: bf16[32,32], index: 4, kind: output, shape index: {}]  }
   0x1 LB: > { %s493_s16 = sadd.s32 4294967295, %s627_s15   ;;  %p497_p0 = scmp.ge.s32.totalorder %s627_s15, 1  ;;  %s627_s15 = sphi %s654_s15, %s14_s15  }
   0x2   : > { %p164_p1 = scmp.lt.s32.totalorder %s627_s15, 3 }
   0x4   : > { %p165_p2 = pnand %p497_p0, %p164_p1 }
   0x5   : > { %s498_s21 = sshll.u32 (!%p165_p2), %s493_s16, 1 }
   0x6   : > { %168 = sbr.rel (%p165_p2) target bundleno = 192 (0xc0), region = 36  ;;  %p192_p3 = scmp.lt.s32.totalorder (!%p165_p2), %s498_s21, 3 }
   0xb   : > { %v599_v0 = vld [vmem:[%s736_s1 + $0x38] sm:$0xff]  ;;  %v598_v2 = vld [vmem:[%s736_s1 + $0x30] sm:$0xff]  ;;  %v609_v4 = vld [vmem:[%s736_s1 + $0x88] sm:$0xff]  ;;  %s741_s21 = smov (!%p192_p3, %s498_s21), 3  ;;  %vm368_vm0 = vcmask 261120   ;;  %vm434_vm2 = vcmask 257024  }
   0xc   : > { %v607_v1 = vld [vmem:[%s736_s1 + $0x78] sm:$0xff]  ;;  %372 = vmatpush.bf16.msra.mxu0 %v599_v0  ;;  %v606_v3 = vld [vmem:[%s736_s1 + $0x70] sm:$0xff]  ;;  %406 = vmatpush.bf16.msra.mxu2 %v609_v4  ;;  %v608_v5 = vld [vmem:[%s736_s1 + $0x80] sm:$0xff]  ;;  %s610_s6 = smul.u32 12, %s741_s21 }
   0xd   : > { %386 = vmatpush.bf16.msra.mxu1 %v607_v1  ;;  %v597_v6 = vld [vmem:[%s736_s1 + $0x28] sm:$0xff]  ;;  %v596_v11 = vld [vmem:[%s736_s1 + $0x20] sm:$0xff]  ;;  %v595_v13 = vld [vmem:[%s736_s1 + $0x18] sm:$0xff] }
   0xe   : > { %v605_v7 = vld [vmem:[%s736_s1 + $0x68] sm:$0xff]  ;;  %s196_s11 = scalar_lea.vmem %s735_s0, %s610_s6  ;;  %v604_v12 = vld [vmem:[%s736_s1 + $0x60] sm:$0xff]  ;;  %v603_v14 = vld [vmem:[%s736_s1 + $0x58] sm:$0xff] }
   0xf   : > { %v512_v8 = vld [vmem:[%s196_s11 + $0x8] sm:$0xf]  ;;  %v591_v9 = vld [vmem:[%s196_s11 + $0x10] sm:$0xf0]  ;;  %v592_v19 = vld [vmem:[%s736_s1] sm:$0xff] }
  0x10   : > { %373 = vmatpush.bf16.msra.mxu0 %v598_v2  ;;  %407 = vmatpush.bf16.msra.mxu2 %v608_v5  ;;  %v513_v10 = vor.u32 %v591_v9, %v512_v8  ;;  %v594_v15 = vld [vmem:[%s736_s1 + $0x10] sm:$0xff]  ;;  %v593_v17 = vld [vmem:[%s736_s1 + $0x8] sm:$0xff]  ;;  %v600_v20 = vld [vmem:[%s736_s1 + $0x40] sm:$0xff] }
  0x11   : > { %387 = vmatpush.bf16.msra.mxu1 %v606_v3  ;;  %v602_v16 = vld [vmem:[%s736_s1 + $0x50] sm:$0xff]  ;;  %v601_v18 = vld [vmem:[%s736_s1 + $0x48] sm:$0xff]  ;;  %v504_v21 = vld [vmem:[%s196_s11] sm:$0xf] }
  0x12   : > { %v590_v22 = vld [vmem:[%s196_s11 + $0x8] sm:$0xf0]  ;;  %v589_v23 = vld [vmem:[%s196_s11 + $0x4] sm:$0xf]  ;;  %v506_v24 = vld [vmem:[%s196_s11 + $0xc] sm:$0xf0] }
  0x13   : > { %586 = vmatmul.msk.bf16.vlgmr.msra.gmra.mxu2 %vm368_vm0, %v513_v10  ;;  %v505_v25 = vor.u32 %v590_v22, %v504_v21  ;;  %v509_v26 = vor.u32 %v589_v23, %v506_v24  ;;  %v619_v31 = vld [vmem:[%s737_s2] ss:$0 sm:$0xff]  ;;  %s501_s11 = sshll.u32 %s741_s21, 2 }
  0x14   : > { %374 = vmatpush.bf16.msra.mxu0 %v597_v6  ;;  %v620_v33 = vld [vmem:[%s738_s3] ss:$0 sm:$0xff]  ;;  %s202_s16 = scalar_lea.vmem %s739_s4, %s501_s11 }
  0x15   : > { %388 = vmatpush.bf16.msra.mxu1 %v605_v7 }
  0x18   : > { %375 = vmatpush.bf16.msra.mxu0 %v596_v11 }
  0x19   : > { %389 = vmatpush.bf16.msra.mxu1 %v604_v12 }
  0x1c   : > { %376 = vmatpush.bf16.msra.mxu0 %v595_v13 }
  0x1d   : > { %390 = vmatpush.bf16.msra.mxu1 %v603_v14 }
  0x20   : > { %377 = vmatpush.bf16.msra.mxu0 %v594_v15 }
  0x21   : > { %391 = vmatpush.bf16.msra.mxu1 %v602_v16 }
  0x24   : > { %378 = vmatpush.bf16.msra.mxu0 %v593_v17 }
  0x25   : > { %392 = vmatpush.bf16.msra.mxu1 %v601_v18 }
  0x28   : > { %379 = vmatpush.bf16.msra.mxu0 %v592_v19 }
  0x29   : > { %393 = vmatpush.bf16.msra.mxu1 %v600_v20 }
  0x2b   : > { %380 = vmatmul.bf16.vlgmr.msra.gmra.mxu0 %v505_v25 }
  0x2c   : > { %394 = vmatmul.bf16.vlgmr.msra.gmra.mxu1 %v509_v26 }
  0x96   : > { %v409_v27 = vpop.f32.mrf.mxu2 }
  0x9e   : > { %v411_v40 = vpop.f32.mrf.mxu2 }
  0xa8   : > { %v381_v28 = vpop.f32.mrf.mxu0 }
  0xa9   : > { %v395_v29 = vpop.f32.mrf.mxu1 }
  0xaa   : > { %v396_v30 = vadd.f32 %v395_v29, %v381_v28 }
  0xac   : > { %v410_v32 = vadd.f32 %v409_v27, %v396_v30 }
  0xae   : > { %v418_v34 = vmul.f32 %v619_v31, %v410_v32 }
  0xb0   : > { %v424_v35 = vadd.f32 %v620_v33, %v418_v34  ;;  %v383_v36 = vpop.f32.mrf.mxu0 }
  0xb1   : > { %v397_v37 = vpop.f32.mrf.mxu1 }
  0xb2   : > { %vm426_vm1 = vcmp.ge.f32.partialorder %v424_v35, 0.0  ;;  %v428_v38 = vmul.f32 0.1, %v424_v35  ;;  %v398_v39 = vadd.f32 %v397_v37, %v383_v36 }
  0xb4   : > { %v430_v41 = vsel %vm426_vm1, %v424_v35, %v428_v38  ;;  %v412_v42 = vadd.f32 %v411_v40, %v398_v39 }
  0xb5   : > { %v432_v43 = vpack.c.bf16 %v430_v41, %v430_v41 }
  0xb6   : > { %v419_v44 = vmul.f32 %v619_v31, %v412_v42 }
  0xb7   : > { %435 = vst.msk [vmem:[%s202_s16] sm:$0xf] %vm434_vm2, %v432_v43 }
  0xb8   : > { %v425_v45 = vadd.f32 %v620_v33, %v419_v44 }
  0xba   : > { %vm427_vm3 = vcmp.ge.f32.partialorder %v425_v45, 0.0  ;;  %v429_v46 = vmul.f32 0.1, %v425_v45 }
  0xbc   : > { %v431_v47 = vsel %vm427_vm3, %v425_v45, %v429_v46 }
  0xbd   : > { %v433_v48 = vpack.c.bf16 %v431_v47, %v431_v47 }
  0xbf   : > { %436 = vst.msk [vmem:[%s202_s16 + $0x4] sm:$0xf] %vm434_vm2, %v433_v48 }
  0xc0 PF: > { %s14_s15 = sadd.s32 1, %s627_s15  }
  0xc1   : > { %p11_p4 = scmp.ge.s32.totalorder %s14_s15, 4  }
  0xc3   :  { %13 = sbr.rel (!%p11_p4) target bundleno = 1 (0x1), region = 66 }

// kernel: unet_forward.12
= control target key start
LH: loop header
LB: loop body
LE: loop exit
PB: predicated region body
PF: predicated region fallthrough
CT: control target
= control target key end

     0   :  { %vm174_vm0 = vcmask 261120   ;;  %vm231_vm2 = vcmask 257024   ;;  %s424_s1 = inlined_call_operand.vmem [shape: bf16[288,32], index: 1, kind: input, shape index: {}]   ;;  %s425_s0 = inlined_call_operand.vmem [shape: bf16[8,288], index: 0, kind: input, shape index: {}]   ;;  %s426_s2 = inlined_call_operand.vmem [shape: f32[1,32], index: 2, kind: input, shape index: {}]   ;;  %s427_s3 = inlined_call_operand.vmem [shape: f32[1,32], index: 3, kind: input, shape index: {}]   ;;  %s428_s4 = inlined_call_operand.vmem [shape: bf16[8,32], index: 4, kind: output, shape index: {}]  }
   0x1   :  { %v317_v0 = vld [vmem:[%s424_s1 + $0x38] sm:$0xff]  ;;  %v316_v2 = vld [vmem:[%s424_s1 + $0x30] sm:$0xff]  ;;  %v327_v4 = vld [vmem:[%s424_s1 + $0x88] sm:$0xff] }
   0x2   :  { %v325_v1 = vld [vmem:[%s424_s1 + $0x78] sm:$0xff]  ;;  %178 = vmatpush.bf16.msra.mxu0 %v317_v0  ;;  %v324_v3 = vld [vmem:[%s424_s1 + $0x70] sm:$0xff]  ;;  %210 = vmatpush.bf16.msra.mxu2 %v327_v4  ;;  %v326_v5 = vld [vmem:[%s424_s1 + $0x80] sm:$0xff] }
   0x3   :  { %191 = vmatpush.bf16.msra.mxu1 %v325_v1  ;;  %v19_v6 = vld [vmem:[%s425_s0 + $0x8] sm:$0xf]  ;;  %v314_v11 = vld [vmem:[%s424_s1 + $0x20] sm:$0xff]  ;;  %v313_v13 = vld [vmem:[%s424_s1 + $0x18] sm:$0xff] }
   0x4   :  { %v60_v7 = vunpack.c.l.b16 %v19_v6  ;;  %v315_v8 = vld [vmem:[%s424_s1 + $0x28] sm:$0xff]  ;;  %v322_v12 = vld [vmem:[%s424_s1 + $0x60] sm:$0xff]  ;;  %v321_v14 = vld [vmem:[%s424_s1 + $0x58] sm:$0xff] }
   0x5   :  { %v323_v9 = vld [vmem:[%s424_s1 + $0x68] sm:$0xff]  ;;  %v312_v15 = vld [vmem:[%s424_s1 + $0x10] sm:$0xff]  ;;  %v18_v19 = vld [vmem:[%s425_s0] sm:$0xff] }
   0x6   :  { %179 = vmatpush.bf16.msra.mxu0 %v316_v2  ;;  %v63_v10 = vpack.c.b16 %v60_v7, %v60_v7  ;;  %211 = vmatpush.bf16.msra.mxu2 %v326_v5  ;;  %v320_v16 = vld [vmem:[%s424_s1 + $0x50] sm:$0xff]  ;;  %v311_v17 = vld [vmem:[%s424_s1 + $0x8] sm:$0xff]  ;;  %v58_v20 = vunpack.c.l.b16 %v18_v19  ;;  %v59_v21 = vunpack.c.h.b16 %v18_v19  ;;  %v310_v22 = vld [vmem:[%s424_s1] sm:$0xff] }
   0x7   :  { %192 = vmatpush.bf16.msra.mxu1 %v324_v3  ;;  %v319_v18 = vld [vmem:[%s424_s1 + $0x48] sm:$0xff]  ;;  %v318_v23 = vld [vmem:[%s424_s1 + $0x40] sm:$0xff] }
   0x8   :  { %v61_v24 = vpack.c.b16 %v58_v20, %v58_v20  ;;  %v62_v25 = vpack.c.b16 %v59_v21, %v59_v21  ;;  %v328_v31 = vld [vmem:[%s426_s2] ss:$0 sm:$0xff] }
   0x9   :  { %309 = vmatmul.msk.bf16.vlgmr.msra.gmra.mxu2 %vm174_vm0, %v63_v10  ;;  %v329_v33 = vld [vmem:[%s427_s3] ss:$0 sm:$0xff] }
   0xa   :  { %180 = vmatpush.bf16.msra.mxu0 %v315_v8 }
   0xb   :  { %193 = vmatpush.bf16.msra.mxu1 %v323_v9 }
   0xe   :  { %181 = vmatpush.bf16.msra.mxu0 %v314_v11 }
   0xf   :  { %194 = vmatpush.bf16.msra.mxu1 %v322_v12 }
  0x12   :  { %182 = vmatpush.bf16.msra.mxu0 %v313_v13 }
  0x13   :  { %195 = vmatpush.bf16.msra.mxu1 %v321_v14 }
  0x16   :  { %183 = vmatpush.bf16.msra.mxu0 %v312_v15 }
  0x17   :  { %196 = vmatpush.bf16.msra.mxu1 %v320_v16 }
  0x1a   :  { %184 = vmatpush.bf16.msra.mxu0 %v311_v17 }
  0x1b   :  { %197 = vmatpush.bf16.msra.mxu1 %v319_v18 }
  0x1e   :  { %185 = vmatpush.bf16.msra.mxu0 %v310_v22 }
  0x1f   :  { %198 = vmatpush.bf16.msra.mxu1 %v318_v23 }
  0x21   :  { %186 = vmatmul.bf16.vlgmr.msra.gmra.mxu0 %v61_v24 }
  0x22   :  { %199 = vmatmul.bf16.vlgmr.msra.gmra.mxu1 %v62_v25 }
  0x8c   :  { %v213_v26 = vpop.f32.mrf.mxu2 }
  0x94   :  { %v215_v27 = vpop.f32.mrf.mxu2 }
  0x9e   :  { %v187_v28 = vpop.f32.mrf.mxu0 }
  0x9f   :  { %v200_v29 = vpop.f32.mrf.mxu1 }
  0xa0   :  { %v201_v30 = vadd.f32 %v200_v29, %v187_v28 }
  0xa2   :  { %v214_v32 = vadd.f32 %v213_v26, %v201_v30 }
  0xa4   :  { %v221_v34 = vmul.f32 %v328_v31, %v214_v32 }
  0xa6   :  { %v226_v35 = vadd.f32 %v329_v33, %v221_v34  ;;  %v189_v36 = vpop.f32.mrf.mxu0 }
  0xa7   :  { %v202_v37 = vpop.f32.mrf.mxu1 }
  0xa8   :  { %vm227_vm1 = vcmp.ge.f32.partialorder %v226_v35, 0.0  ;;  %v228_v38 = vmul.f32 0.1, %v226_v35 }
  0xaa   :  { %v229_v39 = vsel %vm227_vm1, %v226_v35, %v228_v38 }
  0xab   :  { %v230_v40 = vpack.c.bf16 %v229_v39, %v229_v39 }
  0xad   :  { %232 = vst.msk [vmem:[%s428_s4] sm:$0xf] %vm231_vm2, %v230_v40 }

// kernel: unet_forward.14
= control target key start
LH: loop header
LB: loop body
LE: loop exit
PB: predicated region body
PF: predicated region fallthrough
CT: control target
= control target key end

     0   :  { %vm174_vm0 = vcmask 261120   ;;  %s423_s1 = inlined_call_operand.vmem [shape: bf16[288,128], index: 1, kind: input, shape index: {}]   ;;  %s424_s0 = inlined_call_operand.vmem [shape: bf16[8,288], index: 0, kind: input, shape index: {}]   ;;  %s425_s2 = inlined_call_operand.vmem [shape: f32[1,128], index: 2, kind: input, shape index: {}]   ;;  %s426_s3 = inlined_call_operand.vmem [shape: f32[1,128], index: 3, kind: input, shape index: {}]   ;;  %s427_s4 = inlined_call_operand.vmem [shape: bf16[8,128], index: 4, kind: output, shape index: {}]  }
   0x1   :  { %v316_v0 = vld [vmem:[%s423_s1 + $0x38] sm:$0xff]  ;;  %v315_v2 = vld [vmem:[%s423_s1 + $0x30] sm:$0xff]  ;;  %v326_v4 = vld [vmem:[%s423_s1 + $0x88] sm:$0xff] }
   0x2   :  { %v324_v1 = vld [vmem:[%s423_s1 + $0x78] sm:$0xff]  ;;  %178 = vmatpush.bf16.msra.mxu0 %v316_v0  ;;  %v323_v3 = vld [vmem:[%s423_s1 + $0x70] sm:$0xff]  ;;  %210 = vmatpush.bf16.msra.mxu2 %v326_v4  ;;  %v325_v5 = vld [vmem:[%s423_s1 + $0x80] sm:$0xff] }
   0x3   :  { %191 = vmatpush.bf16.msra.mxu1 %v324_v1  ;;  %v19_v6 = vld [vmem:[%s424_s0 + $0x8] sm:$0xf]  ;;  %v313_v11 = vld [vmem:[%s423_s1 + $0x20] sm:$0xff]  ;;  %v312_v13 = vld [vmem:[%s423_s1 + $0x18] sm:$0xff] }
   0x4   :  { %v60_v7 = vunpack.c.l.b16 %v19_v6  ;;  %v314_v8 = vld [vmem:[%s423_s1 + $0x28] sm:$0xff]  ;;  %v321_v12 = vld [vmem:[%s423_s1 + $0x60] sm:$0xff]  ;;  %v320_v14 = vld [vmem:[%s423_s1 + $0x58] sm:$0xff] }
   0x5   :  { %v322_v9 = vld [vmem:[%s423_s1 + $0x68] sm:$0xff]  ;;  %v311_v15 = vld [vmem:[%s423_s1 + $0x10] sm:$0xff]  ;;  %v18_v19 = vld [vmem:[%s424_s0] sm:$0xff] }
   0x6   :  { %179 = vmatpush.bf16.msra.mxu0 %v315_v2  ;;  %v63_v10 = vpack.c.b16 %v60_v7, %v60_v7  ;;  %211 = vmatpush.bf16.msra.mxu2 %v325_v5  ;;  %v319_v16 = vld [vmem:[%s423_s1 + $0x50] sm:$0xff]  ;;  %v310_v17 = vld [vmem:[%s423_s1 + $0x8] sm:$0xff]  ;;  %v58_v20 = vunpack.c.l.b16 %v18_v19  ;;  %v59_v21 = vunpack.c.h.b16 %v18_v19  ;;  %v309_v22 = vld [vmem:[%s423_s1] sm:$0xff] }
   0x7   :  { %192 = vmatpush.bf16.msra.mxu1 %v323_v3  ;;  %v318_v18 = vld [vmem:[%s423_s1 + $0x48] sm:$0xff]  ;;  %v317_v23 = vld [vmem:[%s423_s1 + $0x40] sm:$0xff] }
   0x8   :  { %v61_v24 = vpack.c.b16 %v58_v20, %v58_v20  ;;  %v62_v25 = vpack.c.b16 %v59_v21, %v59_v21  ;;  %v327_v31 = vld [vmem:[%s425_s2] ss:$0 sm:$0xff] }
   0x9   :  { %308 = vmatmul.msk.bf16.vlgmr.msra.gmra.mxu2 %vm174_vm0, %v63_v10  ;;  %v328_v33 = vld [vmem:[%s426_s3] ss:$0 sm:$0xff] }
   0xa   :  { %180 = vmatpush.bf16.msra.mxu0 %v314_v8 }
   0xb   :  { %193 = vmatpush.bf16.msra.mxu1 %v322_v9 }
   0xe   :  { %181 = vmatpush.bf16.msra.mxu0 %v313_v11 }
   0xf   :  { %194 = vmatpush.bf16.msra.mxu1 %v321_v12 }
  0x12   :  { %182 = vmatpush.bf16.msra.mxu0 %v312_v13 }
  0x13   :  { %195 = vmatpush.bf16.msra.mxu1 %v320_v14 }
  0x16   :  { %183 = vmatpush.bf16.msra.mxu0 %v311_v15 }
  0x17   :  { %196 = vmatpush.bf16.msra.mxu1 %v319_v16 }
  0x1a   :  { %184 = vmatpush.bf16.msra.mxu0 %v310_v17 }
  0x1b   :  { %197 = vmatpush.bf16.msra.mxu1 %v318_v18 }
  0x1e   :  { %185 = vmatpush.bf16.msra.mxu0 %v309_v22 }
  0x1f   :  { %198 = vmatpush.bf16.msra.mxu1 %v317_v23 }
  0x21   :  { %186 = vmatmul.bf16.vlgmr.msra.gmra.mxu0 %v61_v24 }
  0x22   :  { %199 = vmatmul.bf16.vlgmr.msra.gmra.mxu1 %v62_v25 }
  0x8c   :  { %v213_v26 = vpop.f32.mrf.mxu2 }
  0x94   :  { %v215_v27 = vpop.f32.mrf.mxu2 }
  0x9e   :  { %v187_v28 = vpop.f32.mrf.mxu0 }
  0x9f   :  { %v200_v29 = vpop.f32.mrf.mxu1 }
  0xa0   :  { %v201_v30 = vadd.f32 %v200_v29, %v187_v28 }
  0xa2   :  { %v214_v32 = vadd.f32 %v213_v26, %v201_v30 }
  0xa4   :  { %v221_v34 = vmul.f32 %v327_v31, %v214_v32 }
  0xa6   :  { %v226_v35 = vadd.f32 %v328_v33, %v221_v34  ;;  %v189_v36 = vpop.f32.mrf.mxu0 }
  0xa7   :  { %v202_v37 = vpop.f32.mrf.mxu1 }
  0xa8   :  { %vm227_vm1 = vcmp.ge.f32.partialorder %v226_v35, 0.0  ;;  %v228_v38 = vmul.f32 0.1, %v226_v35 }
  0xaa   :  { %v229_v39 = vsel %vm227_vm1, %v226_v35, %v228_v38 }
  0xab   :  { %v230_v40 = vpack.c.bf16 %v229_v39, %v229_v39 }
  0xad   :  { %231 = vst [vmem:[%s427_s4] sm:$0xf] %v230_v40 }

// kernel: unet_forward.15
= control target key start
LH: loop header
LB: loop body
LE: loop exit
PB: predicated region body
PF: predicated region fallthrough
CT: control target
= control target key end

     0   :  { %s1075_s21 = smov 0   ;;  %s1235_s0 = inlined_call_operand.vmem [shape: bf16[32,288], index: 0, kind: input, shape index: {}]   ;;  %s1236_s1 = inlined_call_operand.vmem [shape: bf16[32,288], index: 1, kind: input, shape index: {}]   ;;  %s1237_s2 = inlined_call_operand.vmem [shape: bf16[288,128], index: 2, kind: input, shape index: {}]   ;;  %s1238_s3 = inlined_call_operand.vmem [shape: bf16[288,128], index: 3, kind: input, shape index: {}]   ;;  %s1239_s4 = inlined_call_operand.vmem [shape: f32[1,128], index: 4, kind: input, shape index: {}]   ;;  %s1240_s5 = inlined_call_operand.vmem [shape: f32[1,128], index: 5, kind: input, shape index: {}]   ;;  %s1241_s6 = inlined_call_operand.vmem [shape: bf16[32,128], index: 6, kind: output, shape index: {}]  }
   0x1 LB: > { %s791_s22 = sadd.s32 4294967295, %s1038_s21   ;;  %p795_p0 = scmp.ge.s32.totalorder %s1038_s21, 1  ;;  %s1038_s21 = sphi %s1075_s21, %s16_s21  }
   0x2   : > { %p226_p1 = scmp.lt.s32.totalorder %s1038_s21, 3 }
   0x4   : > { %p227_p2 = pnand %p795_p0, %p226_p1 }
   0x5   : > { %s796_s29 = sshll.u32 (!%p227_p2), %s791_s22, 1 }
   0x6   : > { %230 = sbr.rel (%p227_p2) target bundleno = 205 (0xcd), region = 44  ;;  %p264_p3 = scmp.lt.s32.totalorder (!%p227_p2), %s796_s29, 3 }
   0xb   : > { %v1005_v0 = vld [vmem:[%s1238_s3 + $0x38] sm:$0xff]  ;;  %v1015_v2 = vld [vmem:[%s1238_s3 + $0x88] sm:$0xff]  ;;  %v1004_v4 = vld [vmem:[%s1238_s3 + $0x30] sm:$0xff]  ;;  %s1243_s29 = smov (!%p264_p3, %s796_s29), 3  ;;  %vm487_vm0 = vcmask 261120  }
   0xc   : > { %v1013_v1 = vld [vmem:[%s1238_s3 + $0x78] sm:$0xff]  ;;  %491 = vmatpush.bf16.msra.mxu0 %v1005_v0  ;;  %v1012_v5 = vld [vmem:[%s1238_s3 + $0x70] sm:$0xff]  ;;  %525 = vmatpush.bf16.msra.mxu2 %v1015_v2  ;;  %v1014_v6 = vld [vmem:[%s1238_s3 + $0x80] sm:$0xff]  ;;  %s1021_s18 = smul.u32 12, %s1243_s29  ;;  %s801_s20 = sshll.u32 %s1243_s29, 2 }
   0xd   : > { %v984_v3 = vld [vmem:[%s1237_s2 + $0x38] sm:$0xff]  ;;  %505 = vmatpush.bf16.msra.mxu1 %v1013_v1  ;;  %v983_v7 = vld [vmem:[%s1237_s2 + $0x30] sm:$0xff]  ;;  %v1003_v9 = vld [vmem:[%s1238_s3 + $0x28] sm:$0xff]  ;;  %s281_s24 = scalar_lea.vmem %s1241_s6, %s801_s20 }
   0xe   : > { %659 = vmatpush.bf16.msra.mxu3 %v984_v3  ;;  %v992_v8 = vld [vmem:[%s1237_s2 + $0x78] sm:$0xff]  ;;  %v1011_v10 = vld [vmem:[%s1238_s3 + $0x68] sm:$0xff]  ;;  %s1127_s28 = scalar_lea.vmem %s1236_s1, %s1021_s18  ;;  %v991_v12 = vld [vmem:[%s1237_s2 + $0x70] sm:$0xff]  ;;  %s1191_s26 = scalar_lea.vmem %s1235_s0, %s1021_s18 }
   0xf   : > { %v982_v11 = vld [vmem:[%s1237_s2 + $0x28] sm:$0xff]  ;;  %v997_v14 = vld [vmem:[%s1127_s28 + $0x10] sm:$0xf0]  ;;  %v1002_v16 = vld [vmem:[%s1238_s3 + $0x20] sm:$0xff] }
  0x10   : > { %492 = vmatpush.bf16.msra.mxu0 %v1004_v4  ;;  %526 = vmatpush.bf16.msra.mxu2 %v1014_v6  ;;  %v812_v13 = vld [vmem:[%s1127_s28 + $0x8] sm:$0xf]  ;;  %v1010_v17 = vld [vmem:[%s1238_s3 + $0x60] sm:$0xff]  ;;  %v1001_v20 = vld [vmem:[%s1238_s3 + $0x18] sm:$0xff] }
  0x11   : > { %506 = vmatpush.bf16.msra.mxu1 %v1012_v5  ;;  %v813_v15 = vor.u32 %v997_v14, %v812_v13  ;;  %v981_v18 = vld [vmem:[%s1237_s2 + $0x20] sm:$0xff]  ;;  %v990_v19 = vld [vmem:[%s1237_s2 + $0x68] sm:$0xff]  ;;  %v1009_v21 = vld [vmem:[%s1238_s3 + $0x58] sm:$0xff] }
  0x12   : > { %660 = vmatpush.bf16.msra.mxu3 %v983_v7  ;;  %v980_v22 = vld [vmem:[%s1237_s2 + $0x18] sm:$0xff]  ;;  %v989_v23 = vld [vmem:[%s1237_s2 + $0x60] sm:$0xff]  ;;  %v1000_v24 = vld [vmem:[%s1238_s3 + $0x10] sm:$0xff] }
  0x13   : > { %886 = vmatmul.msk.bf16.vlgmr.msra.gmra.mxu2 %vm487_vm0, %v813_v15  ;;  %v1008_v25 = vld [vmem:[%s1238_s3 + $0x50] sm:$0xff]  ;;  %v988_v27 = vld [vmem:[%s1237_s2 + $0x58] sm:$0xff]  ;;  %v999_v28 = vld [vmem:[%s1238_s3 + $0x8] sm:$0xff] }
  0x14   : > { %673 = vmatpush.bf16.msrb.mxu2 %v992_v8  ;;  %493 = vmatpush.bf16.msra.mxu0 %v1003_v9  ;;  %v979_v26 = vld [vmem:[%s1237_s2 + $0x10] sm:$0xff]  ;;  %v1007_v29 = vld [vmem:[%s1238_s3 + $0x48] sm:$0xff]  ;;  %v998_v32 = vld [vmem:[%s1238_s3] sm:$0xff] }
  0x15   : > { %507 = vmatpush.bf16.msra.mxu1 %v1011_v10  ;;  %v978_v30 = vld [vmem:[%s1237_s2 + $0x8] sm:$0xff]  ;;  %v987_v31 = vld [vmem:[%s1237_s2 + $0x50] sm:$0xff]  ;;  %v1006_v33 = vld [vmem:[%s1238_s3 + $0x40] sm:$0xff] }
  0x16   : > { %661 = vmatpush.bf16.msra.mxu3 %v982_v11  ;;  %v977_v34 = vld [vmem:[%s1237_s2] sm:$0xff]  ;;  %v996_v36 = vld [vmem:[%s1127_s28 + $0x8] sm:$0xf0]  ;;  %v806_v38 = vld [vmem:[%s1127_s28 + $0xc] sm:$0xf0] }
  0x17   : > { %v804_v35 = vld [vmem:[%s1127_s28] sm:$0xf]  ;;  %v995_v37 = vld [vmem:[%s1127_s28 + $0x4] sm:$0xf]  ;;  %v975_v40 = vld [vmem:[%s1191_s26 + $0x8] sm:$0xf0] }
  0x18   : > { %674 = vmatpush.bf16.msrb.mxu2 %v991_v12  ;;  %494 = vmatpush.bf16.msra.mxu0 %v1002_v16  ;;  %v889_v39 = vld [vmem:[%s1191_s26] sm:$0xf]  ;;  %v994_v41 = vld [vmem:[%s1237_s2 + $0x88] sm:$0xff]  ;;  %v805_v43 = vor.u32 %v996_v36, %v804_v35  ;;  %v809_v44 = vor.u32 %v995_v37, %v806_v38  ;;  %v974_v48 = vld [vmem:[%s1191_s26 + $0x4] sm:$0xf] }
  0x19   : > { %508 = vmatpush.bf16.msra.mxu1 %v1010_v17  ;;  %v986_v42 = vld [vmem:[%s1237_s2 + $0x48] sm:$0xff]  ;;  %v890_v45 = vor.u32 %v975_v40, %v889_v39  ;;  %v993_v46 = vld [vmem:[%s1237_s2 + $0x80] sm:$0xff]  ;;  %v891_v49 = vld [vmem:[%s1191_s26 + $0xc] sm:$0xf0] }
  0x1a   : > { %662 = vmatpush.bf16.msra.mxu3 %v981_v18  ;;  %v985_v47 = vld [vmem:[%s1237_s2 + $0x40] sm:$0xff]  ;;  %v894_v50 = vor.u32 %v974_v48, %v891_v49  ;;  %v897_v51 = vld [vmem:[%s1191_s26 + $0x8] sm:$0xf]  ;;  %v976_v52 = vld [vmem:[%s1191_s26 + $0x10] sm:$0xf0] }
  0x1b   : > { %v898_v53 = vor.u32 %v976_v52, %v897_v51  ;;  %v1030_v5 = vld [vmem:[%s1239_s4] ss:$0 sm:$0xff] }
  0x1c   : > { %675 = vmatpush.bf16.msrb.mxu2 %v990_v19  ;;  %495 = vmatpush.bf16.msra.mxu0 %v1001_v20  ;;  %v1031_v11 = vld [vmem:[%s1240_s5] ss:$0 sm:$0xff] }
  0x1d   : > { %509 = vmatpush.bf16.msra.mxu1 %v1009_v21 }
  0x1e   : > { %663 = vmatpush.bf16.msra.mxu3 %v980_v22 }
  0x20   : > { %676 = vmatpush.bf16.msrb.mxu2 %v989_v23  ;;  %496 = vmatpush.bf16.msra.mxu0 %v1000_v24 }
  0x21   : > { %510 = vmatpush.bf16.msra.mxu1 %v1008_v25 }
  0x22   : > { %664 = vmatpush.bf16.msra.mxu3 %v979_v26 }
  0x24   : > { %677 = vmatpush.bf16.msrb.mxu2 %v988_v27  ;;  %497 = vmatpush.bf16.msra.mxu0 %v999_v28 }
  0x25   : > { %511 = vmatpush.bf16.msra.mxu1 %v1007_v29 }
  0x26   : > { %665 = vmatpush.bf16.msra.mxu3 %v978_v30 }
  0x28   : > { %678 = vmatpush.bf16.msrb.mxu2 %v987_v31  ;;  %498 = vmatpush.bf16.msra.mxu0 %v998_v32 }
  0x29   : > { %512 = vmatpush.bf16.msra.mxu1 %v1006_v33 }
  0x2a   : > { %666 = vmatpush.bf16.msra.mxu3 %v977_v34 }
  0x2b   : > { %499 = vmatmul.bf16.vlgmr.msra.gmra.mxu0 %v805_v43 }
  0x2c   : > { %693 = vmatpush.bf16.msrb.mxu0 %v994_v41  ;;  %679 = vmatpush.bf16.msrb.mxu2 %v986_v42 }
  0x2d   : > { %513 = vmatmul.bf16.vlgmr.msra.gmra.mxu1 %v809_v44  ;;  %667 = vmatmul.bf16.vlgmr.msra.gmra.mxu3 %v890_v45 }
  0x30   : > { %694 = vmatpush.bf16.msrb.mxu0 %v993_v46  ;;  %680 = vmatpush.bf16.msrb.mxu2 %v985_v47 }
  0x33   : > { %681 = vmatmul.bf16.vlgmr.msrb.gmra.mxu2 %v894_v50 }
  0x3b   : > { %971 = vmatmul.msk.bf16.vlgmr.msrb.gmra.mxu0 %vm487_vm0, %v898_v53 }
  0x96   : > { %v528_v54 = vpop.f32.mrf.mxu2 }
  0x9e   : > { %v530_v57 = vpop.f32.mrf.mxu2 }
  0xa8   : > { %v500_v55 = vpop.f32.mrf.mxu0 }
  0xaa   : > { %v514_v56 = vpop.f32.mrf.mxu1 }
  0xab   : > { %v515_v58 = vadd.f32 %v514_v56, %v500_v55 }
  0xad   : > { %v529_v61 = vadd.f32 %v528_v54, %v515_v58 }
  0xb0   : > { %v668_v59 = vpop.f32.mrf.mxu3  ;;  %v502_v60 = vpop.f32.mrf.mxu0 }
  0xb1   : > { %v669_v0 = vadd.f32 %v668_v59, %v529_v61 }
  0xb2   : > { %v516_v62 = vpop.f32.mrf.mxu1 }
  0xb3   : > { %v517_v1 = vadd.f32 %v516_v62, %v502_v60 }
  0xb5   : > { %v531_v7 = vadd.f32 %v530_v57, %v517_v1 }
  0xb6   : > { %v682_v63 = vpop.f32.mrf.mxu2 }
  0xb7   : > { %v683_v2 = vadd.f32 %v682_v63, %v669_v0 }
  0xb8   : > { %v696_v3 = vpop.f32.mrf.mxu0  ;;  %v670_v6 = vpop.f32.mrf.mxu3 }
  0xb9   : > { %v697_v4 = vadd.f32 %v696_v3, %v683_v2  ;;  %v671_v9 = vadd.f32 %v670_v6, %v531_v7 }
  0xbb   : > { %v705_v10 = vmul.f32 %v1030_v5, %v697_v4 }
  0xbd   : > { %v711_v14 = vadd.f32 %v1031_v11, %v705_v10 }
  0xbe   : > { %v684_v8 = vpop.f32.mrf.mxu2 }
  0xbf   : > { %v685_v12 = vadd.f32 %v684_v8, %v671_v9  ;;  %v715_v17 = vmul.f32 0.1, %v711_v14  ;;  %vm713_vm1 = vcmp.ge.f32.partialorder %v711_v14, 0.0 }
  0xc0   : > { %v698_v13 = vpop.f32.mrf.mxu0 }
  0xc1   : > { %v699_v15 = vadd.f32 %v698_v13, %v685_v12  ;;  %v717_v20 = vsel %vm713_vm1, %v711_v14, %v715_v17 }
  0xc3   : > { %v706_v16 = vmul.f32 %v1030_v5, %v699_v15 }
  0xc5   : > { %v712_v18 = vadd.f32 %v1031_v11, %v706_v16 }
  0xc7   : > { %vm714_vm2 = vcmp.ge.f32.partialorder %v712_v18, 0.0  ;;  %v716_v19 = vmul.f32 0.1, %v712_v18 }
  0xc9   : > { %v718_v21 = vsel %vm714_vm2, %v712_v18, %v716_v19 }
  0xca   : > { %v1019_v22 = vpack.c.bf16 %v718_v21, %v717_v20 }
  0xcc   : > { %1020 = vst [vmem:[%s281_s24] sm:$0xff] %v1019_v22  }
  0xcd PF: > { %s16_s21 = sadd.s32 1, %s1038_s21  }
  0xce   : > { %p13_p4 = scmp.ge.s32.totalorder %s16_s21, 4  }
  0xd0   :  { %15 = sbr.rel (!%p13_p4) target bundleno = 1 (0x1), region = 77 }

// kernel: unet_forward.16
= control target key start
LH: loop header
LB: loop body
LE: loop exit
PB: predicated region body
PF: predicated region fallthrough
CT: control target
= control target key end

     0   :  { %s1463_s21 = smov 0   ;;  %s1715_s0 = inlined_call_operand.vmem [shape: bf16[128,288], index: 0, kind: input, shape index: {}]   ;;  %s1716_s1 = inlined_call_operand.vmem [shape: bf16[128,288], index: 1, kind: input, shape index: {}]   ;;  %s1717_s2 = inlined_call_operand.vmem [shape: bf16[288,128], index: 2, kind: input, shape index: {}]   ;;  %s1718_s3 = inlined_call_operand.vmem [shape: bf16[288,128], index: 3, kind: input, shape index: {}]   ;;  %s1719_s4 = inlined_call_operand.vmem [shape: f32[1,128], index: 4, kind: input, shape index: {}]   ;;  %s1720_s5 = inlined_call_operand.vmem [shape: f32[1,128], index: 5, kind: input, shape index: {}]   ;;  %s1721_s6 = inlined_call_operand.vmem [shape: bf16[128,128], index: 6, kind: output, shape index: {}]  }
   0x1 LB: > { %s1055_s22 = sadd.s32 4294967295, %s1426_s21   ;;  %p1059_p0 = scmp.ge.s32.totalorder %s1426_s21, 1  ;;  %s1426_s21 = sphi %s1463_s21, %s16_s21  }
   0x2   : > { %p226_p1 = scmp.lt.s32.totalorder %s1426_s21, 3 }
   0x4   : > { %p227_p2 = pnand %p1059_p0, %p226_p1 }
   0x5   : > { %s1060_s25 = sshll.u32 (!%p227_p2), %s1055_s22, 3 }
   0x6   : > { %230 = sbr.rel (%p227_p2) target bundleno = 277 (0x115), region = 44  ;;  %p264_p3 = scmp.lt.s32.totalorder (!%p227_p2), %s1060_s25, 15 }
   0xb   : > { %v1365_v0 = vld [vmem:[%s1718_s3 + $0x38] sm:$0xff]  ;;  %v1375_v1 = vld [vmem:[%s1718_s3 + $0x88] sm:$0xff]  ;;  %v1364_v2 = vld [vmem:[%s1718_s3 + $0x30] sm:$0xff]  ;;  %s1723_s25 = smov (!%p264_p3, %s1060_s25), 15  ;;  %vm556_vm0 = vcmask 261120  }
   0xc   : > { %569 = vmatpush.bf16.msra.mxu0 %v1365_v0  ;;  %1399 = vmatpush.bf16.msra.mxu1 %v1365_v0  ;;  %v1374_v3 = vld [vmem:[%s1718_s3 + $0x80] sm:$0xff]  ;;  %v1335_v4 = vld [vmem:[%s1717_s2 + $0x38] sm:$0xff]  ;;  %s1409_s12 = smul.u32 12, %s1723_s25  ;;  %v1363_v6 = vld [vmem:[%s1718_s3 + $0x28] sm:$0xff]  ;;  %s1065_s22 = sshll.u32 %s1723_s25, 2 }
   0xd   : > { %1407 = vmatpush.bf16.msra.mxu3 %v1375_v1  ;;  %633 = vmatpush.bf16.msra.mxu2 %v1375_v1  ;;  %v1343_v5 = vld [vmem:[%s1717_s2 + $0x78] sm:$0xff]  ;;  %v1334_v7 = vld [vmem:[%s1717_s2 + $0x30] sm:$0xff]  ;;  %v1362_v14 = vld [vmem:[%s1718_s3 + $0x20] sm:$0xff] }
   0xe   : > { %s1500_s17 = scalar_lea.vmem %s1716_s1, %s1409_s12  ;;  %v1342_v13 = vld [vmem:[%s1717_s2 + $0x70] sm:$0xff]  ;;  %v1333_v16 = vld [vmem:[%s1717_s2 + $0x28] sm:$0xff]  ;;  %v1361_v18 = vld [vmem:[%s1718_s3 + $0x18] sm:$0xff]  ;;  %s1589_s26 = scalar_lea.vmem %s1715_s0, %s1409_s12 }
   0xf   : > { %v1100_v8 = vld [vmem:[%s1500_s17 + $0x38] sm:$0xf]  ;;  %v1354_v9 = vld [vmem:[%s1500_s17 + $0x40] sm:$0xf0]  ;;  %v1076_v10 = vld [vmem:[%s1500_s17 + $0x8] sm:$0xf] }
  0x10   : > { %570 = vmatpush.bf16.msra.mxu0 %v1364_v2  ;;  %1400 = vmatpush.bf16.msra.mxu1 %v1364_v2  ;;  %v1101_v11 = vor.u32 %v1354_v9, %v1100_v8  ;;  %v1348_v12 = vld [vmem:[%s1500_s17 + $0x10] sm:$0xf0]  ;;  %v1341_v17 = vld [vmem:[%s1717_s2 + $0x68] sm:$0xff]  ;;  %v1332_v19 = vld [vmem:[%s1717_s2 + $0x20] sm:$0xff] }
  0x11   : > { %1408 = vmatpush.bf16.msra.mxu3 %v1374_v3  ;;  %634 = vmatpush.bf16.msra.mxu2 %v1374_v3  ;;  %v1077_v15 = vor.u32 %v1348_v12, %v1076_v10  ;;  %v1340_v20 = vld [vmem:[%s1717_s2 + $0x60] sm:$0xff]  ;;  %v1360_v21 = vld [vmem:[%s1718_s3 + $0x10] sm:$0xff]  ;;  %v1357_v23 = vld [vmem:[%s1500_s17 + $0x58] sm:$0xf0] }
  0x12   : > { %v1112_v22 = vld [vmem:[%s1500_s17 + $0x50] sm:$0xf]  ;;  %v1331_v24 = vld [vmem:[%s1717_s2 + $0x18] sm:$0xff]  ;;  %v1088_v25 = vld [vmem:[%s1500_s17 + $0x20] sm:$0xf] }
  0x13   : > { %v1351_v26 = vld [vmem:[%s1500_s17 + $0x28] sm:$0xf0]  ;;  %v1339_v27 = vld [vmem:[%s1717_s2 + $0x58] sm:$0xff]  ;;  %v1113_v29 = vor.u32 %v1357_v23, %v1112_v22  ;;  %v1330_v31 = vld [vmem:[%s1717_s2 + $0x10] sm:$0xff] }
  0x14   : > { %571 = vmatpush.bf16.msra.mxu0 %v1363_v6  ;;  %1401 = vmatpush.bf16.msra.mxu1 %v1363_v6  ;;  %v1359_v28 = vld [vmem:[%s1718_s3 + $0x8] sm:$0xff]  ;;  %v1089_v30 = vor.u32 %v1351_v26, %v1088_v25  ;;  %v1358_v32 = vld [vmem:[%s1718_s3] sm:$0xff]  ;;  %v1338_v34 = vld [vmem:[%s1717_s2 + $0x50] sm:$0xff] }
  0x15   : > { %836 = vmatpush.bf16.msrb.mxu3 %v1335_v4  ;;  %865 = vmatpush.bf16.msrb.mxu2 %v1343_v5  ;;  %v1068_v33 = vld [vmem:[%s1500_s17] sm:$0xf]  ;;  %v1347_v35 = vld [vmem:[%s1500_s17 + $0x8] sm:$0xf0]  ;;  %v1092_v36 = vld [vmem:[%s1500_s17 + $0x30] sm:$0xf] }
  0x16   : > { %1188 = vmatmul.msk.bf16.vlgmr.msra.gmra.mxu3 %vm556_vm0, %v1101_v11  ;;  %1186 = vmatmul.msk.bf16.vlgmr.msra.gmra.mxu2 %vm556_vm0, %v1077_v15  ;;  %v1353_v37 = vld [vmem:[%s1500_s17 + $0x38] sm:$0xf0]  ;;  %v1345_v39 = vld [vmem:[%s1717_s2 + $0x88] sm:$0xff]  ;;  %v1069_v41 = vor.u32 %v1347_v35, %v1068_v33  ;;  %v1372_v44 = vld [vmem:[%s1718_s3 + $0x70] sm:$0xff] }
  0x17   : > { %v1373_v38 = vld [vmem:[%s1718_s3 + $0x78] sm:$0xff]  ;;  %v1329_v40 = vld [vmem:[%s1717_s2 + $0x8] sm:$0xff]  ;;  %v1093_v42 = vor.u32 %v1353_v37, %v1092_v36  ;;  %v1344_v45 = vld [vmem:[%s1717_s2 + $0x80] sm:$0xff] }
  0x18   : > { %572 = vmatpush.bf16.msra.mxu0 %v1362_v14  ;;  %1402 = vmatpush.bf16.msra.mxu1 %v1362_v14  ;;  %v1337_v43 = vld [vmem:[%s1717_s2 + $0x48] sm:$0xff]  ;;  %v1328_v46 = vld [vmem:[%s1717_s2] sm:$0xff]  ;;  %v1194_v52 = vld [vmem:[%s1589_s26 + $0xc] sm:$0xf0] }
  0x19   : > { %837 = vmatpush.bf16.msrb.mxu3 %v1334_v7  ;;  %866 = vmatpush.bf16.msrb.mxu2 %v1342_v13  ;;  %v1336_v47 = vld [vmem:[%s1717_s2 + $0x40] sm:$0xff]  ;;  %v1371_v48 = vld [vmem:[%s1718_s3 + $0x68] sm:$0xff]  ;;  %v1080_v56 = vld [vmem:[%s1500_s17 + $0x18] sm:$0xf] }
  0x1a   : > { %v1192_v49 = vld [vmem:[%s1589_s26] sm:$0xf]  ;;  %v1317_v50 = vld [vmem:[%s1589_s26 + $0x8] sm:$0xf0]  ;;  %v1316_v51 = vld [vmem:[%s1589_s26 + $0x4] sm:$0xf] }
  0x1b   : > { %v1370_v53 = vld [vmem:[%s1718_s3 + $0x60] sm:$0xff]  ;;  %v1193_v54 = vor.u32 %v1317_v50, %v1192_v49  ;;  %v1197_v55 = vor.u32 %v1316_v51, %v1194_v52  ;;  %v1104_v58 = vld [vmem:[%s1500_s17 + $0x48] sm:$0xf]  ;;  %v1356_v59 = vld [vmem:[%s1500_s17 + $0x50] sm:$0xf0] }
  0x1c   : > { %573 = vmatpush.bf16.msra.mxu0 %v1361_v18  ;;  %1403 = vmatpush.bf16.msra.mxu1 %v1361_v18  ;;  %v1350_v57 = vld [vmem:[%s1500_s17 + $0x20] sm:$0xf0]  ;;  %v1369_v60 = vld [vmem:[%s1718_s3 + $0x58] sm:$0xff]  ;;  %v1105_v62 = vor.u32 %v1356_v59, %v1104_v58  ;;  %v1368_v63 = vld [vmem:[%s1718_s3 + $0x50] sm:$0xff] }
  0x1d   : > { %838 = vmatpush.bf16.msrb.mxu3 %v1333_v16  ;;  %867 = vmatpush.bf16.msrb.mxu2 %v1341_v17  ;;  %v1081_v61 = vor.u32 %v1350_v57, %v1080_v56  ;;  %v1367_v0 = vld [vmem:[%s1718_s3 + $0x48] sm:$0xff]  ;;  %v1204_v1 = vld [vmem:[%s1589_s26 + $0x18] sm:$0xf]  ;;  %v1320_v2 = vld [vmem:[%s1589_s26 + $0x20] sm:$0xf0] }
  0x1e   : > { %v1319_v3 = vld [vmem:[%s1589_s26 + $0x1c] sm:$0xf]  ;;  %v1206_v4 = vld [vmem:[%s1589_s26 + $0x24] sm:$0xf0]  ;;  %v1366_v5 = vld [vmem:[%s1718_s3 + $0x40] sm:$0xff]  ;;  %v1205_v6 = vor.u32 %v1320_v2, %v1204_v1 }
  0x1f   : > { %v1209_v7 = vor.u32 %v1319_v3, %v1206_v4  ;;  %v1346_v8 = vld [vmem:[%s1500_s17 + $0x4] sm:$0xf]  ;;  %v1070_v9 = vld [vmem:[%s1500_s17 + $0xc] sm:$0xf0]  ;;  %v1200_v10 = vld [vmem:[%s1589_s26 + $0x8] sm:$0xf] }
  0x20   : > { %574 = vmatpush.bf16.msra.mxu0 %v1360_v21  ;;  %1404 = vmatpush.bf16.msra.mxu1 %v1360_v21  ;;  %v1318_v11 = vld [vmem:[%s1589_s26 + $0x10] sm:$0xf0]  ;;  %v1073_v12 = vor.u32 %v1346_v8, %v1070_v9  ;;  %v1216_v14 = vld [vmem:[%s1589_s26 + $0x30] sm:$0xf]  ;;  %v1323_v15 = vld [vmem:[%s1589_s26 + $0x38] sm:$0xf0] }
  0x21   : > { %839 = vmatpush.bf16.msrb.mxu3 %v1332_v19  ;;  %868 = vmatpush.bf16.msrb.mxu2 %v1340_v20  ;;  %v1201_v13 = vor.u32 %v1318_v11, %v1200_v10  ;;  %v1322_v16 = vld [vmem:[%s1589_s26 + $0x34] sm:$0xf]  ;;  %v1218_v17 = vld [vmem:[%s1589_s26 + $0x3c] sm:$0xf0]  ;;  %v1217_v18 = vor.u32 %v1323_v15, %v1216_v14  ;;  %v1349_v20 = vld [vmem:[%s1500_s17 + $0x1c] sm:$0xf] }
  0x22   : > { %v1221_v19 = vor.u32 %v1322_v16, %v1218_v17  ;;  %v1082_v21 = vld [vmem:[%s1500_s17 + $0x24] sm:$0xf0]  ;;  %v1212_v22 = vld [vmem:[%s1589_s26 + $0x20] sm:$0xf]  ;;  %v1321_v23 = vld [vmem:[%s1589_s26 + $0x28] sm:$0xf0] }
  0x23   : > { %v1213_v25 = vor.u32 %v1321_v23, %v1212_v22  ;;  %v1228_v26 = vld [vmem:[%s1589_s26 + $0x48] sm:$0xf]  ;;  %v1094_v33 = vld [vmem:[%s1500_s17 + $0x3c] sm:$0xf0]  ;;  %v1324_v35 = vld [vmem:[%s1589_s26 + $0x40] sm:$0xf0] }
  0x24   : > { %575 = vmatpush.bf16.msra.mxu0 %v1359_v28  ;;  %1405 = vmatpush.bf16.msra.mxu1 %v1359_v28  ;;  %v1325_v28 = vld [vmem:[%s1589_s26 + $0x4c] sm:$0xf]  ;;  %v1671_v9 = vld [vmem:[%s1719_s4] ss:$0 sm:$0xff] }
  0x25   : > { %840 = vmatpush.bf16.msrb.mxu3 %v1331_v24  ;;  %869 = vmatpush.bf16.msrb.mxu2 %v1339_v27  ;;  %v1085_v24 = vor.u32 %v1349_v20, %v1082_v21  ;;  %v1326_v27 = vld [vmem:[%s1589_s26 + $0x50] sm:$0xf0]  ;;  %v1677_v15 = vld [vmem:[%s1720_s5] ss:$0 sm:$0xff] }
  0x26   : > { %1189 = vmatmul.msk.bf16.gmra.mxu3 %vm556_vm0, %v1113_v29  ;;  %1187 = vmatmul.msk.bf16.gmra.mxu2 %vm556_vm0, %v1089_v30  ;;  %v1230_v29 = vld [vmem:[%s1589_s26 + $0x54] sm:$0xf0]  ;;  %v1229_v30 = vor.u32 %v1326_v27, %v1228_v26 }
  0x28   : > { %576 = vmatpush.bf16.msra.mxu0 %v1358_v32  ;;  %1406 = vmatpush.bf16.msra.mxu1 %v1358_v32  ;;  %v1352_v32 = vld [vmem:[%s1500_s17 + $0x34] sm:$0xf] }
  0x29   : > { %841 = vmatpush.bf16.msrb.mxu3 %v1330_v31  ;;  %870 = vmatpush.bf16.msrb.mxu2 %v1338_v34  ;;  %v1233_v31 = vor.u32 %v1325_v28, %v1230_v29  ;;  %v1224_v34 = vld [vmem:[%s1589_s26 + $0x38] sm:$0xf]  ;;  %v1097_v36 = vor.u32 %v1352_v32, %v1094_v33 }
  0x2a   : > { %v1225_v37 = vor.u32 %v1324_v35, %v1224_v34 }
  0x2b   : > { %577 = vmatmul.bf16.vlgmr.msra.gmra.mxu0 %v1069_v41  ;;  %587 = vmatmul.bf16.vlgmr.msra.gmra.mxu1 %v1093_v42  ;;  %v1327_v41 = vld [vmem:[%s1589_s26 + $0x58] sm:$0xf0] }
  0x2c   : > { %598 = vmatpush.bf16.msrb.mxu1 %v1373_v38  ;;  %900 = vmatpush.bf16.msrb.mxu0 %v1345_v39  ;;  %v1355_v38 = vld [vmem:[%s1500_s17 + $0x4c] sm:$0xf]  ;;  %v1106_v39 = vld [vmem:[%s1500_s17 + $0x54] sm:$0xf0] }
  0x2d   : > { %842 = vmatpush.bf16.msrb.mxu3 %v1329_v40  ;;  %871 = vmatpush.bf16.msrb.mxu2 %v1337_v43  ;;  %v1236_v40 = vld [vmem:[%s1589_s26 + $0x50] sm:$0xf]  ;;  %v1109_v42 = vor.u32 %v1355_v38, %v1106_v39  ;;  %s1686_s26 = scalar_lea.vmem %s1721_s6, %s1065_s22 }
  0x2e   : > { %v1237_v43 = vor.u32 %v1327_v41, %v1236_v40 }
  0x30   : > { %599 = vmatpush.bf16.msrb.mxu1 %v1372_v44  ;;  %901 = vmatpush.bf16.msrb.mxu0 %v1344_v45 }
  0x31   : > { %843 = vmatpush.bf16.msrb.mxu3 %v1328_v46  ;;  %872 = vmatpush.bf16.msrb.mxu2 %v1336_v47 }
  0x34   : > { %600 = vmatpush.bf16.msrb.mxu1 %v1371_v48 }
  0x36   : > { %844 = vmatmul.bf16.vlgmr.msrb.gmra.mxu3 %v1193_v54  ;;  %873 = vmatmul.bf16.vlgmr.msrb.gmra.mxu2 %v1197_v55 }
  0x38   : > { %601 = vmatpush.bf16.msrb.mxu1 %v1370_v53 }
  0x3b   : > { %582 = vmatmul.bf16.gmra.mxu0 %v1081_v61  ;;  %592 = vmatmul.bf16.gmra.mxu1 %v1105_v62 }
  0x3c   : > { %602 = vmatpush.bf16.msrb.mxu1 %v1369_v60 }
  0x40   : > { %603 = vmatpush.bf16.msrb.mxu1 %v1368_v63 }
  0x44   : > { %604 = vmatpush.bf16.msrb.mxu1 %v1367_v0 }
  0x46   : > { %849 = vmatmul.bf16.gmra.mxu3 %v1205_v6  ;;  %878 = vmatmul.bf16.gmra.mxu2 %v1209_v7 }
  0x48   : > { %605 = vmatpush.bf16.msrb.mxu1 %v1366_v5 }
  0x4b   : > { %606 = vmatmul.bf16.vlgmr.msrb.gmra.mxu1 %v1073_v12  ;;  %1310 = vmatmul.msk.bf16.vlgmr.msrb.gmra.mxu0 %vm556_vm0, %v1201_v13 }
  0x56   : > { %854 = vmatmul.bf16.gmra.mxu3 %v1217_v18  ;;  %883 = vmatmul.bf16.gmra.mxu2 %v1221_v19 }
  0x5b   : > { %611 = vmatmul.bf16.gmra.mxu1 %v1085_v24  ;;  %1311 = vmatmul.msk.bf16.gmra.mxu0 %vm556_vm0, %v1213_v25 }
  0x66   : > { %859 = vmatmul.bf16.gmra.mxu3 %v1229_v30  ;;  %888 = vmatmul.bf16.gmra.mxu2 %v1233_v31 }
  0x6b   : > { %616 = vmatmul.bf16.gmra.mxu1 %v1097_v36  ;;  %1312 = vmatmul.msk.bf16.gmra.mxu0 %vm556_vm0, %v1225_v37 }
  0x7b   : > { %621 = vmatmul.bf16.gmra.mxu1 %v1109_v42  ;;  %1313 = vmatmul.msk.bf16.gmra.mxu0 %vm556_vm0, %v1237_v43 }
  0x99   : > { %v1652_v44 = vpop.f32.mrf.mxu3  ;;  %v636_v45 = vpop.f32.mrf.mxu2 }
  0xa1   : > { %v1654_v46 = vpop.f32.mrf.mxu3  ;;  %v638_v47 = vpop.f32.mrf.mxu2 }
  0xa8   : > { %v578_v48 = vpop.f32.mrf.mxu0  ;;  %v1656_v49 = vpop.f32.mrf.mxu1 }
  0xa9   : > { %v1658_v50 = vpop.f32.mrf.mxu3  ;;  %v641_v51 = vpop.f32.mrf.mxu2 }
  0xb0   : > { %v580_v52 = vpop.f32.mrf.mxu0  ;;  %v1660_v53 = vpop.f32.mrf.mxu1 }
  0xb1   : > { %v1662_v54 = vpop.f32.mrf.mxu3  ;;  %v643_v55 = vpop.f32.mrf.mxu2 }
  0xb8   : > { %v583_v56 = vpop.f32.mrf.mxu0  ;;  %v1664_v57 = vpop.f32.mrf.mxu1 }
  0xb9   : > { %v845_v58 = vpop.f32.mrf.mxu3  ;;  %v874_v59 = vpop.f32.mrf.mxu2 }
  0xc0   : > { %v585_v60 = vpop.f32.mrf.mxu0  ;;  %v1666_v61 = vpop.f32.mrf.mxu1 }
  0xc1   : > { %v847_v62 = vpop.f32.mrf.mxu3  ;;  %v876_v2 = vpop.f32.mrf.mxu2 }
  0xc8   : > { %v607_v63 = vpop.f32.mrf.mxu1  ;;  %v903_v0 = vpop.f32.mrf.mxu0 }
  0xc9   : > { %v608_v1 = vadd.f32 %v607_v63, %v578_v48  ;;  %v850_v11 = vpop.f32.mrf.mxu3  ;;  %v879_v13 = vpop.f32.mrf.mxu2 }
  0xcb   : > { %v637_v3 = vadd.f32 %v636_v45, %v608_v1 }
  0xcd   : > { %v846_v4 = vadd.f32 %v845_v58, %v637_v3 }
  0xcf   : > { %v875_v5 = vadd.f32 %v874_v59, %v846_v4 }
  0xd0   : > { %v609_v6 = vpop.f32.mrf.mxu1  ;;  %v905_v7 = vpop.f32.mrf.mxu0 }
  0xd1   : > { %v904_v8 = vadd.f32 %v903_v0, %v875_v5  ;;  %v610_v10 = vadd.f32 %v609_v6, %v580_v52  ;;  %v852_v25 = vpop.f32.mrf.mxu3  ;;  %v881_v29 = vpop.f32.mrf.mxu2 }
  0xd3   : > { %v639_v12 = vadd.f32 %v638_v47, %v610_v10  ;;  %v927_v14 = vmul.f32 %v1671_v9, %v904_v8 }
  0xd5   : > { %v848_v16 = vadd.f32 %v847_v62, %v639_v12  ;;  %v939_v20 = vadd.f32 %v1677_v15, %v927_v14 }
  0xd7   : > { %v877_v17 = vadd.f32 %v876_v2, %v848_v16  ;;  %v955_v26 = vmul.f32 0.1, %v939_v20  ;;  %vm947_vm1 = vcmp.ge.f32.partialorder %v939_v20, 0.0 }
  0xd8   : > { %v612_v18 = vpop.f32.mrf.mxu1  ;;  %v908_v19 = vpop.f32.mrf.mxu0 }
  0xd9   : > { %v906_v21 = vadd.f32 %v905_v7, %v877_v17  ;;  %v613_v22 = vadd.f32 %v612_v18, %v583_v56  ;;  %v963_v34 = vsel %vm947_vm1, %v939_v20, %v955_v26  ;;  %v855_v42 = vpop.f32.mrf.mxu3  ;;  %v884_v45 = vpop.f32.mrf.mxu2 }
  0xdb   : > { %v928_v23 = vmul.f32 %v1671_v9, %v906_v21  ;;  %v642_v24 = vadd.f32 %v641_v51, %v613_v22 }
  0xdd   : > { %v940_v27 = vadd.f32 %v1677_v15, %v928_v23  ;;  %v851_v28 = vadd.f32 %v850_v11, %v642_v24 }
  0xdf   : > { %vm948_vm2 = vcmp.ge.f32.partialorder %v940_v27, 0.0  ;;  %v956_v30 = vmul.f32 0.1, %v940_v27  ;;  %v880_v31 = vadd.f32 %v879_v13, %v851_v28 }
  0xe0   : > { %v614_v32 = vpop.f32.mrf.mxu1  ;;  %v910_v33 = vpop.f32.mrf.mxu0 }
  0xe1   : > { %v964_v35 = vsel %vm948_vm2, %v940_v27, %v956_v30  ;;  %v909_v36 = vadd.f32 %v908_v19, %v880_v31  ;;  %v615_v37 = vadd.f32 %v614_v32, %v585_v60  ;;  %v857_v1 = vpop.f32.mrf.mxu3  ;;  %v886_v7 = vpop.f32.mrf.mxu2 }
  0xe2   : > { %v1379_v38 = vpack.c.bf16 %v964_v35, %v963_v34 }
  0xe3   : > { %v644_v39 = vadd.f32 %v643_v55, %v615_v37  ;;  %v929_v40 = vmul.f32 %v1671_v9, %v909_v36 }
  0xe4   : > { %1380 = vst [vmem:[%s1686_s26] sm:$0xff] %v1379_v38  }
  0xe5   : > { %v853_v41 = vadd.f32 %v852_v25, %v644_v39  ;;  %v941_v48 = vadd.f32 %v1677_v15, %v929_v40 }
  0xe7   : > { %v882_v43 = vadd.f32 %v881_v29, %v853_v41  ;;  %v957_v60 = vmul.f32 0.1, %v941_v48  ;;  %vm949_vm3 = vcmp.ge.f32.partialorder %v941_v48, 0.0 }
  0xe8   : > { %v617_v47 = vpop.f32.mrf.mxu1  ;;  %v913_v56 = vpop.f32.mrf.mxu0 }
  0xe9   : > { %v911_v51 = vadd.f32 %v910_v33, %v882_v43  ;;  %v618_v52 = vadd.f32 %v617_v47, %v1656_v49  ;;  %v965_v3 = vsel %vm949_vm3, %v941_v48, %v957_v60  ;;  %v860_v18 = vpop.f32.mrf.mxu3  ;;  %v889_v20 = vpop.f32.mrf.mxu2 }
  0xeb   : > { %v930_v58 = vmul.f32 %v1671_v9, %v911_v51  ;;  %v647_v59 = vadd.f32 %v1652_v44, %v618_v52 }
  0xed   : > { %v942_v55 = vadd.f32 %v1677_v15, %v930_v58  ;;  %v856_v62 = vadd.f32 %v855_v42, %v647_v59 }
  0xef   : > { %vm950_vm4 = vcmp.ge.f32.partialorder %v942_v55, 0.0  ;;  %v958_v63 = vmul.f32 0.1, %v942_v55  ;;  %v885_v0 = vadd.f32 %v884_v45, %v856_v62 }
  0xf0   : > { %v619_v2 = vpop.f32.mrf.mxu1  ;;  %v915_v8 = vpop.f32.mrf.mxu0 }
  0xf1   : > { %v966_v4 = vsel %vm950_vm4, %v942_v55, %v958_v63  ;;  %v914_v5 = vadd.f32 %v913_v56, %v885_v0  ;;  %v620_v49 = vadd.f32 %v619_v2, %v1660_v53  ;;  %v862_v31 = vpop.f32.mrf.mxu3  ;;  %v891_v34 = vpop.f32.mrf.mxu2 }
  0xf2   : > { %v1384_v6 = vpack.c.bf16 %v966_v4, %v965_v3 }
  0xf3   : > { %v649_v44 = vadd.f32 %v1654_v46, %v620_v49  ;;  %v931_v10 = vmul.f32 %v1671_v9, %v914_v5 }
  0xf4   : > { %1396 = vst [vmem:[%s1686_s26 + $0x8] sm:$0xff] %v1384_v6  }
  0xf5   : > { %v858_v11 = vadd.f32 %v857_v1, %v649_v44  ;;  %v943_v14 = vadd.f32 %v1677_v15, %v931_v10 }
  0xf7   : > { %v887_v12 = vadd.f32 %v886_v7, %v858_v11  ;;  %v959_v46 = vmul.f32 0.1, %v943_v14  ;;  %vm951_vm5 = vcmp.ge.f32.partialorder %v943_v14, 0.0 }
  0xf8   : > { %v622_v13 = vpop.f32.mrf.mxu1  ;;  %v918_v23 = vpop.f32.mrf.mxu0 }
  0xf9   : > { %v916_v16 = vadd.f32 %v915_v8, %v887_v12  ;;  %v623_v17 = vadd.f32 %v622_v13, %v1664_v57  ;;  %v967_v27 = vsel %vm951_vm5, %v943_v14, %v959_v46 }
  0xfb   : > { %v932_v19 = vmul.f32 %v1671_v9, %v916_v16  ;;  %v652_v53 = vadd.f32 %v1658_v50, %v623_v17 }
  0xfd   : > { %v944_v21 = vadd.f32 %v1677_v15, %v932_v19  ;;  %v861_v22 = vadd.f32 %v860_v18, %v652_v53 }
  0xff   : > { %vm952_vm6 = vcmp.ge.f32.partialorder %v944_v21, 0.0  ;;  %v960_v24 = vmul.f32 0.1, %v944_v21  ;;  %v890_v25 = vadd.f32 %v889_v20, %v861_v22 }
 0x100   : > { %v624_v26 = vpop.f32.mrf.mxu1  ;;  %v920_v36 = vpop.f32.mrf.mxu0 }
 0x101   : > { %v968_v28 = vsel %vm952_vm6, %v944_v21, %v960_v24  ;;  %v919_v57 = vadd.f32 %v918_v23, %v890_v25  ;;  %v625_v29 = vadd.f32 %v624_v26, %v1666_v61 }
 0x102   : > { %v1389_v30 = vpack.c.bf16 %v968_v28, %v967_v27 }
 0x103   : > { %v654_v50 = vadd.f32 %v1662_v54, %v625_v29  ;;  %v933_v32 = vmul.f32 %v1671_v9, %v919_v57 }
 0x104   : > { %1397 = vst [vmem:[%s1686_s26 + $0x10] sm:$0xff] %v1389_v30  }
 0x105   : > { %v863_v33 = vadd.f32 %v862_v31, %v654_v50  ;;  %v945_v37 = vadd.f32 %v1677_v15, %v933_v32 }
 0x107   : > { %v892_v35 = vadd.f32 %v891_v34, %v863_v33  ;;  %v961_v40 = vmul.f32 0.1, %v945_v37  ;;  %vm953_vm7 = vcmp.ge.f32.partialorder %v945_v37, 0.0 }
 0x109   : > { %v921_v38 = vadd.f32 %v920_v36, %v892_v35  ;;  %v969_v41 = vsel %vm953_vm7, %v945_v37, %v961_v40 }
 0x10b   : > { %v934_v39 = vmul.f32 %v1671_v9, %v921_v38 }
 0x10d   : > { %v946_v61 = vadd.f32 %v1677_v15, %v934_v39 }
 0x10f   : > { %vm954_vm8 = vcmp.ge.f32.partialorder %v946_v61, 0.0  ;;  %v962_v54 = vmul.f32 0.1, %v946_v61 }
 0x111   : > { %v970_v42 = vsel %vm954_vm8, %v946_v61, %v962_v54 }
 0x112   : > { %v1394_v43 = vpack.c.bf16 %v970_v42, %v969_v41 }
 0x114   : > { %1398 = vst [vmem:[%s1686_s26 + $0x18] sm:$0xff] %v1394_v43  }
 0x115 PF: > { %s16_s21 = sadd.s32 1, %s1426_s21  }
 0x116   : > { %p13_p4 = scmp.ge.s32.totalorder %s16_s21, 4  }
 0x118   :  { %15 = sbr.rel (!%p13_p4) target bundleno = 1 (0x1), region = 77 }

// kernel: unet_forward.17
= control target key start
LH: loop header
LB: loop body
LE: loop exit
PB: predicated region body
PF: predicated region fallthrough
CT: control target
= control target key end

     0   :  { %11 = vsyncpa [#allocation3], 0  ;;  %s3674_s0 = inlined_call_operand.vmem [shape: bf16[512,288], index: 0, kind: input, shape index: {}]   ;;  %s3675_s1 = inlined_call_operand.vmem [shape: bf16[512,288], index: 1, kind: input, shape index: {}]   ;;  %s3676_s2 = inlined_call_operand.vmem [shape: bf16[288,32], index: 2, kind: input, shape index: {}]   ;;  %s3677_s3 = inlined_call_operand.vmem [shape: bf16[288,32], index: 3, kind: input, shape index: {}]   ;;  %s3678_s4 = inlined_call_operand.vmem [shape: f32[1,32], index: 4, kind: input, shape index: {}]   ;;  %s3679_s5 = inlined_call_operand.vmem [shape: f32[1,32], index: 5, kind: input, shape index: {}]   ;;  %s3680_s6 = inlined_call_operand.hbm [shape: f32[512,32], index: 6, kind: output, shape index: {}]  }
   0x1   :  { %13 = vsyncpa [#allocation3 + $0x1], 0  ;;  %s2865_s21 = smov 0   ;;  %s2867_s22 = smov 0  }
   0x2   :  { %s2869_s23 = smov 0   ;;  %s2871_s24 = smov 0  }
   0x3 LB: > { %s2886_s25 = sadd.s32 4294967295, %s2826_s24   ;;  %s2003_s26 = sadd.s32 4294967294, %s2826_s24   ;;  %s2826_s24 = sphi %s2871_s24, %s3734_s24   ;;  %s2822_s23 = sphi %s2869_s23, %s3733_s23   ;;  %s2818_s22 = sphi %s2867_s22, %s3732_s22   ;;  %s2814_s21 = sphi %s2865_s21, %s3731_s21  }
   0x4   : > { %s2890_s27 = sadd.s32 1, %s2826_s24   ;;  %s162_s28 = sadd.s32 1, %s2822_s23 }
   0x5   : > { %s159_s29 = ssub.s32 %s2826_s24, %s2890_s27  ;;  %p172_p0 = scmp.ne.s32.totalorder %s2822_s23, %s2818_s22 }
   0x6   : > { %p160_p1 = scmp.eq.s32.totalorder %s159_s29, 0  ;;  %p173_p2 = scmp.eq.s32.totalorder %s2886_s25, 1 }
   0x7   : > { %p178_p3 = scmp.ne.s32.totalorder %s2818_s22, %s2814_s21  ;;  %p179_p4 = scmp.eq.s32.totalorder %s2003_s26, 1 }
   0x8   : > { %s2901_s30 = scalar_select %p160_p1, %s2822_s23, %s162_s28  }
   0x9   : > { %p2903_p5 = por %p173_p2, %p172_p0  ;;  %p2907_p6 = por %p179_p4, %p178_p3 }
   0xa   : > { %p2006_p7 = scmp.ge.s32.totalorder %s2826_s24, 1  ;;  %p229_p8 = scmp.lt.s32.totalorder %s2826_s24, 3 }
   0xc   : > { %p230_p9 = pnand %p2006_p7, %p229_p8 }
   0xe   : > { %233 = sbr.rel (%p230_p9) target bundleno = 571 (0x23b), region = 44 }
  0x13   : > { %v2698_v0 = vld [vmem:[%s3677_s3 + $0x38] sm:$0xff]  ;;  %v2708_v1 = vld [vmem:[%s3677_s3 + $0x88] sm:$0xff]  ;;  %s2008_s13 = sshll.u32 %s2886_s25, 5  ;;  %v2697_v2 = vld [vmem:[%s3677_s3 + $0x30] sm:$0xff]  ;;  %vm830_vm0 = vcmask 261120  }
  0x14   : > { %p267_p10 = scmp.lt.s32.totalorder %s2008_s13, 63  ;;  %879 = vmatpush.bf16.msra.mxu0 %v2698_v0  ;;  %2710 = vmatpush.bf16.msra.mxu1 %v2698_v0  ;;  %v2707_v3 = vld [vmem:[%s3677_s3 + $0x80] sm:$0xff]  ;;  %v2640_v4 = vld [vmem:[%s3676_s2 + $0x78] sm:$0xff]  ;;  %v2696_v5 = vld [vmem:[%s3677_s3 + $0x28] sm:$0xff] }
  0x15   : > { %1063 = vmatpush.bf16.msra.mxu2 %v2708_v1  ;;  %2718 = vmatpush.bf16.msra.mxu3 %v2708_v1  ;;  %v2639_v8 = vld [vmem:[%s3676_s2 + $0x70] sm:$0xff]  ;;  %v2695_v10 = vld [vmem:[%s3677_s3 + $0x20] sm:$0xff]  ;;  %v2632_v14 = vld [vmem:[%s3676_s2 + $0x38] sm:$0xff] }
  0x16   : > { %s3736_s13 = smov (!%p267_p10, %s2008_s13), 63  ;;  %v2694_v15 = vld [vmem:[%s3677_s3 + $0x18] sm:$0xff]  ;;  %v2638_v16 = vld [vmem:[%s3676_s2 + $0x68] sm:$0xff]  ;;  %v2693_v17 = vld [vmem:[%s3677_s3 + $0x10] sm:$0xff] }
  0x17   : > { %s2720_s20 = smul.u32 12, %s3736_s13  ;;  %v2692_v20 = vld [vmem:[%s3677_s3 + $0x8] sm:$0xff]  ;;  %v2691_v22 = vld [vmem:[%s3677_s3] sm:$0xff]  ;;  %v2706_v29 = vld [vmem:[%s3677_s3 + $0x78] sm:$0xff]  ;;  %s263_s13 = sand.u32 1, %s2818_s22  }
  0x18   : > { %880 = vmatpush.bf16.msra.mxu0 %v2697_v2  ;;  %2711 = vmatpush.bf16.msra.mxu1 %v2697_v2  ;;  %v2642_v30 = vld [vmem:[%s3676_s2 + $0x88] sm:$0xff]  ;;  %v2631_v31 = vld [vmem:[%s3676_s2 + $0x30] sm:$0xff]  ;;  %v2637_v36 = vld [vmem:[%s3676_s2 + $0x60] sm:$0xff]  ;;  %s2007_s16 = sshll.u32 %s263_s13, 8 }
  0x19   : > { %1064 = vmatpush.bf16.msra.mxu2 %v2707_v3  ;;  %s2940_s10 = scalar_lea.vmem %s3675_s1, %s2720_s20  ;;  %2719 = vmatpush.bf16.msra.mxu3 %v2707_v3  ;;  %v2705_v35 = vld [vmem:[%s3677_s3 + $0x70] sm:$0xff]  ;;  %v2704_v37 = vld [vmem:[%s3677_s3 + $0x68] sm:$0xff]  ;;  %v2703_v51 = vld [vmem:[%s3677_s3 + $0x60] sm:$0xff]  ;;  %s3105_s14 = scalar_lea.vmem %s3674_s0, %s2720_s20 }
  0x1a   : > { %v2022_v6 = vld [vmem:[%s2940_s10 + $0x8] sm:$0xf]  ;;  %v2645_v7 = vld [vmem:[%s2940_s10 + $0x10] sm:$0xf0]  ;;  %v2130_v11 = vld [vmem:[%s2940_s10 + $0xe0] sm:$0xf] }
  0x1b   : > { %v2023_v9 = vor.u32 %v2645_v7, %v2022_v6  ;;  %v2672_v12 = vld [vmem:[%s2940_s10 + $0xe8] sm:$0xf0]  ;;  %v2034_v18 = vld [vmem:[%s2940_s10 + $0x20] sm:$0xf]  ;;  %v2142_v24 = vld [vmem:[%s2940_s10 + $0xf8] sm:$0xf] }
  0x1c   : > { %881 = vmatpush.bf16.msra.mxu0 %v2696_v5  ;;  %2712 = vmatpush.bf16.msra.mxu1 %v2696_v5  ;;  %v2131_v13 = vor.u32 %v2672_v12, %v2130_v11  ;;  %v2648_v19 = vld [vmem:[%s2940_s10 + $0x28] sm:$0xf0]  ;;  %v2014_v23 = vld [vmem:[%s2940_s10] sm:$0xf]  ;;  %v2675_v25 = vld [vmem:[%s2940_s10 + $0x100] sm:$0xf0] }
  0x1d   : > { %1631 = vmatpush.bf16.msrb.mxu2 %v2640_v4  ;;  %1542 = vmatpush.bf16.msrb.mxu3 %v2632_v14  ;;  %v2035_v21 = vor.u32 %v2648_v19, %v2034_v18  ;;  %v2644_v26 = vld [vmem:[%s2940_s10 + $0x8] sm:$0xf0]  ;;  %v2110_v27 = vld [vmem:[%s2940_s10 + $0xc0] sm:$0xf]  ;;  %v2143_v32 = vor.u32 %v2675_v25, %v2142_v24  ;;  %v2046_v38 = vld [vmem:[%s2940_s10 + $0x38] sm:$0xf] }
  0x1e   : > { %2276 = vmatmul.msk.bf16.vlgmr.msra.gmra.mxu2 %vm830_vm0, %v2023_v9  ;;  %2285 = vmatmul.msk.bf16.vlgmr.msra.gmra.mxu3 %vm830_vm0, %v2131_v13  ;;  %v2668_v28 = vld [vmem:[%s2940_s10 + $0xc8] sm:$0xf0]  ;;  %v2015_v33 = vor.u32 %v2644_v26, %v2014_v23  ;;  %v2651_v39 = vld [vmem:[%s2940_s10 + $0x40] sm:$0xf0]  ;;  %v2026_v41 = vld [vmem:[%s2940_s10 + $0x18] sm:$0xf] }
  0x1f   : > { %v2111_v34 = vor.u32 %v2668_v28, %v2110_v27  ;;  %v2047_v40 = vor.u32 %v2651_v39, %v2046_v38  ;;  %v2154_v42 = vld [vmem:[%s2940_s10 + $0x110] sm:$0xf]  ;;  %v2678_v43 = vld [vmem:[%s2940_s10 + $0x118] sm:$0xf0]  ;;  %v2647_v44 = vld [vmem:[%s2940_s10 + $0x20] sm:$0xf0] }
  0x20   : > { %882 = vmatpush.bf16.msra.mxu0 %v2695_v10  ;;  %2713 = vmatpush.bf16.msra.mxu1 %v2695_v10  ;;  %v2122_v45 = vld [vmem:[%s2940_s10 + $0xd8] sm:$0xf]  ;;  %v2671_v46 = vld [vmem:[%s2940_s10 + $0xe0] sm:$0xf0]  ;;  %v2630_v47 = vld [vmem:[%s3676_s2 + $0x28] sm:$0xff]  ;;  %v2155_v48 = vor.u32 %v2678_v43, %v2154_v42  ;;  %v2027_v49 = vor.u32 %v2647_v44, %v2026_v41  ;;  %s3367_s19 = scalar_lea.vmem [#allocation2], %s2007_s16 }
  0x21   : > { %1632 = vmatpush.bf16.msrb.mxu2 %v2639_v8  ;;  %1543 = vmatpush.bf16.msrb.mxu3 %v2631_v31  ;;  %v2123_v50 = vor.u32 %v2671_v46, %v2122_v45  ;;  %v2629_v52 = vld [vmem:[%s3676_s2 + $0x20] sm:$0xff]  ;;  %v2636_v53 = vld [vmem:[%s3676_s2 + $0x58] sm:$0xff]  ;;  %v2058_v54 = vld [vmem:[%s2940_s10 + $0x50] sm:$0xf]  ;;  %s1926_s9 = sshll.u32 %s3367_s19, 4  ;;  %s2784_s16 = scalar_lea.hbm %s3680_s6, 512  ;;  %s1927_s9 = int_to_ptr.vmem [resolvable:$true] %s1926_s9 }
  0x22   : > { %v2654_v55 = vld [vmem:[%s2940_s10 + $0x58] sm:$0xf0]  ;;  %v2038_v57 = vld [vmem:[%s2940_s10 + $0x30] sm:$0xf]  ;;  %v2166_v58 = vld [vmem:[%s2940_s10 + $0x128] sm:$0xf] }
  0x23   : > { %v2059_v56 = vor.u32 %v2654_v55, %v2058_v54  ;;  %v2681_v59 = vld [vmem:[%s2940_s10 + $0x130] sm:$0xf0]  ;;  %v2650_v60 = vld [vmem:[%s2940_s10 + $0x38] sm:$0xf0]  ;;  %v2134_v61 = vld [vmem:[%s2940_s10 + $0xf0] sm:$0xf] }
  0x24   : > { %883 = vmatpush.bf16.msra.mxu0 %v2694_v15  ;;  %2714 = vmatpush.bf16.msra.mxu1 %v2694_v15  ;;  %v2674_v62 = vld [vmem:[%s2940_s10 + $0xf8] sm:$0xf0]  ;;  %v2167_v63 = vor.u32 %v2681_v59, %v2166_v58  ;;  %v2039_v0 = vor.u32 %v2650_v60, %v2038_v57  ;;  %v2641_v4 = vld [vmem:[%s3676_s2 + $0x80] sm:$0xff]  ;;  %v2070_v5 = vld [vmem:[%s2940_s10 + $0x68] sm:$0xf] }
  0x25   : > { %1633 = vmatpush.bf16.msrb.mxu2 %v2638_v16  ;;  %1544 = vmatpush.bf16.msrb.mxu3 %v2630_v47  ;;  %v2135_v1 = vor.u32 %v2674_v62, %v2134_v61  ;;  %v2702_v2 = vld [vmem:[%s3677_s3 + $0x58] sm:$0xff]  ;;  %v2657_v6 = vld [vmem:[%s2940_s10 + $0x70] sm:$0xf0]  ;;  %v2050_v8 = vld [vmem:[%s2940_s10 + $0x48] sm:$0xf] }
  0x26   : > { %v2628_v3 = vld [vmem:[%s3676_s2 + $0x18] sm:$0xff]  ;;  %v2071_v7 = vor.u32 %v2657_v6, %v2070_v5  ;;  %v2178_v9 = vld [vmem:[%s2940_s10 + $0x140] sm:$0xf]  ;;  %v2684_v10 = vld [vmem:[%s2940_s10 + $0x148] sm:$0xf0] }
  0x27   : > { %v2653_v11 = vld [vmem:[%s2940_s10 + $0x50] sm:$0xf0]  ;;  %v2146_v12 = vld [vmem:[%s2940_s10 + $0x108] sm:$0xf]  ;;  %v2179_v15 = vor.u32 %v2684_v10, %v2178_v9  ;;  %v2062_v23 = vld [vmem:[%s2940_s10 + $0x60] sm:$0xf] }
  0x28   : > { %884 = vmatpush.bf16.msra.mxu0 %v2693_v17  ;;  %2715 = vmatpush.bf16.msra.mxu1 %v2693_v17  ;;  %v2677_v13 = vld [vmem:[%s2940_s10 + $0x110] sm:$0xf0]  ;;  %v2051_v16 = vor.u32 %v2653_v11, %v2050_v8  ;;  %v2190_v24 = vld [vmem:[%s2940_s10 + $0x158] sm:$0xf]  ;;  %v2687_v25 = vld [vmem:[%s2940_s10 + $0x160] sm:$0xf0] }
  0x29   : > { %1634 = vmatpush.bf16.msrb.mxu2 %v2637_v36  ;;  %1545 = vmatpush.bf16.msrb.mxu3 %v2629_v52  ;;  %v2635_v14 = vld [vmem:[%s3676_s2 + $0x50] sm:$0xff]  ;;  %v2147_v17 = vor.u32 %v2677_v13, %v2146_v12  ;;  %v2656_v26 = vld [vmem:[%s2940_s10 + $0x68] sm:$0xf0]  ;;  %v2158_v27 = vld [vmem:[%s2940_s10 + $0x120] sm:$0xf] }
  0x2a   : > { %v2701_v18 = vld [vmem:[%s3677_s3 + $0x50] sm:$0xff]  ;;  %v2680_v28 = vld [vmem:[%s2940_s10 + $0x128] sm:$0xf0]  ;;  %v2063_v31 = vor.u32 %v2656_v26, %v2062_v23  ;;  %v2663_v36 = vld [vmem:[%s2940_s10 + $0xa0] sm:$0xf0] }
  0x2b   : > { %v2627_v19 = vld [vmem:[%s3676_s2 + $0x10] sm:$0xff]  ;;  %v2074_v38 = vld [vmem:[%s2940_s10 + $0x78] sm:$0xf]  ;;  %v2659_v41 = vld [vmem:[%s2940_s10 + $0x80] sm:$0xf0] }
  0x2c   : > { %885 = vmatpush.bf16.msra.mxu0 %v2692_v20  ;;  %2716 = vmatpush.bf16.msra.mxu1 %v2692_v20  ;;  %v2082_v20 = vld [vmem:[%s2940_s10 + $0x80] sm:$0xf]  ;;  %v2202_v39 = vld [vmem:[%s2940_s10 + $0x170] sm:$0xf]  ;;  %v2170_v42 = vld [vmem:[%s2940_s10 + $0x138] sm:$0xf]  ;;  %v2075_v45 = vor.u32 %v2659_v41, %v2074_v38 }
  0x2d   : > { %1635 = vmatpush.bf16.msrb.mxu2 %v2636_v53  ;;  %1546 = vmatpush.bf16.msrb.mxu3 %v2628_v3  ;;  %v2683_v43 = vld [vmem:[%s2940_s10 + $0x140] sm:$0xf0]  ;;  %v2086_v53 = vld [vmem:[%s2940_s10 + $0x90] sm:$0xf]  ;;  %v2294_v54 = vld [vmem:[%s3105_s14] sm:$0xf] }
  0x2e   : > { %2277 = vmatmul.msk.bf16.gmra.mxu2 %vm830_vm0, %v2035_v21  ;;  %2286 = vmatmul.msk.bf16.gmra.mxu3 %vm830_vm0, %v2143_v32  ;;  %v2660_v21 = vld [vmem:[%s2940_s10 + $0x88] sm:$0xf0]  ;;  %v2159_v32 = vor.u32 %v2680_v28, %v2158_v27  ;;  %v2171_v46 = vor.u32 %v2683_v43, %v2170_v42  ;;  %v2633_v47 = vld [vmem:[%s3676_s2 + $0x40] sm:$0xff]  ;;  %v2182_v57 = vld [vmem:[%s2940_s10 + $0x150] sm:$0xf] }
  0x2f   : > { %v2578_v55 = vld [vmem:[%s3105_s14 + $0x8] sm:$0xf0]  ;;  %v2686_v58 = vld [vmem:[%s2940_s10 + $0x158] sm:$0xf0]  ;;  %v2118_v62 = vld [vmem:[%s2940_s10 + $0xc8] sm:$0xf] }
  0x30   : > { %886 = vmatpush.bf16.msra.mxu0 %v2691_v22  ;;  %2717 = vmatpush.bf16.msra.mxu1 %v2691_v22  ;;  %v2083_v22 = vor.u32 %v2660_v21, %v2082_v20  ;;  %v2295_v59 = vor.u32 %v2578_v55, %v2294_v54  ;;  %v2183_v61 = vor.u32 %v2686_v58, %v2182_v57  ;;  %v2581_v3 = vld [vmem:[%s3105_s14 + $0x20] sm:$0xf0]  ;;  %v2194_v5 = vld [vmem:[%s2940_s10 + $0x168] sm:$0xf]  ;;  %v2689_v6 = vld [vmem:[%s2940_s10 + $0x170] sm:$0xf0] }
  0x31   : > { %1636 = vmatpush.bf16.msrb.mxu2 %v2635_v14  ;;  %1547 = vmatpush.bf16.msrb.mxu3 %v2627_v19  ;;  %v2195_v9 = vor.u32 %v2689_v6, %v2194_v5  ;;  %v2577_v12 = vld [vmem:[%s3105_s14 + $0x4] sm:$0xf]  ;;  %v2296_v13 = vld [vmem:[%s3105_s14 + $0xc] sm:$0xf0]  ;;  %v2302_v20 = vld [vmem:[%s3105_s14 + $0x8] sm:$0xf] }
  0x32   : > { %v2016_v19 = vld [vmem:[%s2940_s10 + $0xc] sm:$0xf0]  ;;  %v2579_v21 = vld [vmem:[%s3105_s14 + $0x10] sm:$0xf0]  ;;  %v2582_v41 = vld [vmem:[%s3105_s14 + $0x28] sm:$0xf0] }
  0x33   : > { %887 = vmatmul.bf16.vlgmr.msra.gmra.mxu0 %v2015_v33  ;;  %927 = vmatmul.bf16.vlgmr.msra.gmra.mxu1 %v2111_v34  ;;  %v2700_v33 = vld [vmem:[%s3677_s3 + $0x48] sm:$0xff]  ;;  %v2587_v38 = vld [vmem:[%s3105_s14 + $0x50] sm:$0xf0]  ;;  %v2342_v57 = vld [vmem:[%s3105_s14 + $0x60] sm:$0xf] }
  0x34   : > { %968 = vmatpush.bf16.msrb.mxu1 %v2706_v29  ;;  %1726 = vmatpush.bf16.msrb.mxu0 %v2642_v30  ;;  %v2634_v29 = vld [vmem:[%s3676_s2 + $0x48] sm:$0xff]  ;;  %v2191_v30 = vor.u32 %v2687_v25, %v2190_v24  ;;  %v2303_v25 = vor.u32 %v2579_v21, %v2302_v20  ;;  %v2588_v20 = vld [vmem:[%s3105_s14 + $0x58] sm:$0xf0] }
  0x35   : > { %1637 = vmatpush.bf16.msrb.mxu2 %v2634_v29  ;;  %v2626_v34 = vld [vmem:[%s3676_s2 + $0x8] sm:$0xff] }
  0x36   : > { %1548 = vmatpush.bf16.msrb.mxu3 %v2626_v34  ;;  %v2590_v58 = vld [vmem:[%s3105_s14 + $0x68] sm:$0xf0] }
  0x37   : > { %v2586_v6 = vld [vmem:[%s3105_s14 + $0x4c] sm:$0xf] }
  0x38   : > { %969 = vmatpush.bf16.msrb.mxu1 %v2705_v35  ;;  %1727 = vmatpush.bf16.msrb.mxu0 %v2641_v4  ;;  %v2094_v35 = vld [vmem:[%s2940_s10 + $0x98] sm:$0xf]  ;;  %v2665_v4 = vld [vmem:[%s2940_s10 + $0xb0] sm:$0xf0] }
  0x39   : > { %1638 = vmatpush.bf16.msrb.mxu2 %v2633_v47 }
  0x3c   : > { %970 = vmatpush.bf16.msrb.mxu1 %v2704_v37  ;;  %v2095_v37 = vor.u32 %v2663_v36, %v2094_v35  ;;  %v2646_v36 = vld [vmem:[%s2940_s10 + $0x1c] sm:$0xf] }
  0x3e   : > { %2278 = vmatmul.msk.bf16.gmra.mxu2 %vm830_vm0, %v2047_v40  ;;  %2287 = vmatmul.msk.bf16.gmra.mxu3 %vm830_vm0, %v2155_v48  ;;  %v2690_v40 = vld [vmem:[%s2940_s10 + $0x178] sm:$0xf0]  ;;  %v2699_v48 = vld [vmem:[%s3677_s3 + $0x40] sm:$0xff] }
  0x3f   : > { %v2203_v44 = vor.u32 %v2690_v40, %v2202_v39  ;;  %v2028_v39 = vld [vmem:[%s2940_s10 + $0x24] sm:$0xf0]  ;;  %v2314_v40 = vld [vmem:[%s3105_s14 + $0x20] sm:$0xf] }
  0x40   : > { %971 = vmatpush.bf16.msrb.mxu1 %v2703_v51  ;;  %v2666_v51 = vld [vmem:[%s2940_s10 + $0xb8] sm:$0xf0] }
  0x43   : > { %892 = vmatmul.bf16.gmra.mxu0 %v2027_v49  ;;  %932 = vmatmul.bf16.gmra.mxu1 %v2123_v50  ;;  %v2625_v49 = vld [vmem:[%s3676_s2] sm:$0xff]  ;;  %v2106_v50 = vld [vmem:[%s2940_s10 + $0xb0] sm:$0xf] }
  0x44   : > { %972 = vmatpush.bf16.msrb.mxu1 %v2702_v2  ;;  %1549 = vmatpush.bf16.msrb.mxu3 %v2625_v49  ;;  %v2107_v52 = vor.u32 %v2666_v51, %v2106_v50  ;;  %v2306_v2 = vld [vmem:[%s3105_s14 + $0x18] sm:$0xf]  ;;  %v2583_v50 = vld [vmem:[%s3105_s14 + $0x34] sm:$0xf]  ;;  %v2320_v51 = vld [vmem:[%s3105_s14 + $0x3c] sm:$0xf0] }
  0x45   : > { %v2323_v55 = vor.u32 %v2583_v50, %v2320_v51  ;;  %v2596_v50 = vld [vmem:[%s3105_s14 + $0x98] sm:$0xf0]  ;;  %v2064_v51 = vld [vmem:[%s2940_s10 + $0x6c] sm:$0xf0] }
  0x48   : > { %973 = vmatpush.bf16.msrb.mxu1 %v2701_v18  ;;  %v2584_v18 = vld [vmem:[%s3105_s14 + $0x38] sm:$0xf0] }
  0x4c   : > { %974 = vmatpush.bf16.msrb.mxu1 %v2700_v33 }
  0x4e   : > { %2279 = vmatmul.msk.bf16.gmra.mxu2 %vm830_vm0, %v2059_v56  ;;  %2288 = vmatmul.msk.bf16.gmra.mxu3 %vm830_vm0, %v2167_v63  ;;  %v2662_v56 = vld [vmem:[%s2940_s10 + $0x98] sm:$0xf0]  ;;  %v2669_v63 = vld [vmem:[%s2940_s10 + $0xd0] sm:$0xf0] }
  0x4f   : > { %v2087_v60 = vor.u32 %v2662_v56, %v2086_v53  ;;  %v2649_v56 = vld [vmem:[%s2940_s10 + $0x34] sm:$0xf] }
  0x50   : > { %975 = vmatpush.bf16.msrb.mxu1 %v2699_v48 }
  0x53   : > { %897 = vmatmul.bf16.gmra.mxu0 %v2039_v0  ;;  %937 = vmatmul.bf16.gmra.mxu1 %v2135_v1  ;;  %v2119_v0 = vor.u32 %v2669_v63, %v2118_v62  ;;  %v2098_v1 = vld [vmem:[%s2940_s10 + $0xa8] sm:$0xf]  ;;  %v2343_v63 = vor.u32 %v2590_v58, %v2342_v57 }
  0x54   : > { %v2099_v8 = vor.u32 %v2665_v4, %v2098_v1 }
  0x5e   : > { %2280 = vmatmul.msk.bf16.gmra.mxu2 %vm830_vm0, %v2071_v7  ;;  %2289 = vmatmul.msk.bf16.gmra.mxu3 %vm830_vm0, %v2179_v15  ;;  %v2307_v7 = vor.u32 %v2581_v3, %v2306_v2  ;;  %v2299_v15 = vor.u32 %v2577_v12, %v2296_v13 }
  0x63   : > { %902 = vmatmul.bf16.gmra.mxu0 %v2051_v16  ;;  %942 = vmatmul.bf16.gmra.mxu1 %v2147_v17  ;;  %v2643_v16 = vld [vmem:[%s2940_s10 + $0x4] sm:$0xf]  ;;  %v2318_v17 = vld [vmem:[%s3105_s14 + $0x30] sm:$0xf] }
  0x64   : > { %v2319_v23 = vor.u32 %v2584_v18, %v2318_v17  ;;  %v2019_v24 = vor.u32 %v2643_v16, %v2016_v19  ;;  %v2354_v16 = vld [vmem:[%s3105_s14 + $0x78] sm:$0xf]  ;;  %v2593_v17 = vld [vmem:[%s3105_s14 + $0x80] sm:$0xf0]  ;;  %v2338_v19 = vld [vmem:[%s3105_s14 + $0x50] sm:$0xf] }
  0x65   : > { %v2052_v18 = vld [vmem:[%s2940_s10 + $0x54] sm:$0xf0] }
  0x6e   : > { %2281 = vmatmul.msk.bf16.gmra.mxu2 %vm830_vm0, %v2083_v22  ;;  %2290 = vmatmul.msk.bf16.gmra.mxu3 %vm830_vm0, %v2191_v30  ;;  %v2580_v30 = vld [vmem:[%s3105_s14 + $0x1c] sm:$0xf] }
  0x73   : > { %907 = vmatmul.bf16.gmra.mxu0 %v2063_v31  ;;  %947 = vmatmul.bf16.gmra.mxu1 %v2159_v32  ;;  %v2308_v31 = vld [vmem:[%s3105_s14 + $0x24] sm:$0xf0] }
  0x74   : > { %v2311_v35 = vor.u32 %v2580_v30, %v2308_v31 }
  0x7e   : > { %2282 = vmatmul.msk.bf16.gmra.mxu2 %vm830_vm0, %v2095_v37  ;;  %2291 = vmatmul.msk.bf16.gmra.mxu3 %vm830_vm0, %v2203_v44  ;;  %v2330_v37 = vld [vmem:[%s3105_s14 + $0x48] sm:$0xf]  ;;  %v2031_v44 = vor.u32 %v2646_v36, %v2028_v39 }
  0x7f   : > { %v2331_v43 = vor.u32 %v2587_v38, %v2330_v37  ;;  %v2589_v37 = vld [vmem:[%s3105_s14 + $0x64] sm:$0xf]  ;;  %v2344_v38 = vld [vmem:[%s3105_s14 + $0x6c] sm:$0xf0] }
  0x83   : > { %912 = vmatmul.bf16.gmra.mxu0 %v2075_v45  ;;  %952 = vmatmul.bf16.gmra.mxu1 %v2171_v46  ;;  %v2315_v45 = vor.u32 %v2582_v41, %v2314_v40 }
  0x8e   : > { %2283 = vmatmul.msk.bf16.gmra.mxu2 %vm830_vm0, %v2107_v52  ;;  %1550 = vmatmul.bf16.vlgmr.msrb.gmra.mxu3 %v2295_v59  ;;  %v2040_v59 = vld [vmem:[%s2940_s10 + $0x3c] sm:$0xf0] }
  0x93   : > { %917 = vmatmul.bf16.gmra.mxu0 %v2087_v60  ;;  %957 = vmatmul.bf16.gmra.mxu1 %v2183_v61  ;;  %v2326_v60 = vld [vmem:[%s3105_s14 + $0x38] sm:$0xf]  ;;  %v2585_v61 = vld [vmem:[%s3105_s14 + $0x40] sm:$0xf0] }
  0x94   : > { %v2327_v1 = vor.u32 %v2585_v61, %v2326_v60 }
  0x9e   : > { %2284 = vmatmul.msk.bf16.gmra.mxu2 %vm830_vm0, %v2119_v0  ;;  %1555 = vmatmul.bf16.gmra.mxu3 %v2307_v7  ;;  %v2043_v0 = vor.u32 %v2649_v56, %v2040_v59  ;;  %v2332_v7 = vld [vmem:[%s3105_s14 + $0x54] sm:$0xf0]  ;;  %v2591_v56 = vld [vmem:[%s3105_s14 + $0x70] sm:$0xf0] }
  0x9f   : > { %v2335_v13 = vor.u32 %v2586_v6, %v2332_v7  ;;  %v2592_v6 = vld [vmem:[%s3105_s14 + $0x7c] sm:$0xf]  ;;  %v2356_v7 = vld [vmem:[%s3105_s14 + $0x84] sm:$0xf0] }
  0xa1   : > { %v3123_v10 = vpop.f32.mrf.mxu2  ;;  %v3125_v11 = vpop.f32.mrf.mxu3 }
  0xa3   : > { %922 = vmatmul.bf16.gmra.mxu0 %v2099_v8  ;;  %962 = vmatmul.bf16.gmra.mxu1 %v2195_v9 }
  0xa9   : > { %v3129_v14 = vpop.f32.mrf.mxu2  ;;  %v3137_v22 = vpop.f32.mrf.mxu3 }
  0xae   : > { %1639 = vmatmul.bf16.vlgmr.msrb.gmra.mxu2 %v2299_v15  ;;  %1560 = vmatmul.bf16.gmra.mxu3 %v2319_v23  ;;  %v2652_v15 = vld [vmem:[%s2940_s10 + $0x4c] sm:$0xf]  ;;  %v2355_v23 = vor.u32 %v2593_v17, %v2354_v16  ;;  %v2359_v17 = vor.u32 %v2592_v6, %v2356_v7 }
  0xb0   : > { %v3141_v27 = vpop.f32.mrf.mxu0  ;;  %v3143_v28 = vpop.f32.mrf.mxu1 }
  0xb1   : > { %v3139_v26 = vpop.f32.mrf.mxu2  ;;  %v3146_v29 = vpop.f32.mrf.mxu3 }
  0xb2   : > { %3683 = vst [vmem:[#allocation5_spill] sm:$0xff] %v3146_v29 }
  0xb3   : > { %976 = vmatmul.bf16.vlgmr.msrb.gmra.mxu1 %v2019_v24  ;;  %2556 = vmatmul.msk.bf16.vlgmr.msrb.gmra.mxu0 %vm830_vm0, %v2303_v25  ;;  %v2055_v24 = vor.u32 %v2652_v15, %v2052_v18  ;;  %v2339_v25 = vor.u32 %v2588_v20, %v2338_v19  ;;  %v2658_v18 = vld [vmem:[%s2940_s10 + $0x7c] sm:$0xf]  ;;  %v2378_v19 = vld [vmem:[%s3105_s14 + $0xa8] sm:$0xf]  ;;  %v2599_v20 = vld [vmem:[%s3105_s14 + $0xb0] sm:$0xf0] }
  0xb8   : > { %v3152_v33 = vpop.f32.mrf.mxu0  ;;  %v3154_v34 = vpop.f32.mrf.mxu1 }
  0xb9   : > { %v3150_v32 = vpop.f32.mrf.mxu2  ;;  %v3162_v42 = vpop.f32.mrf.mxu3 }
  0xba   : > { %3684 = vst [vmem:[#allocation6_spill] sm:$0xff] %v3162_v42  ;;  %v2410_v42 = vld [vmem:[%s3105_s14 + $0xe0] sm:$0xf] }
  0xbe   : > { %1644 = vmatmul.bf16.gmra.mxu2 %v2311_v35  ;;  %1565 = vmatmul.bf16.gmra.mxu3 %v2331_v43  ;;  %v2347_v43 = vor.u32 %v2589_v37, %v2344_v38  ;;  %v2379_v38 = vor.u32 %v2599_v20, %v2378_v19  ;;  %v2602_v19 = vld [vmem:[%s3105_s14 + $0xc8] sm:$0xf0]  ;;  %v2088_v20 = vld [vmem:[%s2940_s10 + $0x9c] sm:$0xf0] }
  0xc0   : > { %v3166_v47 = vpop.f32.mrf.mxu0  ;;  %v3168_v48 = vpop.f32.mrf.mxu1 }
  0xc1   : > { %v3164_v46 = vpop.f32.mrf.mxu2  ;;  %v3171_v49 = vpop.f32.mrf.mxu3 }
  0xc2   : > { %3685 = vst [vmem:[#allocation7_spill] sm:$0xff] %v3171_v49 }
  0xc3   : > { %981 = vmatmul.bf16.gmra.mxu1 %v2031_v44  ;;  %2557 = vmatmul.msk.bf16.gmra.mxu0 %vm830_vm0, %v2315_v45  ;;  %v2655_v44 = vld [vmem:[%s2940_s10 + $0x64] sm:$0xf]  ;;  %v2366_v45 = vld [vmem:[%s3105_s14 + $0x90] sm:$0xf] }
  0xc4   : > { %v2367_v58 = vor.u32 %v2596_v50, %v2366_v45  ;;  %v2067_v59 = vor.u32 %v2655_v44, %v2064_v51 }
  0xc8   : > { %v3177_v53 = vpop.f32.mrf.mxu0  ;;  %v3179_v54 = vpop.f32.mrf.mxu1 }
  0xc9   : > { %v3175_v52 = vpop.f32.mrf.mxu2  ;;  %v3187_v62 = vpop.f32.mrf.mxu3 }
  0xca   : > { %3686 = vst [vmem:[#allocation8_spill] sm:$0xff] %v3187_v62 }
  0xce   : > { %1649 = vmatmul.bf16.gmra.mxu2 %v2323_v55  ;;  %1570 = vmatmul.bf16.gmra.mxu3 %v2343_v63  ;;  %v2350_v55 = vld [vmem:[%s3105_s14 + $0x68] sm:$0xf] }
  0xcf   : > { %v2351_v60 = vor.u32 %v2591_v56, %v2350_v55  ;;  %v2595_v56 = vld [vmem:[%s3105_s14 + $0x94] sm:$0xf] }
  0xd0   : > { %v3191_v3 = vpop.f32.mrf.mxu0  ;;  %v3193_v4 = vpop.f32.mrf.mxu1 }
  0xd1   : > { %v3189_v2 = vpop.f32.mrf.mxu2  ;;  %3687 = vst [vmem:[#allocation9_spill] sm:$0xff] %v3193_v4  ;;  %v3196_v5 = vpop.f32.mrf.mxu3 }
  0xd2   : > { %3688 = vst [vmem:[#allocation10_spill] sm:$0xff] %v3196_v5  ;;  %v2398_v5 = vld [vmem:[%s3105_s14 + $0xc8] sm:$0xf] }
  0xd3   : > { %986 = vmatmul.bf16.gmra.mxu1 %v2043_v0  ;;  %2558 = vmatmul.msk.bf16.gmra.mxu0 %vm830_vm0, %v2327_v1 }
  0xd8   : > { %v3202_v9 = vpop.f32.mrf.mxu0  ;;  %v3204_v12 = vpop.f32.mrf.mxu1 }
  0xd9   : > { %v3200_v8 = vpop.f32.mrf.mxu2  ;;  %3689 = vst [vmem:[#allocation11_spill] sm:$0xff] %v3204_v12  ;;  %v3212_v21 = vpop.f32.mrf.mxu3 }
  0xda   : > { %3690 = vst [vmem:[#allocation12_spill] sm:$0xff] %v3212_v21  ;;  %v2414_v21 = vld [vmem:[%s3105_s14 + $0xf0] sm:$0xf] }
  0xde   : > { %1654 = vmatmul.bf16.gmra.mxu2 %v2335_v13  ;;  %1575 = vmatmul.bf16.gmra.mxu3 %v2355_v23  ;;  %v2076_v23 = vld [vmem:[%s2940_s10 + $0x84] sm:$0xf0] }
  0xe0   : > { %v3216_v31 = vpop.f32.mrf.mxu0  ;;  %v3218_v35 = vpop.f32.mrf.mxu1 }
  0xe1   : > { %v3214_v30 = vpop.f32.mrf.mxu2  ;;  %3691 = vst [vmem:[#allocation13_spill] sm:$0xff] %v3218_v35  ;;  %v3221_v36 = vpop.f32.mrf.mxu3 }
  0xe2   : > { %3692 = vst [vmem:[#allocation14_spill] sm:$0xff] %v3221_v36 }
  0xe3   : > { %991 = vmatmul.bf16.gmra.mxu1 %v2055_v24  ;;  %2559 = vmatmul.msk.bf16.gmra.mxu0 %vm830_vm0, %v2339_v25  ;;  %v2362_v24 = vld [vmem:[%s3105_s14 + $0x80] sm:$0xf]  ;;  %v2594_v25 = vld [vmem:[%s3105_s14 + $0x88] sm:$0xf0] }
  0xe4   : > { %v2363_v44 = vor.u32 %v2594_v25, %v2362_v24  ;;  %v2597_v24 = vld [vmem:[%s3105_s14 + $0xa0] sm:$0xf0] }
  0xe8   : > { %v3227_v40 = vpop.f32.mrf.mxu0  ;;  %v3229_v41 = vpop.f32.mrf.mxu1 }
  0xe9   : > { %v3225_v39 = vpop.f32.mrf.mxu2  ;;  %3693 = vst [vmem:[#allocation15_spill] sm:$0xff] %v3229_v41  ;;  %v3237_v57 = vpop.f32.mrf.mxu3 }
  0xea   : > { %3694 = vst [vmem:[#allocation16_spill] sm:$0xff] %v3237_v57 }
  0xee   : > { %1659 = vmatmul.bf16.gmra.mxu2 %v2347_v43  ;;  %1580 = vmatmul.bf16.gmra.mxu3 %v2367_v58  ;;  %v2079_v43 = vor.u32 %v2658_v18, %v2076_v23  ;;  %v2368_v58 = vld [vmem:[%s3105_s14 + $0x9c] sm:$0xf0]  ;;  %v2374_v23 = vld [vmem:[%s3105_s14 + $0x98] sm:$0xf] }
  0xef   : > { %v2371_v7 = vor.u32 %v2595_v56, %v2368_v58  ;;  %v2390_v18 = vld [vmem:[%s3105_s14 + $0xc0] sm:$0xf] }
  0xf0   : > { %v3241_v63 = vpop.f32.mrf.mxu0  ;;  %v3243_v0 = vpop.f32.mrf.mxu1 }
  0xf1   : > { %v3239_v61 = vpop.f32.mrf.mxu2  ;;  %3695 = vst [vmem:[#allocation17_spill] sm:$0xff] %v3243_v0  ;;  %v3246_v1 = vpop.f32.mrf.mxu3 }
  0xf2   : > { %3696 = vst [vmem:[#allocation18_spill] sm:$0xff] %v3246_v1  ;;  %v2605_v1 = vld [vmem:[%s3105_s14 + $0xe0] sm:$0xf0] }
  0xf3   : > { %996 = vmatmul.bf16.gmra.mxu1 %v2067_v59  ;;  %2560 = vmatmul.msk.bf16.gmra.mxu0 %vm830_vm0, %v2351_v60 }
  0xf8   : > { %v3252_v15 = vpop.f32.mrf.mxu0  ;;  %v3254_v16 = vpop.f32.mrf.mxu1 }
  0xf9   : > { %v3250_v13 = vpop.f32.mrf.mxu2  ;;  %3697 = vst [vmem:[#allocation19_spill] sm:$0xff] %v3254_v16  ;;  %v3262_v37 = vpop.f32.mrf.mxu3  ;;  %v2608_v16 = vld [vmem:[%s3105_s14 + $0xf8] sm:$0xf0] }
  0xfa   : > { %3698 = vst [vmem:[#allocation20_spill] sm:$0xff] %v3262_v37  ;;  %v2402_v37 = vld [vmem:[%s3105_s14 + $0xd8] sm:$0xf] }
  0xfb   : > { %v2403_v57 = vor.u32 %v2605_v1, %v2402_v37  ;;  %v2601_v1 = vld [vmem:[%s3105_s14 + $0xc4] sm:$0xf]  ;;  %v2392_v37 = vld [vmem:[%s3105_s14 + $0xcc] sm:$0xf0] }
  0xfe   : > { %1664 = vmatmul.bf16.gmra.mxu2 %v2359_v17  ;;  %1585 = vmatmul.bf16.gmra.mxu3 %v2379_v38  ;;  %v2661_v17 = vld [vmem:[%s2940_s10 + $0x94] sm:$0xf]  ;;  %v2391_v38 = vor.u32 %v2602_v19, %v2390_v18  ;;  %v2598_v18 = vld [vmem:[%s3105_s14 + $0xac] sm:$0xf]  ;;  %v2380_v19 = vld [vmem:[%s3105_s14 + $0xb4] sm:$0xf0] }
 0x100   : > { %v3266_v50 = vpop.f32.mrf.mxu0  ;;  %v3268_v51 = vpop.f32.mrf.mxu1 }
 0x101   : > { %v3264_v45 = vpop.f32.mrf.mxu2  ;;  %3699 = vst [vmem:[#allocation21_spill] sm:$0xff] %v3268_v51  ;;  %v3271_v55 = vpop.f32.mrf.mxu3 }
 0x102   : > { %3700 = vst [vmem:[#allocation22_spill] sm:$0xff] %v3271_v55 }
 0x103   : > { %1001 = vmatmul.bf16.gmra.mxu1 %v2079_v43  ;;  %2561 = vmatmul.msk.bf16.gmra.mxu0 %vm830_vm0, %v2363_v44  ;;  %v2091_v43 = vor.u32 %v2661_v17, %v2088_v20  ;;  %v2375_v44 = vor.u32 %v2597_v24, %v2374_v23  ;;  %v2383_v24 = vor.u32 %v2598_v18, %v2380_v19 }
 0x108   : > { %v3277_v60 = vpop.f32.mrf.mxu0  ;;  %v3279_v6 = vpop.f32.mrf.mxu1 }
 0x109   : > { %v3275_v59 = vpop.f32.mrf.mxu2  ;;  %3701 = vst [vmem:[#allocation23_spill] sm:$0xff] %v3279_v6  ;;  %v3287_v25 = vpop.f32.mrf.mxu3 }
 0x10a   : > { %3702 = vst [vmem:[#allocation24_spill] sm:$0xff] %v3287_v25  ;;  %v2664_v25 = vld [vmem:[%s2940_s10 + $0xac] sm:$0xf] }
 0x10e   : > { %1669 = vmatmul.bf16.gmra.mxu2 %v2371_v7  ;;  %1590 = vmatmul.bf16.gmra.mxu3 %v2391_v38  ;;  %v2386_v38 = vld [vmem:[%s3105_s14 + $0xb0] sm:$0xf] }
 0x110   : > { %v3291_v56 = vpop.f32.mrf.mxu0  ;;  %v3293_v58 = vpop.f32.mrf.mxu1 }
 0x111   : > { %v3289_v55 = vpop.f32.mrf.mxu2  ;;  %3703 = vst [vmem:[#allocation25_spill] sm:$0xff] %v3293_v58  ;;  %v1551_v7 = vpop.f32.mrf.mxu3  ;;  %v2100_v58 = vld [vmem:[%s2940_s10 + $0xb4] sm:$0xf0] }
 0x112   : > { %v2103_v6 = vor.u32 %v2664_v25, %v2100_v58 }
 0x113   : > { %1006 = vmatmul.bf16.gmra.mxu1 %v2091_v43  ;;  %2562 = vmatmul.msk.bf16.gmra.mxu0 %vm830_vm0, %v2375_v44  ;;  %v2600_v43 = vld [vmem:[%s3105_s14 + $0xb8] sm:$0xf0] }
 0x114   : > { %v2387_v36 = vor.u32 %v2600_v43, %v2386_v38  ;;  %v2395_v43 = vor.u32 %v2601_v1, %v2392_v37 }
 0x118   : > { %v3300_v20 = vpop.f32.mrf.mxu0  ;;  %v3302_v23 = vpop.f32.mrf.mxu1 }
 0x119   : > { %v3298_v17 = vpop.f32.mrf.mxu2  ;;  %3704 = vst [vmem:[#allocation26_spill] sm:$0xff] %v3302_v23  ;;  %v1553_v44 = vpop.f32.mrf.mxu3  ;;  %v2667_v23 = vld [vmem:[%s2940_s10 + $0xc4] sm:$0xf] }
 0x11e   : > { %1674 = vmatmul.bf16.gmra.mxu2 %v2383_v24  ;;  %1595 = vmatmul.bf16.gmra.mxu3 %v2403_v57  ;;  %v2603_v57 = vld [vmem:[%s3105_s14 + $0xd0] sm:$0xf0] }
 0x11f   : > { %v2399_v62 = vor.u32 %v2603_v57, %v2398_v5  ;;  %v2404_v5 = vld [vmem:[%s3105_s14 + $0xe4] sm:$0xf0]  ;;  %v2611_v57 = vld [vmem:[%s3105_s14 + $0x110] sm:$0xf0] }
 0x120   : > { %v3312_v18 = vpop.f32.mrf.mxu0  ;;  %v3314_v19 = vpop.f32.mrf.mxu1 }
 0x121   : > { %v3310_v51 = vpop.f32.mrf.mxu2  ;;  %3705 = vst [vmem:[#allocation27_spill] sm:$0xff] %v3314_v19  ;;  %v3317_v24 = vpop.f32.mrf.mxu3  ;;  %v2112_v19 = vld [vmem:[%s2940_s10 + $0xcc] sm:$0xf0] }
 0x122   : > { %v2115_v0 = vor.u32 %v2667_v23, %v2112_v19  ;;  %v3353_v23 = vld [vmem:[%s3679_s5] ss:$0 sm:$0xff]  ;;  %v2670_v19 = vld [vmem:[%s2940_s10 + $0xdc] sm:$0xf] }
 0x123   : > { %1011 = vmatmul.bf16.gmra.mxu1 %v2103_v6  ;;  %2563 = vmatmul.msk.bf16.gmra.mxu0 %vm830_vm0, %v2387_v36  ;;  %v2415_v6 = vor.u32 %v2608_v16, %v2414_v21  ;;  %v2604_v21 = vld [vmem:[%s3105_s14 + $0xdc] sm:$0xf] }
 0x128   : > { %v3323_v58 = vpop.f32.mrf.mxu0  ;;  %v3325_v38 = vpop.f32.mrf.mxu1 }
 0x129   : > { %v3321_v25 = vpop.f32.mrf.mxu2  ;;  %3706 = vst [vmem:[#allocation28_spill] sm:$0xff] %v3325_v38  ;;  %v3333_v36 = vpop.f32.mrf.mxu3 }
 0x12e   : > { %1679 = vmatmul.bf16.gmra.mxu2 %v2395_v43  ;;  %1600 = vmatmul.bf16.gmra.mxu3 %v2415_v6 }
 0x130   : > { %v1729_v49 = vpop.f32.mrf.mxu0  ;;  %v977_v35 = vpop.f32.mrf.mxu1 }
 0x131   : > { %v1640_v41 = vpop.f32.mrf.mxu2  ;;  %v978_v1 = vadd.f32 %v977_v35, %v3141_v27  ;;  %v3338_v43 = vpop.f32.mrf.mxu3  ;;  %v3346_v27 = vld [vmem:[%s3678_s4] ss:$0 sm:$0xff] }
 0x133   : > { %1016 = vmatmul.bf16.gmra.mxu1 %v2115_v0  ;;  %2564 = vmatmul.msk.bf16.gmra.mxu0 %vm830_vm0, %v2399_v62  ;;  %v1067_v37 = vadd.f32 %v3123_v10, %v978_v1  ;;  %v2407_v0 = vor.u32 %v2604_v21, %v2404_v5  ;;  %v2606_v21 = vld [vmem:[%s3105_s14 + $0xe8] sm:$0xf0] }
 0x134   : > { %v2411_v4 = vor.u32 %v2606_v21, %v2410_v42  ;;  %v2438_v21 = vld [vmem:[%s3105_s14 + $0x120] sm:$0xf] }
 0x135   : > { %v1552_v38 = vadd.f32 %v1551_v7, %v1067_v37  ;;  %v2124_v37 = vld [vmem:[%s2940_s10 + $0xe4] sm:$0xf0] }
 0x136   : > { %v2127_v29 = vor.u32 %v2670_v19, %v2124_v37  ;;  %v2673_v37 = vld [vmem:[%s2940_s10 + $0xf4] sm:$0xf] }
 0x137   : > { %v1641_v16 = vadd.f32 %v1640_v41, %v1552_v38  ;;  %v2426_v38 = vld [vmem:[%s3105_s14 + $0x108] sm:$0xf] }
 0x138   : > { %v1731_v10 = vpop.f32.mrf.mxu0  ;;  %v979_v35 = vpop.f32.mrf.mxu1  ;;  %v2427_v12 = vor.u32 %v2611_v57, %v2426_v38 }
 0x139   : > { %v1642_v62 = vpop.f32.mrf.mxu2  ;;  %v1730_v7 = vadd.f32 %v1729_v49, %v1641_v16  ;;  %v980_v41 = vadd.f32 %v979_v35, %v3152_v33  ;;  %v3364_v5 = vpop.f32.mrf.mxu3 }
 0x13b   : > { %v1813_v6 = vmul.f32 %v3346_v27, %v1730_v7  ;;  %v1069_v1 = vadd.f32 %v3129_v14, %v980_v41 }
 0x13d   : > { %v1849_v49 = vadd.f32 %v3353_v23, %v1813_v6  ;;  %v1554_v16 = vadd.f32 %v1553_v44, %v1069_v1 }
 0x13e   : > { %1684 = vmatmul.bf16.gmra.mxu2 %v2407_v0  ;;  %1605 = vmatmul.bf16.gmra.mxu3 %v2427_v12 }
 0x13f   : > { %1881 = vst.msk [vmem:[%s3367_s19] sm:$0xff] %vm830_vm0, %v1849_v49  ;;  %v1643_v14 = vadd.f32 %v1642_v62, %v1554_v16  ;;  %v2614_v49 = vld [vmem:[%s3105_s14 + $0x128] sm:$0xf0] }
 0x140   : > { %v1734_v35 = vpop.f32.mrf.mxu0  ;;  %v982_v0 = vpop.f32.mrf.mxu1 }
 0x141   : > { %v1645_v33 = vpop.f32.mrf.mxu2  ;;  %v1732_v7 = vadd.f32 %v1731_v10, %v1643_v14  ;;  %v983_v41 = vadd.f32 %v982_v0, %v3166_v47  ;;  %v3375_v19 = vpop.f32.mrf.mxu3  ;;  %v2607_v10 = vld [vmem:[%s3105_s14 + $0xf4] sm:$0xf]  ;;  %v2416_v47 = vld [vmem:[%s3105_s14 + $0xfc] sm:$0xf0]  ;;  %v2422_v0 = vld [vmem:[%s3105_s14 + $0xf8] sm:$0xf] }
 0x142   : > { %v2419_v6 = vor.u32 %v2607_v10, %v2416_v47  ;;  %v2136_v14 = vld [vmem:[%s2940_s10 + $0xfc] sm:$0xf0] }
 0x143   : > { %1021 = vmatmul.bf16.gmra.mxu1 %v2127_v29  ;;  %2565 = vmatmul.msk.bf16.gmra.mxu0 %vm830_vm0, %v2411_v4  ;;  %v1814_v42 = vmul.f32 %v3346_v27, %v1732_v7  ;;  %v1072_v44 = vadd.f32 %v3139_v26, %v983_v41  ;;  %v2609_v7 = vld [vmem:[%s3105_s14 + $0x100] sm:$0xf0] }
 0x145   : > { %v1850_v62 = vadd.f32 %v3353_v23, %v1814_v42  ;;  %v1557_v38 = vadd.f32 %v3317_v24, %v1072_v44  ;;  %v2439_v42 = vor.u32 %v2614_v49, %v2438_v21  ;;  %v2423_v44 = vor.u32 %v2609_v7, %v2422_v0  ;;  %v2450_v0 = vld [vmem:[%s3105_s14 + $0x138] sm:$0xf]  ;;  %v2617_v7 = vld [vmem:[%s3105_s14 + $0x140] sm:$0xf0] }
 0x147   : > { %1882 = vst.msk [vmem:[%s3367_s19 + $0x8] sm:$0xff] %vm830_vm0, %v1850_v62  ;;  %v1646_v29 = vadd.f32 %v1645_v33, %v1557_v38 }
 0x148   : > { %v1736_v12 = vpop.f32.mrf.mxu0  ;;  %v984_v57 = vpop.f32.mrf.mxu1 }
 0x149   : > { %v1647_v4 = vpop.f32.mrf.mxu2  ;;  %v1735_v26 = vadd.f32 %v1734_v35, %v1646_v29  ;;  %v985_v1 = vadd.f32 %v984_v57, %v3177_v53  ;;  %v3392_v33 = vpop.f32.mrf.mxu3  ;;  %v2139_v53 = vor.u32 %v2673_v37, %v2136_v14  ;;  %v2676_v14 = vld [vmem:[%s2940_s10 + $0x10c] sm:$0xf] }
 0x14b   : > { %v1815_v24 = vmul.f32 %v3346_v27, %v1735_v26  ;;  %v1074_v16 = vadd.f32 %v3150_v32, %v985_v1 }
 0x14d   : > { %v1851_v41 = vadd.f32 %v3353_v23, %v1815_v24  ;;  %v1559_v35 = vadd.f32 %v3333_v36, %v1074_v16 }
 0x14e   : > { %1689 = vmatmul.bf16.gmra.mxu2 %v2419_v6  ;;  %1610 = vmatmul.bf16.gmra.mxu3 %v2439_v42  ;;  %v2434_v42 = vld [vmem:[%s3105_s14 + $0x110] sm:$0xf] }
 0x14f   : > { %1883 = vst.msk [vmem:[%s3367_s19 + $0x10] sm:$0xff] %vm830_vm0, %v1851_v41  ;;  %v1648_v62 = vadd.f32 %v1647_v4, %v1559_v35  ;;  %v2148_v35 = vld [vmem:[%s2940_s10 + $0x114] sm:$0xf0] }
 0x150   : > { %v1739_v38 = vpop.f32.mrf.mxu0  ;;  %v987_v10 = vpop.f32.mrf.mxu1 }
 0x151   : > { %v1650_v32 = vpop.f32.mrf.mxu2  ;;  %v1737_v47 = vadd.f32 %v1736_v12, %v1648_v62  ;;  %v988_v29 = vadd.f32 %v987_v10, %v3191_v3  ;;  %v3402_v6 = vpop.f32.mrf.mxu3  ;;  %v2610_v12 = vld [vmem:[%s3105_s14 + $0x10c] sm:$0xf]  ;;  %v2428_v3 = vld [vmem:[%s3105_s14 + $0x114] sm:$0xf0] }
 0x152   : > { %v2431_v24 = vor.u32 %v2610_v12, %v2428_v3 }
 0x153   : > { %1026 = vmatmul.bf16.gmra.mxu1 %v2139_v53  ;;  %2566 = vmatmul.msk.bf16.gmra.mxu0 %vm830_vm0, %v2423_v44  ;;  %v1816_v36 = vmul.f32 %v3346_v27, %v1737_v47  ;;  %v1077_v57 = vadd.f32 %v3164_v46, %v988_v29  ;;  %v2612_v53 = vld [vmem:[%s3105_s14 + $0x118] sm:$0xf0] }
 0x154   : > { %v2435_v10 = vor.u32 %v2612_v53, %v2434_v42  ;;  %v2446_v42 = vld [vmem:[%s3105_s14 + $0x128] sm:$0xf]  ;;  %v2615_v53 = vld [vmem:[%s3105_s14 + $0x130] sm:$0xf0] }
 0x155   : > { %v1852_v4 = vadd.f32 %v3353_v23, %v1816_v36  ;;  %v1562_v26 = vadd.f32 %v3338_v43, %v1077_v57 }
 0x157   : > { %1884 = vst.msk [vmem:[%s3367_s19 + $0x18] sm:$0xff] %vm830_vm0, %v1852_v4  ;;  %v1651_v1 = vadd.f32 %v1650_v32, %v1562_v26 }
 0x158   : > { %v1741_v21 = vpop.f32.mrf.mxu0  ;;  %v989_v49 = vpop.f32.mrf.mxu1 }
 0x159   : > { %v1652_v37 = vpop.f32.mrf.mxu2  ;;  %v1740_v46 = vadd.f32 %v1739_v38, %v1651_v1  ;;  %v990_v16 = vadd.f32 %v989_v49, %v3202_v9  ;;  %v3419_v44 = vpop.f32.mrf.mxu3  ;;  %v2451_v38 = vor.u32 %v2617_v7, %v2450_v0  ;;  %v2151_v9 = vor.u32 %v2676_v14, %v2148_v35  ;;  %v2679_v0 = vld [vmem:[%s2940_s10 + $0x124] sm:$0xf]  ;;  %v2462_v7 = vld [vmem:[%s3105_s14 + $0x150] sm:$0xf] }
 0x15a   : > { %v2160_v35 = vld [vmem:[%s2940_s10 + $0x12c] sm:$0xf0] }
 0x15b   : > { %v1817_v43 = vmul.f32 %v3346_v27, %v1740_v46  ;;  %v1079_v41 = vadd.f32 %v3175_v52, %v990_v16 }
 0x15d   : > { %v1853_v62 = vadd.f32 %v3353_v23, %v1817_v43  ;;  %v1564_v32 = vadd.f32 %v3364_v5, %v1079_v41  ;;  %v2620_v43 = vld [vmem:[%s3105_s14 + $0x158] sm:$0xf0] }
 0x15e   : > { %1694 = vmatmul.bf16.gmra.mxu2 %v2431_v24  ;;  %1615 = vmatmul.bf16.gmra.mxu3 %v2451_v38 }
 0x15f   : > { %1885 = vst.msk [vmem:[%s3367_s19 + $0x20] sm:$0xff] %vm830_vm0, %v1853_v62  ;;  %v1653_v47 = vadd.f32 %v1652_v37, %v1564_v32  ;;  %v2613_v37 = vld [vmem:[%s3105_s14 + $0x124] sm:$0xf] }
 0x160   : > { %v1744_v29 = vpop.f32.mrf.mxu0  ;;  %v992_v36 = vpop.f32.mrf.mxu1 }
 0x161   : > { %v1655_v52 = vpop.f32.mrf.mxu2  ;;  %v1742_v57 = vadd.f32 %v1741_v21, %v1653_v47  ;;  %v993_v4 = vadd.f32 %v992_v36, %v3216_v31  ;;  %v3429_v12 = vpop.f32.mrf.mxu3  ;;  %v2440_v31 = vld [vmem:[%s3105_s14 + $0x12c] sm:$0xf0] }
 0x162   : > { %v2443_v16 = vor.u32 %v2613_v37, %v2440_v31 }
 0x163   : > { %1031 = vmatmul.bf16.gmra.mxu1 %v2151_v9  ;;  %2567 = vmatmul.msk.bf16.gmra.mxu0 %vm830_vm0, %v2435_v10  ;;  %v1818_v5 = vmul.f32 %v3346_v27, %v1742_v57  ;;  %v1082_v26 = vadd.f32 %v3189_v2, %v993_v4  ;;  %v2463_v9 = vor.u32 %v2620_v43, %v2462_v7  ;;  %v2172_v7 = vld [vmem:[%s2940_s10 + $0x144] sm:$0xf0]  ;;  %v2458_v43 = vld [vmem:[%s3105_s14 + $0x140] sm:$0xf] }
 0x164   : > { %v2447_v10 = vor.u32 %v2615_v53, %v2446_v42 }
 0x165   : > { %v1854_v3 = vadd.f32 %v3353_v23, %v1818_v5  ;;  %v1567_v1 = vadd.f32 %v3375_v19, %v1082_v26 }
 0x167   : > { %1886 = vst.msk [vmem:[%s3367_s19 + $0x28] sm:$0xff] %vm830_vm0, %v1854_v3  ;;  %v1656_v21 = vadd.f32 %v1655_v52, %v1567_v1  ;;  %v2616_v1 = vld [vmem:[%s3105_s14 + $0x13c] sm:$0xf] }
 0x168   : > { %v1746_v24 = vpop.f32.mrf.mxu0  ;;  %v994_v46 = vpop.f32.mrf.mxu1 }
 0x169   : > { %v1657_v49 = vpop.f32.mrf.mxu2  ;;  %v1745_v2 = vadd.f32 %v1744_v29, %v1656_v21  ;;  %v995_v14 = vadd.f32 %v994_v46, %v3227_v40  ;;  %v3446_v62 = vpop.f32.mrf.mxu3  ;;  %v2163_v40 = vor.u32 %v2679_v0, %v2160_v35 }
 0x16b   : > { %v1819_v19 = vmul.f32 %v3346_v27, %v1745_v2  ;;  %v1084_v41 = vadd.f32 %v3200_v8, %v995_v14  ;;  %v2474_v2 = vld [vmem:[%s3105_s14 + $0x168] sm:$0xf]  ;;  %v2623_v14 = vld [vmem:[%s3105_s14 + $0x170] sm:$0xf0] }
 0x16c   : > { %v2475_v53 = vor.u32 %v2623_v14, %v2474_v2 }
 0x16d   : > { %v1855_v32 = vadd.f32 %v3353_v23, %v1819_v19  ;;  %v1569_v38 = vadd.f32 %v3392_v33, %v1084_v41  ;;  %v2618_v19 = vld [vmem:[%s3105_s14 + $0x148] sm:$0xf0] }
 0x16e   : > { %1699 = vmatmul.bf16.gmra.mxu2 %v2443_v16  ;;  %1620 = vmatmul.bf16.gmra.mxu3 %v2463_v9  ;;  %v2682_v16 = vld [vmem:[%s2940_s10 + $0x13c] sm:$0xf] }
 0x16f   : > { %1887 = vst.msk [vmem:[%s3367_s19 + $0x30] sm:$0xff] %vm830_vm0, %v1855_v32  ;;  %v1658_v47 = vadd.f32 %v1657_v49, %v1569_v38  ;;  %v2459_v32 = vor.u32 %v2618_v19, %v2458_v43 }
 0x170   : > { %v1749_v52 = vpop.f32.mrf.mxu0  ;;  %v997_v29 = vpop.f32.mrf.mxu1 }
 0x171   : > { %v1660_v8 = vpop.f32.mrf.mxu2  ;;  %v1747_v36 = vadd.f32 %v1746_v24, %v1658_v47  ;;  %v998_v57 = vadd.f32 %v997_v29, %v3241_v63  ;;  %v3456_v5 = vpop.f32.mrf.mxu3  ;;  %v2452_v63 = vld [vmem:[%s3105_s14 + $0x144] sm:$0xf0] }
 0x172   : > { %v2455_v24 = vor.u32 %v2616_v1, %v2452_v63 }
 0x173   : > { %1036 = vmatmul.bf16.gmra.mxu1 %v2163_v40  ;;  %2568 = vmatmul.msk.bf16.gmra.mxu0 %vm830_vm0, %v2447_v10  ;;  %v1820_v33 = vmul.f32 %v3346_v27, %v1747_v36  ;;  %v1087_v4 = vadd.f32 %v3214_v30, %v998_v57  ;;  %v2619_v57 = vld [vmem:[%s3105_s14 + $0x154] sm:$0xf] }
 0x175   : > { %v1856_v26 = vadd.f32 %v3353_v23, %v1820_v33  ;;  %v1572_v3 = vadd.f32 %v3402_v6, %v1087_v4 }
 0x177   : > { %1888 = vst.msk [vmem:[%s3367_s19 + $0x38] sm:$0xff] %vm830_vm0, %v1856_v26  ;;  %v1661_v37 = vadd.f32 %v1660_v8, %v1572_v3 }
 0x178   : > { %v1751_v21 = vpop.f32.mrf.mxu0  ;;  %v999_v49 = vpop.f32.mrf.mxu1 }
 0x179   : > { %v1662_v31 = vpop.f32.mrf.mxu2  ;;  %v1750_v30 = vadd.f32 %v1749_v52, %v1661_v37  ;;  %v1000_v46 = vadd.f32 %v999_v49, %v3252_v15  ;;  %v3473_v41 = vpop.f32.mrf.mxu3  ;;  %v2175_v15 = vor.u32 %v2682_v16, %v2172_v7  ;;  %v2685_v37 = vld [vmem:[%s2940_s10 + $0x154] sm:$0xf]  ;;  %v2470_v49 = vld [vmem:[%s3105_s14 + $0x158] sm:$0xf] }
 0x17b   : > { %v1821_v6 = vmul.f32 %v3346_v27, %v1750_v30  ;;  %v1089_v0 = vadd.f32 %v3225_v39, %v1000_v46 }
 0x17d   : > { %v1857_v35 = vadd.f32 %v3353_v23, %v1821_v6  ;;  %v1574_v42 = vadd.f32 %v3419_v44, %v1089_v0 }
 0x17e   : > { %1704 = vmatmul.bf16.gmra.mxu2 %v2455_v24  ;;  %1625 = vmatmul.bf16.gmra.mxu3 %v2475_v53  ;;  %v2621_v24 = vld [vmem:[%s3105_s14 + $0x160] sm:$0xf0]  ;;  %v2622_v53 = vld [vmem:[%s3105_s14 + $0x16c] sm:$0xf] }
 0x17f   : > { %1889 = vst.msk [vmem:[%s3367_s19 + $0x40] sm:$0xff] %vm830_vm0, %v1857_v35  ;;  %v1663_v38 = vadd.f32 %v1662_v31, %v1574_v42  ;;  %v2471_v14 = vor.u32 %v2621_v24, %v2470_v49 }
 0x180   : > { %v1754_v9 = vpop.f32.mrf.mxu0  ;;  %v1002_v40 = vpop.f32.mrf.mxu1 }
 0x181   : > { %v1665_v39 = vpop.f32.mrf.mxu2  ;;  %v1752_v10 = vadd.f32 %v1751_v21, %v1663_v38  ;;  %v1003_v47 = vadd.f32 %v1002_v40, %v3266_v50  ;;  %v3483_v52 = vpop.f32.mrf.mxu3  ;;  %v2464_v50 = vld [vmem:[%s3105_s14 + $0x15c] sm:$0xf0] }
 0x182   : > { %v2467_v1 = vor.u32 %v2619_v57, %v2464_v50 }
 0x183   : > { %1041 = vmatmul.bf16.gmra.mxu1 %v2175_v15  ;;  %2569 = vmatmul.msk.bf16.gmra.mxu0 %vm830_vm0, %v2459_v32  ;;  %v1822_v44 = vmul.f32 %v3346_v27, %v1752_v10  ;;  %v1092_v8 = vadd.f32 %v3239_v61, %v1003_v47  ;;  %v2476_v15 = vld [vmem:[%s3105_s14 + $0x174] sm:$0xf0]  ;;  %v2688_v47 = vld [vmem:[%s2940_s10 + $0x16c] sm:$0xf] }
 0x184   : > { %v2479_v40 = vor.u32 %v2622_v53, %v2476_v15 }
 0x185   : > { %v1858_v29 = vadd.f32 %v3353_v23, %v1822_v44  ;;  %v1577_v36 = vadd.f32 %v3429_v12, %v1092_v8  ;;  %v2184_v12 = vld [vmem:[%s2940_s10 + $0x15c] sm:$0xf0]  ;;  %v2196_v8 = vld [vmem:[%s2940_s10 + $0x174] sm:$0xf0]  ;;  %s2709_s10 = sshll.u32 %s2886_s25, 8  ;;  %s1914_s25 = scalar_lea.sflag [#allocation3], %s263_s13 }
 0x186   : > { %v2187_v2 = vor.u32 %v2685_v37, %v2184_v12  ;;  %s1925_s29 = scalar_lea.hbm %s3680_s6, %s2709_s10 }
 0x187   : > { %1890 = vst.msk [vmem:[%s3367_s19 + $0x48] sm:$0xff] %vm830_vm0, %v1858_v29  ;;  %v1666_v33 = vadd.f32 %v1665_v39, %v1577_v36  ;;  %v2482_v29 = vld [vmem:[%s3105_s14 + $0x170] sm:$0xf]  ;;  %v2624_v36 = vld [vmem:[%s3105_s14 + $0x178] sm:$0xf0]  ;;  %s1928_s11 = sshll.u32 %s1925_s29, 4  ;;  %s1929_s11 = int_to_ptr.hbm [resolvable:$true] %s1928_s11 }
 0x188   : > { %v1756_v26 = vpop.f32.mrf.mxu0  ;;  %v1004_v3 = vpop.f32.mrf.mxu1  ;;  %s2778_s12 = sshra.s32 %s1929_s11, 4  ;;  %s2779_s12 = int_to_ptr.hbm [resolvable:$true] %s2778_s12 }
 0x189   : > { %v1667_v4 = vpop.f32.mrf.mxu2  ;;  %v1755_v61 = vadd.f32 %v1754_v9, %v1666_v33  ;;  %v1005_v63 = vadd.f32 %v1004_v3, %v3277_v60  ;;  %v3498_v30 = vpop.f32.mrf.mxu3  ;;  %v2199_v33 = vor.u32 %v2688_v47, %v2196_v8  ;;  %s2780_s14 = scalar_lea.hbm %s2779_s12, 256  ;;  %p2785_p0 = scmp.lt.s32.totalorder %s2779_s12, %s3680_s6 }
 0x18a   : > { %p2781_p11 = scmp.ne.s32.totalorder %s2779_s12, %s2780_s14  ;;  %p2786_p1 = scmp.lt.s32.totalorder %s2784_s16, %s2780_s14 }
 0x18b   : > { %v1823_v31 = vmul.f32 %v3346_v27, %v1755_v61  ;;  %v1094_v21 = vadd.f32 %v3250_v13, %v1005_v63 }
 0x18c   : > { %p2782_p12 = pnand %p2781_p11, %p2903_p5  ;;  %p2787_p2 = por %p2786_p1, %p2785_p0 }
 0x18d   : > { %v1859_v46 = vadd.f32 %v3353_v23, %v1823_v31  ;;  %v1579_v16 = vadd.f32 %v3446_v62, %v1094_v21 }
 0x18e   : > { %1709 = vmatmul.bf16.gmra.mxu2 %v2467_v1  ;;  %p2783_p13 = pneg %p2782_p12 }
 0x18f   : > { %1891 = vst.msk [vmem:[%s3367_s19 + $0x50] sm:$0xff] %vm830_vm0, %v1859_v46  ;;  %v1668_v60 = vadd.f32 %v1667_v4, %v1579_v16  ;;  %v2483_v4 = vor.u32 %v2624_v36, %v2482_v29 }
 0x190   : > { %v1759_v13 = vpop.f32.mrf.mxu0  ;;  %v1007_v0 = vpop.f32.mrf.mxu1  ;;  %p2788_p3 = pnand %p2787_p2, %p2783_p13 }
 0x191   : > { %v1670_v6 = vpop.f32.mrf.mxu2  ;;  %v1757_v7 = vadd.f32 %v1756_v26, %v1668_v60  ;;  %v1008_v43 = vadd.f32 %v1007_v0, %v3291_v56  ;;  %v1591_v32 = vpop.f32.mrf.mxu3 }
 0x193   : > { %1046 = vmatmul.bf16.gmra.mxu1 %v2187_v2  ;;  %2570 = vmatmul.msk.bf16.gmra.mxu0 %vm830_vm0, %v2471_v14  ;;  %v1824_v62 = vmul.f32 %v3346_v27, %v1757_v7  ;;  %v1097_v19 = vadd.f32 %v3264_v45, %v1008_v43 }
 0x195   : > { %v1860_v35 = vadd.f32 %v3353_v23, %v1824_v62  ;;  %v1582_v42 = vadd.f32 %v3456_v5, %v1097_v19 }
 0x197   : > { %1892 = vst.msk [vmem:[%s3367_s19 + $0x58] sm:$0xff] %vm830_vm0, %v1860_v35  ;;  %v1671_v56 = vadd.f32 %v1670_v6, %v1582_v42 }
 0x198   : > { %v1761_v39 = vpop.f32.mrf.mxu0  ;;  %v1009_v9 = vpop.f32.mrf.mxu1 }
 0x199   : > { %v1672_v38 = vpop.f32.mrf.mxu2  ;;  %v1760_v10 = vadd.f32 %v1759_v13, %v1671_v56  ;;  %v1010_v45 = vadd.f32 %v1009_v9, %v3300_v20  ;;  %v1593_v61 = vpop.f32.mrf.mxu3 }
 0x19b   : > { %v1825_v44 = vmul.f32 %v3346_v27, %v1760_v10  ;;  %v1099_v5 = vadd.f32 %v3275_v59, %v1010_v45 }
 0x19d   : > { %v1861_v57 = vadd.f32 %v3353_v23, %v1825_v44  ;;  %v1584_v50 = vadd.f32 %v3473_v41, %v1099_v5 }
 0x19e   : > { %1714 = vmatmul.bf16.gmra.mxu2 %v2479_v40 }
 0x19f   : > { %1893 = vst.msk [vmem:[%s3367_s19 + $0x60] sm:$0xff] %vm830_vm0, %v1861_v57  ;;  %v1673_v26 = vadd.f32 %v1672_v38, %v1584_v50 }
 0x1a0   : > { %v1764_v3 = vpop.f32.mrf.mxu0  ;;  %v1012_v1 = vpop.f32.mrf.mxu1 }
 0x1a1   : > { %v1675_v20 = vpop.f32.mrf.mxu2  ;;  %v1762_v63 = vadd.f32 %v1761_v39, %v1673_v26  ;;  %v1013_v59 = vadd.f32 %v1012_v1, %v3312_v18  ;;  %v1596_v2 = vpop.f32.mrf.mxu3 }
 0x1a3   : > { %1051 = vmatmul.bf16.gmra.mxu1 %v2199_v33  ;;  %2571 = vmatmul.msk.bf16.gmra.mxu0 %vm830_vm0, %v2483_v4  ;;  %v1826_v37 = vmul.f32 %v3346_v27, %v1762_v63  ;;  %v1102_v41 = vadd.f32 %v3289_v55, %v1013_v59 }
 0x1a5   : > { %v1862_v31 = vadd.f32 %v3353_v23, %v1826_v37  ;;  %v1587_v21 = vadd.f32 %v3483_v52, %v1102_v41 }
 0x1a7   : > { %1894 = vst.msk [vmem:[%s3367_s19 + $0x68] sm:$0xff] %vm830_vm0, %v1862_v31  ;;  %v1676_v12 = vadd.f32 %v1675_v20, %v1587_v21  ;;  %v3707_v21 = vld [vmem:[#allocation9_spill] sm:$0xff] }
 0x1a8   : > { %v1766_v24 = vpop.f32.mrf.mxu0  ;;  %v1014_v46 = vpop.f32.mrf.mxu1 }
 0x1a9   : > { %v1677_v49 = vpop.f32.mrf.mxu2  ;;  %v1765_v16 = vadd.f32 %v1764_v3, %v1676_v12  ;;  %v1015_v18 = vadd.f32 %v1014_v46, %v3323_v58  ;;  %v1598_v35 = vpop.f32.mrf.mxu3 }
 0x1ab   : > { %v1827_v14 = vmul.f32 %v3346_v27, %v1765_v16  ;;  %v1104_v60 = vadd.f32 %v3298_v17, %v1015_v18 }
 0x1ad   : > { %v1863_v55 = vadd.f32 %v3353_v23, %v1827_v14  ;;  %v1589_v6 = vadd.f32 %v3498_v30, %v1104_v60 }
 0x1af   : > { %1895 = vst.msk [vmem:[%s3367_s19 + $0x70] sm:$0xff] %vm830_vm0, %v1863_v55  ;;  %v1678_v52 = vadd.f32 %v1677_v49, %v1589_v6  ;;  %v3709_v6 = vld [vmem:[#allocation11_spill] sm:$0xff] }
 0x1b0   : > { %v1769_v0 = vpop.f32.mrf.mxu0  ;;  %v1017_v7 = vpop.f32.mrf.mxu1 }
 0x1b1   : > { %v1680_v13 = vpop.f32.mrf.mxu2  ;;  %v1767_v43 = vadd.f32 %v1766_v24, %v1678_v52  ;;  %v1018_v62 = vadd.f32 %v1017_v7, %v3143_v28  ;;  %v1601_v10 = vpop.f32.mrf.mxu3  ;;  %v3708_v24 = vld [vmem:[#allocation5_spill] sm:$0xff] }
 0x1b3   : > { %v1828_v58 = vmul.f32 %v3346_v27, %v1767_v43  ;;  %v1107_v19 = vadd.f32 %v3310_v51, %v1018_v62 }
 0x1b5   : > { %v1864_v17 = vadd.f32 %v3353_v23, %v1828_v58  ;;  %v1592_v42 = vadd.f32 %v1591_v32, %v1107_v19 }
 0x1b7   : > { %1896 = vst.msk [vmem:[%s3367_s19 + $0x78] sm:$0xff] %vm830_vm0, %v1864_v17  ;;  %v1681_v30 = vadd.f32 %v1680_v13, %v1592_v42 }
 0x1b8   : > { %v1771_v15 = vpop.f32.mrf.mxu0  ;;  %v1019_v56 = vpop.f32.mrf.mxu1 }
 0x1b9   : > { %v1682_v53 = vpop.f32.mrf.mxu2  ;;  %v1770_v38 = vadd.f32 %v1769_v0, %v1681_v30  ;;  %v1020_v39 = vadd.f32 %v1019_v56, %v3154_v34  ;;  %v1603_v26 = vpop.f32.mrf.mxu3  ;;  %v3710_v0 = vld [vmem:[#allocation6_spill] sm:$0xff] }
 0x1bb   : > { %v1829_v28 = vmul.f32 %v3346_v27, %v1770_v38  ;;  %v1109_v9 = vadd.f32 %v3321_v25, %v1020_v39  ;;  %v3712_v38 = vld [vmem:[#allocation7_spill] sm:$0xff] }
 0x1bd   : > { %v1865_v51 = vadd.f32 %v3353_v23, %v1829_v28  ;;  %v1594_v40 = vadd.f32 %v1593_v61, %v1109_v9 }
 0x1bf   : > { %1897 = vst.msk [vmem:[%s3367_s19 + $0x80] sm:$0xff] %vm830_vm0, %v1865_v51  ;;  %v1683_v32 = vadd.f32 %v1682_v53, %v1594_v40  ;;  %v3711_v53 = vld [vmem:[#allocation13_spill] sm:$0xff] }
 0x1c0   : > { %v1774_v47 = vpop.f32.mrf.mxu0  ;;  %v1022_v44 = vpop.f32.mrf.mxu1 }
 0x1c1   : > { %v1685_v45 = vpop.f32.mrf.mxu2  ;;  %v1772_v5 = vadd.f32 %v1771_v15, %v1683_v32  ;;  %v1023_v8 = vadd.f32 %v1022_v44, %v3168_v48  ;;  %v1606_v49 = vpop.f32.mrf.mxu3  ;;  %v3713_v44 = vld [vmem:[#allocation15_spill] sm:$0xff] }
 0x1c3   : > { %v1830_v34 = vmul.f32 %v3346_v27, %v1772_v5  ;;  %v1112_v29 = vadd.f32 %v3125_v11, %v1023_v8 }
 0x1c5   : > { %v1866_v25 = vadd.f32 %v3353_v23, %v1830_v34  ;;  %v1597_v36 = vadd.f32 %v1596_v2, %v1112_v29  ;;  %v3714_v34 = vld [vmem:[#allocation8_spill] sm:$0xff] }
 0x1c7   : > { %1898 = vst.msk [vmem:[%s3367_s19 + $0x88] sm:$0xff] %vm830_vm0, %v1866_v25  ;;  %v1686_v57 = vadd.f32 %v1685_v45, %v1597_v36 }
 0x1c8   : > { %v1776_v33 = vpop.f32.mrf.mxu0  ;;  %v1024_v4 = vpop.f32.mrf.mxu1 }
 0x1c9   : > { %v1687_v50 = vpop.f32.mrf.mxu2  ;;  %v1775_v20 = vadd.f32 %v1774_v47, %v1686_v57  ;;  %v1025_v3 = vadd.f32 %v1024_v4, %v3179_v54  ;;  %v1608_v43 = vpop.f32.mrf.mxu3 }
 0x1cb   : > { %v1831_v48 = vmul.f32 %v3346_v27, %v1775_v20  ;;  %v1114_v1 = vadd.f32 %v3137_v22, %v1025_v3  ;;  %v3715_v3 = vld [vmem:[#allocation17_spill] sm:$0xff] }
 0x1cd   : > { %v1867_v11 = vadd.f32 %v3353_v23, %v1831_v48  ;;  %v1599_v61 = vadd.f32 %v1598_v35, %v1114_v1 }
 0x1cf   : > { %1899 = vst.msk [vmem:[%s3367_s19 + $0x90] sm:$0xff] %vm830_vm0, %v1867_v11  ;;  %v1688_v63 = vadd.f32 %v1687_v50, %v1599_v61  ;;  %v3716_v11 = vld [vmem:[#allocation10_spill] sm:$0xff] }
 0x1d0   : > { %v1779_v37 = vpop.f32.mrf.mxu0  ;;  %v1027_v41 = vpop.f32.mrf.mxu1 }
 0x1d1   : > { %v1690_v59 = vpop.f32.mrf.mxu2  ;;  %v1777_v31 = vadd.f32 %v1776_v33, %v1688_v63  ;;  %v1028_v12 = vadd.f32 %v1027_v41, %v3707_v21  ;;  %v1611_v51 = vpop.f32.mrf.mxu3 }
 0x1d3   : > { %v1832_v54 = vmul.f32 %v3346_v27, %v1777_v31  ;;  %v1117_v46 = vadd.f32 %v3708_v24, %v1028_v12 }
 0x1d5   : > { %v1868_v22 = vadd.f32 %v3353_v23, %v1832_v54  ;;  %v1602_v16 = vadd.f32 %v1601_v10, %v1117_v46 }
 0x1d7   : > { %1900 = vst.msk [vmem:[%s3367_s19 + $0x98] sm:$0xff] %vm830_vm0, %v1868_v22  ;;  %v1691_v18 = vadd.f32 %v1690_v59, %v1602_v16  ;;  %v3718_v22 = vld [vmem:[#allocation12_spill] sm:$0xff] }
 0x1d8   : > { %v1781_v14 = vpop.f32.mrf.mxu0  ;;  %v1029_v60 = vpop.f32.mrf.mxu1 }
 0x1d9   : > { %v1692_v2 = vpop.f32.mrf.mxu2  ;;  %v1780_v55 = vadd.f32 %v1779_v37, %v1691_v18  ;;  %v1030_v52 = vadd.f32 %v1029_v60, %v3709_v6 }
 0x1db   : > { %v1833_v13 = vmul.f32 %v3346_v27, %v1780_v55  ;;  %v1119_v7 = vadd.f32 %v3710_v0, %v1030_v52 }
 0x1dd   : > { %v1869_v62 = vadd.f32 %v3353_v23, %v1833_v13  ;;  %v1604_v58 = vadd.f32 %v1603_v26, %v1119_v7  ;;  %v1613_v26 = vpop.f32.mrf.mxu3  ;;  %v3719_v13 = vld [vmem:[#allocation21_spill] sm:$0xff] }
 0x1df   : > { %1901 = vst.msk [vmem:[%s3367_s19 + $0xa0] sm:$0xff] %vm830_vm0, %v1869_v62  ;;  %v1693_v19 = vadd.f32 %v1692_v2, %v1604_v58 }
 0x1e0   : > { %v1784_v17 = vpop.f32.mrf.mxu0  ;;  %v1032_v42 = vpop.f32.mrf.mxu1 }
 0x1e1   : > { %v1695_v35 = vpop.f32.mrf.mxu2  ;;  %v1782_v30 = vadd.f32 %v1781_v14, %v1693_v19  ;;  %v1033_v15 = vadd.f32 %v1032_v42, %v3711_v53 }
 0x1e3   : > { %v1834_v56 = vmul.f32 %v3346_v27, %v1782_v30  ;;  %v1122_v39 = vadd.f32 %v3712_v38, %v1033_v15 }
 0x1e5   : > { %v1870_v28 = vadd.f32 %v3353_v23, %v1834_v56  ;;  %v1607_v9 = vadd.f32 %v1606_v49, %v1122_v39  ;;  %v3717_v49 = vld [vmem:[#allocation19_spill] sm:$0xff]  ;;  %v1616_v24 = vpop.f32.mrf.mxu3 }
 0x1e6   : > { %v3721_v56 = vld [vmem:[#allocation23_spill] sm:$0xff] }
 0x1e7   : > { %1902 = vst.msk [vmem:[%s3367_s19 + $0xa8] sm:$0xff] %vm830_vm0, %v1870_v28  ;;  %v1696_v40 = vadd.f32 %v1695_v35, %v1607_v9  ;;  %v3722_v28 = vld [vmem:[#allocation16_spill] sm:$0xff] }
 0x1e8   : > { %v1786_v32 = vpop.f32.mrf.mxu0  ;;  %v1034_v45 = vpop.f32.mrf.mxu1 }
 0x1e9   : > { %v1697_v10 = vpop.f32.mrf.mxu2  ;;  %v1785_v47 = vadd.f32 %v1784_v17, %v1696_v40  ;;  %v1035_v5 = vadd.f32 %v1034_v45, %v3713_v44 }
 0x1eb   : > { %v1835_v8 = vmul.f32 %v3346_v27, %v1785_v47  ;;  %v1124_v29 = vadd.f32 %v3714_v34, %v1035_v5  ;;  %v3723_v5 = vld [vmem:[#allocation25_spill] sm:$0xff] }
 0x1ed   : > { %v1871_v25 = vadd.f32 %v3353_v23, %v1835_v8  ;;  %v1609_v36 = vadd.f32 %v1608_v43, %v1124_v29  ;;  %v3720_v43 = vld [vmem:[#allocation14_spill] sm:$0xff]  ;;  %v1618_v58 = vpop.f32.mrf.mxu3 }
 0x1ef   : > { %1903 = vst.msk [vmem:[%s3367_s19 + $0xb0] sm:$0xff] %vm830_vm0, %v1871_v25  ;;  %v1698_v57 = vadd.f32 %v1697_v10, %v1609_v36  ;;  %v3724_v25 = vld [vmem:[#allocation18_spill] sm:$0xff] }
 0x1f0   : > { %v1789_v33 = vpop.f32.mrf.mxu0  ;;  %v1037_v4 = vpop.f32.mrf.mxu1 }
 0x1f1   : > { %v1700_v50 = vpop.f32.mrf.mxu2  ;;  %v1787_v20 = vadd.f32 %v1786_v32, %v1698_v57  ;;  %v1038_v48 = vadd.f32 %v1037_v4, %v3715_v3  ;;  %v3725_v3 = vld [vmem:[#allocation26_spill] sm:$0xff] }
 0x1f3   : > { %v1836_v1 = vmul.f32 %v3346_v27, %v1787_v20  ;;  %v1127_v61 = vadd.f32 %v3716_v11, %v1038_v48 }
 0x1f5   : > { %v1872_v63 = vadd.f32 %v3353_v23, %v1836_v1  ;;  %v1612_v59 = vadd.f32 %v1611_v51, %v1127_v61  ;;  %v1621_v10 = vpop.f32.mrf.mxu3  ;;  %v3726_v61 = vld [vmem:[#allocation20_spill] sm:$0xff] }
 0x1f7   : > { %1904 = vst.msk [vmem:[%s3367_s19 + $0xb8] sm:$0xff] %vm830_vm0, %v1872_v63  ;;  %v1701_v37 = vadd.f32 %v1700_v50, %v1612_v59 }
 0x1f8   : > { %v1791_v31 = vpop.f32.mrf.mxu0  ;;  %v1039_v21 = vpop.f32.mrf.mxu1 }
 0x1f9   : > { %v1702_v41 = vpop.f32.mrf.mxu2  ;;  %v1790_v12 = vadd.f32 %v1789_v33, %v1701_v37  ;;  %v1040_v54 = vadd.f32 %v1039_v21, %v3717_v49  ;;  %v3727_v49 = vld [vmem:[#allocation27_spill] sm:$0xff] }
 0x1fb   : > { %v1837_v46 = vmul.f32 %v3346_v27, %v1790_v12  ;;  %v1129_v16 = vadd.f32 %v3718_v22, %v1040_v54  ;;  %v3728_v22 = vld [vmem:[#allocation22_spill] sm:$0xff] }
 0x1fd   : > { %v1873_v18 = vadd.f32 %v3353_v23, %v1837_v46  ;;  %v1614_v2 = vadd.f32 %v1613_v26, %v1129_v16  ;;  %v1623_v4 = vpop.f32.mrf.mxu3 }
 0x1ff   : > { %1905 = vst.msk [vmem:[%s3367_s19 + $0xc0] sm:$0xff] %vm830_vm0, %v1873_v18  ;;  %v1703_v14 = vadd.f32 %v1702_v41, %v1614_v2 }
 0x200   : > { %v1794_v55 = vpop.f32.mrf.mxu0  ;;  %v1042_v6 = vpop.f32.mrf.mxu1 }
 0x201   : > { %v1705_v60 = vpop.f32.mrf.mxu2  ;;  %v1792_v52 = vadd.f32 %v1791_v31, %v1703_v14  ;;  %v1043_v0 = vadd.f32 %v1042_v6, %v3719_v13  ;;  %v3729_v13 = vld [vmem:[#allocation28_spill] sm:$0xff] }
 0x203   : > { %v1838_v7 = vmul.f32 %v3346_v27, %v1792_v52  ;;  %v1132_v62 = vadd.f32 %v3720_v43, %v1043_v0  ;;  %v3730_v43 = vld [vmem:[#allocation24_spill] sm:$0xff] }
 0x205   : > { %v1874_v19 = vadd.f32 %v3353_v23, %v1838_v7  ;;  %v1617_v35 = vadd.f32 %v1616_v24, %v1132_v62  ;;  %v1626_v24 = vpop.f32.mrf.mxu3 }
 0x207   : > { %1906 = vst.msk [vmem:[%s3367_s19 + $0xc8] sm:$0xff] %vm830_vm0, %v1874_v19  ;;  %v1706_v17 = vadd.f32 %v1705_v60, %v1617_v35 }
 0x208   : > { %v1044_v30 = vpop.f32.mrf.mxu1  ;;  %v1796_v53 = vpop.f32.mrf.mxu0 }
 0x209   : > { %v1707_v42 = vpop.f32.mrf.mxu2  ;;  %v1795_v15 = vadd.f32 %v1794_v55, %v1706_v17  ;;  %v1045_v38 = vadd.f32 %v1044_v30, %v3721_v56 }
 0x20b   : > { %v1839_v39 = vmul.f32 %v3346_v27, %v1795_v15  ;;  %v1134_v9 = vadd.f32 %v3722_v28, %v1045_v38 }
 0x20d   : > { %v1875_v51 = vadd.f32 %v3353_v23, %v1839_v39  ;;  %v1619_v40 = vadd.f32 %v1618_v58, %v1134_v9  ;;  %v1628_v58 = vpop.f32.mrf.mxu3 }
 0x20f   : > { %1907 = vst.msk [vmem:[%s3367_s19 + $0xd0] sm:$0xff] %vm830_vm0, %v1875_v51  ;;  %v1708_v32 = vadd.f32 %v1707_v42, %v1619_v40 }
 0x210   : > { %v1047_v47 = vpop.f32.mrf.mxu1  ;;  %v1799_v34 = vpop.f32.mrf.mxu0 }
 0x211   : > { %v1710_v45 = vpop.f32.mrf.mxu2  ;;  %v1797_v44 = vadd.f32 %v1796_v53, %v1708_v32  ;;  %v1048_v8 = vadd.f32 %v1047_v47, %v3723_v5 }
 0x213   : > { %v1840_v29 = vmul.f32 %v3346_v27, %v1797_v44  ;;  %v1137_v36 = vadd.f32 %v3724_v25, %v1048_v8 }
 0x215   : > { %v1876_v57 = vadd.f32 %v3353_v23, %v1840_v29  ;;  %v1622_v50 = vadd.f32 %v1621_v10, %v1137_v36 }
 0x217   : > { %1908 = vst.msk [vmem:[%s3367_s19 + $0xd8] sm:$0xff] %vm830_vm0, %v1876_v57  ;;  %v1711_v33 = vadd.f32 %v1710_v45, %v1622_v50 }
 0x218   : > { %v1049_v26 = vpop.f32.mrf.mxu1  ;;  %v1801_v59 = vpop.f32.mrf.mxu0 }
 0x219   : > { %v1800_v20 = vadd.f32 %v1799_v34, %v1711_v33  ;;  %v1050_v48 = vadd.f32 %v1049_v26, %v3725_v3  ;;  %v1712_v1 = vpop.f32.mrf.mxu2 }
 0x21b   : > { %v1841_v11 = vmul.f32 %v3346_v27, %v1800_v20  ;;  %v1139_v63 = vadd.f32 %v3726_v61, %v1050_v48 }
 0x21d   : > { %v1877_v37 = vadd.f32 %v3353_v23, %v1841_v11  ;;  %v1624_v41 = vadd.f32 %v1623_v4, %v1139_v63 }
 0x21f   : > { %1909 = vst.msk [vmem:[%s3367_s19 + $0xe0] sm:$0xff] %vm830_vm0, %v1877_v37  ;;  %v1713_v31 = vadd.f32 %v1712_v1, %v1624_v41 }
 0x220   : > { %v1052_v21 = vpop.f32.mrf.mxu1  ;;  %v1804_v60 = vpop.f32.mrf.mxu0 }
 0x221   : > { %v1802_v12 = vadd.f32 %v1801_v59, %v1713_v31  ;;  %v1053_v54 = vadd.f32 %v1052_v21, %v3727_v49  ;;  %v1715_v18 = vpop.f32.mrf.mxu2 }
 0x223   : > { %v1842_v46 = vmul.f32 %v3346_v27, %v1802_v12  ;;  %v1142_v16 = vadd.f32 %v3728_v22, %v1053_v54 }
 0x225   : > { %v1878_v2 = vadd.f32 %v3353_v23, %v1842_v46  ;;  %v1627_v14 = vadd.f32 %v1626_v24, %v1142_v16 }
 0x227   : > { %1910 = vst.msk [vmem:[%s3367_s19 + $0xe8] sm:$0xff] %vm830_vm0, %v1878_v2  ;;  %v1716_v55 = vadd.f32 %v1715_v18, %v1627_v14 }
 0x228   : > { %v1054_v6 = vpop.f32.mrf.mxu1  ;;  %v1806_v30 = vpop.f32.mrf.mxu0 }
 0x229   : > { %v1805_v52 = vadd.f32 %v1804_v60, %v1716_v55  ;;  %v1055_v0 = vadd.f32 %v1054_v6, %v3729_v13  ;;  %v1717_v17 = vpop.f32.mrf.mxu2 }
 0x22b   : > { %v1843_v7 = vmul.f32 %v3346_v27, %v1805_v52  ;;  %v1144_v62 = vadd.f32 %v3730_v43, %v1055_v0 }
 0x22d   : > { %v1879_v19 = vadd.f32 %v3353_v23, %v1843_v7  ;;  %v1629_v35 = vadd.f32 %v1628_v58, %v1144_v62 }
 0x22f   : > { %1911 = vst.msk [vmem:[%s3367_s19 + $0xf0] sm:$0xff] %vm830_vm0, %v1879_v19  ;;  %v1718_v42 = vadd.f32 %v1717_v17, %v1629_v35 }
 0x231   : > { %v1807_v53 = vadd.f32 %v1806_v30, %v1718_v42 }
 0x233   : > { %v1844_v15 = vmul.f32 %v3346_v27, %v1807_v53 }
 0x235   : > { %v1880_v56 = vadd.f32 %v3353_v23, %v1844_v15 }
 0x237   : > { %1912 = vst.msk [vmem:[%s3367_s19 + $0xf8] sm:$0xff] %vm830_vm0, %v1880_v56 }
 0x238   : > { %2791 = shalt.err (!%p2788_p3)
}
 0x239   : > { %s2828_s13 = smov 128   ;;  %s2829_s19 = smov 8  }
 0x23a   : > { %2721 = dma.vmem_to_hbm [thread:$0]  (%p2903_p5), %s1927_s9, 4096, %s1929_s11, %s1914_s25, %s2828_s13, %s2828_s13, %s2829_s19  }
 0x23b PF: > { %p2727_p4 = scmp.ge.s32.totalorder %s2826_s24, 2  ;;  %s1943_s10 = sand.u32 1, %s2814_s21  }
 0x23c   : > { %s1944_s26 = scalar_lea.sflag [#allocation3], %s1943_s10 }
 0x23d   : > { %p2724_p7 = pnand %p2727_p4, %p2907_p6 }
 0x23f   : > { %p2725_p8 = pneg %p2724_p7 }
 0x241   : > { %2809 = dma.done.wait (%p2725_p8), %s1944_s26, 4096  }
 0x242   : > { %2811 = vsyncadd (%p2725_p8), %s1944_s26, 4294963200  ;;  %p16_p9 = scmp.ge.s32.totalorder %s2890_s27, 4   ;;  %s3731_s21 = smov %s2818_s22 }
 0x243   : > { %s3732_s22 = smov %s2822_s23  ;;  %s3733_s23 = smov %s2901_s30 }
 0x244   : > { %s3734_s24 = smov %s2890_s27  ;;  %18 = sbr.rel (!%p16_p9) target bundleno = 3 (0x3), region = 82 }
 0x249   :  { %1950 = vsyncpa [#allocation3], 1 }
 0x24a   :  { %1952 = vsyncpa [#allocation3 + $0x1], 1 }

</bundles_post_ra>
